<compile_context>
chip_gen: v7x
topology: tpu7x:2x2x1
jax: 0.10.0
libtpu: 0.0.40
codegen_flags: <defaults>
</compile_context>

<pallas_src>
import functools

import jax
import jax.numpy as jnp
from jax import lax
from jax.experimental import pallas as pl
from jax.experimental.pallas import tpu as pltpu

LANE = 128   # TPU lane width
SUB = 8      # TPU sublane width

VMEM_BUDGET = 40 << 20   # target working-set bound (fits v7x's 64 MiB VMEM)


def _round_up(x, m):
    return (x + m - 1) // m * m


def _bf16(x):
    return x.astype(jnp.bfloat16)


# ----------------------------- Pallas kernels -----------------------------

def _linear_kernel(x_ref, w_ref, b_ref, o_ref):
    # (tm, K) @ (K, Np) + (1, Np); bf16 operands, fp32 accumulation.
    o_ref[...] = (jnp.dot(x_ref[...].astype(jnp.bfloat16), w_ref[...],
                          preferred_element_type=jnp.float32)
                  + b_ref[...]).astype(o_ref.dtype)


def _linear_logsoftmax_kernel(x_ref, w_ref, b_ref, o_ref, *, n_valid):
    # Fused Linear + LogSoftmax over the first n_valid lanes of the padded
    # (lane-dense) output block; padded lanes are masked out of the reduction.
    y = (jnp.dot(x_ref[...].astype(jnp.bfloat16), w_ref[...],
                 preferred_element_type=jnp.float32) + b_ref[...])
    lane = lax.broadcasted_iota(jnp.int32, y.shape, 1)
    valid = lane < n_valid
    y = jnp.where(valid, y, -1e30)
    m = jnp.max(y, axis=-1, keepdims=True)
    z = y - m
    lse = jnp.log(jnp.sum(jnp.where(valid, jnp.exp(z), 0.0),
                          axis=-1, keepdims=True))
    o_ref[...] = z - lse


def _bilstm2_kernel(x_ref, wih0_ref, whh0_ref, b0_ref,
                    wih1_ref, whh1_ref, b1_ref,
                    o_ref, g_scr, y_scr, *, h_pad):
    # Fully fused 2-layer bidirectional LSTM (padded layout, gate order i,f,o,g).
    #   x_ref : (L, Bt, Dp)       bf16 time-major input (Dp multiple of 128)
    #   wih*  : (Dp|2Hp, 8*Hp)    bf16  [fwd gates | bwd gates]
    #   whh*  : (2*Hp, 8*Hp)      bf16  block-diagonal [whh_f | whh_b]
    #   b*    : (1, 8*Hp)         f32
    #   o_ref : (L, Bt, 2*Hp)     bf16  fwd h in lanes [0:Hp], bwd in [Hp:2Hp]
    #   g_scr : (L, Bt, 8*Hp)     bf16  hoisted gate pre-activations (shared by layers)
    #   y_scr : (L, Bt, 2*Hp)     bf16  layer-0 output (inter-layer buffer)
    L, Bt, Dp = x_ref.shape
    Hp = h_pad
    G2 = 8 * Hp

    def project(in2d, wih_ref, b_ref):
        # Hoisted input projection for all timesteps of one layer, both
        # directions fused in one (L*Bt, K) @ (K, 8*Hp) MXU matmul.
        pre = (jnp.dot(in2d, wih_ref[...], preferred_element_type=jnp.float32)
               + b_ref[...])
        g_scr[...] = pre.astype(jnp.bfloat16).reshape(L, Bt, G2)

    def run_layer(whh_ref, out_ref):
        def step(t, carry):
            h2, c_f, c_b = carry
            # one block-diagonal recurrence matmul for both directions (K=2*Hp)
            rec = jnp.dot(h2.astype(jnp.bfloat16), whh_ref[...],
                          preferred_element_type=jnp.float32)      # (Bt, 8*Hp)
            tb = L - 1 - t
            gf = g_scr[t, :, 0:4 * Hp].astype(jnp.float32) + rec[:, 0:4 * Hp]
            gb = g_scr[tb, :, 4 * Hp:G2].astype(jnp.float32) + rec[:, 4 * Hp:G2]
            # gate order (i, f, o, g): one sigmoid over 3*Hp lanes, one tanh
            sf = jax.nn.sigmoid(gf[:, 0:3 * Hp])
            sb = jax.nn.sigmoid(gb[:, 0:3 * Hp])
            c_f = sf[:, Hp:2 * Hp] * c_f + sf[:, 0:Hp] * jnp.tanh(gf[:, 3 * Hp:4 * Hp])
            c_b = sb[:, Hp:2 * Hp] * c_b + sb[:, 0:Hp] * jnp.tanh(gb[:, 3 * Hp:4 * Hp])
            h_f = sf[:, 2 * Hp:3 * Hp] * jnp.tanh(c_f)
            h_b = sb[:, 2 * Hp:3 * Hp] * jnp.tanh(c_b)
            out_ref[t, :, 0:Hp] = h_f.astype(jnp.bfloat16)
            out_ref[tb, :, Hp:2 * Hp] = h_b.astype(jnp.bfloat16)
            return jnp.concatenate([h_f, h_b], axis=-1), c_f, c_b

        h2 = jnp.zeros((Bt, 2 * Hp), jnp.float32)
        c0 = jnp.zeros((Bt, Hp), jnp.float32)
        lax.fori_loop(0, L, step, (h2, c0, c0))

    # ---- layer 0: input x -> y_scr ----
    project(x_ref[...].reshape(L * Bt, Dp), wih0_ref, b0_ref)
    run_layer(whh0_ref, y_scr)
    # ---- layer 1: y_scr -> o_ref (gate scratch reused) ----
    project(y_scr[...].reshape(L * Bt, 2 * Hp), wih1_ref, b1_ref)
    run_layer(whh1_ref, o_ref)


# ----------------------------- wrappers -----------------------------

def pallas_linear(x2d, w_pad, b_pad, *, out_dtype=jnp.float32, tile_m=512):
    M, K = x2d.shape
    Np = w_pad.shape[1]
    tm = min(tile_m, _round_up(M, SUB))
    Mp = _round_up(M, tm)
    if Mp != M:
        x2d = jnp.pad(x2d, ((0, Mp - M), (0, 0)))
    out = pl.pallas_call(
        _linear_kernel,
        out_shape=jax.ShapeDtypeStruct((Mp, Np), out_dtype),
        grid_spec=pltpu.PrefetchScalarGridSpec(
            num_scalar_prefetch=0, grid=(Mp // tm,),
            in_specs=[pl.BlockSpec((tm, K), lambda i: (i, 0)),
                      pl.BlockSpec((K, Np), lambda i: (0, 0)),
                      pl.BlockSpec((1, Np), lambda i: (0, 0))],
            out_specs=pl.BlockSpec((tm, Np), lambda i: (i, 0))),
        compiler_params=pltpu.CompilerParams(
            dimension_semantics=("parallel",)),
    )(x2d, w_pad, b_pad)
    return out[:M]


def pallas_linear_logsoftmax(x2d, w_pad, b_pad, *, n_valid, tile_m=512):
    M, K = x2d.shape
    Np = w_pad.shape[1]
    tm = min(tile_m, _round_up(M, SUB))
    Mp = _round_up(M, tm)
    if Mp != M:
        x2d = jnp.pad(x2d, ((0, Mp - M), (0, 0)))
    kern = functools.partial(_linear_logsoftmax_kernel, n_valid=n_valid)
    out = pl.pallas_call(
        kern,
        out_shape=jax.ShapeDtypeStruct((Mp, Np), jnp.float32),
        grid_spec=pltpu.PrefetchScalarGridSpec(
            num_scalar_prefetch=0, grid=(Mp // tm,),
            in_specs=[pl.BlockSpec((tm, K), lambda i: (i, 0)),
                      pl.BlockSpec((K, Np), lambda i: (0, 0)),
                      pl.BlockSpec((1, Np), lambda i: (0, 0))],
            out_specs=pl.BlockSpec((tm, Np), lambda i: (i, 0))),
        compiler_params=pltpu.CompilerParams(
            dimension_semantics=("parallel",)),
    )(x2d, w_pad, b_pad)
    return out[:M]


def _lstm_vmem_bytes(L, bt, Dp, Hp):
    """Rough VMEM working-set estimate for the fused 2-layer BiLSTM kernel."""
    bf = 2
    G2 = 8 * Hp
    io = 2 * L * bt * Dp * bf + 2 * L * bt * 2 * Hp * bf        # double-buffered in/out
    w = 2 * ((Dp * G2 + 3 * (2 * Hp) * G2) * bf + 2 * G2 * 4)   # wih0/whh0/wih1/whh1 + biases
    scr = L * bt * G2 * bf + L * bt * 2 * Hp * bf               # gate + inter-layer scratch
    tmp = L * bt * G2 * 4                                       # fp32 projection temporary
    return io + w + scr + tmp


def _pick_b_tile(L, B, Dp, Hp, budget=VMEM_BUDGET):
    """Largest multiple-of-8 batch tile (<=128) whose VMEM estimate fits."""
    bt = min(128, _round_up(B, SUB))
    while bt > SUB and _lstm_vmem_bytes(L, bt, Dp, Hp) > budget:
        bt -= SUB
    return max(bt, SUB)


def pallas_bilstm_stack(x_pad, lstm_pad, *, h_pad=LANE, b_tile=SUB):
    # x_pad: (L, Bp, Dp) bf16 time-major, Bp % b_tile == 0, Dp % 128 == 0.
    L, Bp, Dp = x_pad.shape
    (wih0, whh0, b0), (wih1, whh1, b1) = lstm_pad
    G2 = 8 * h_pad
    kern = functools.partial(_bilstm2_kernel, h_pad=h_pad)

    est = _lstm_vmem_bytes(L, b_tile, Dp, h_pad)
    vlimit = int(min(max(2 * est, 32 << 20), 64 << 20))

    return pl.pallas_call(
        kern,
        out_shape=jax.ShapeDtypeStruct((L, Bp, 2 * h_pad), jnp.bfloat16),
        grid_spec=pltpu.PrefetchScalarGridSpec(
            num_scalar_prefetch=0, grid=(Bp // b_tile,),
            in_specs=[pl.BlockSpec((L, b_tile, Dp), lambda i: (0, i, 0)),
                      pl.BlockSpec((Dp, G2), lambda i: (0, 0)),
                      pl.BlockSpec((2 * h_pad, G2), lambda i: (0, 0)),
                      pl.BlockSpec((1, G2), lambda i: (0, 0)),
                      pl.BlockSpec((2 * h_pad, G2), lambda i: (0, 0)),
                      pl.BlockSpec((2 * h_pad, G2), lambda i: (0, 0)),
                      pl.BlockSpec((1, G2), lambda i: (0, 0))],
            out_specs=pl.BlockSpec((L, b_tile, 2 * h_pad),
                                   lambda i: (0, i, 0)),
            scratch_shapes=[pltpu.VMEM((L, b_tile, G2), jnp.bfloat16),
                            pltpu.VMEM((L, b_tile, 2 * h_pad), jnp.bfloat16)]),
        compiler_params=pltpu.CompilerParams(
            dimension_semantics=("parallel",),
            vmem_limit_bytes=vlimit),
    )(x_pad, wih0, whh0, b0, wih1, whh1, b1)


# --------------------- loss (plain-JAX glue, scalar reduction) ---------------------

def _ce_ignore_index(logits, labels, ignore_index=-1):
    valid = labels != ignore_index
    safe = jnp.where(valid, labels, 0)
    logp = jax.nn.log_softmax(logits, axis=-1)
    nll = -jnp.take_along_axis(logp, safe[:, None], axis=-1)[:, 0]
    nll = jnp.where(valid, nll, 0.0)
    return nll.sum() / jnp.maximum(valid.sum(), 1).astype(nll.dtype)


def calc_loss_helper(logits, labels, attention_mask, num_even_tags, num_odd_tags):
    odd_logits = logits[..., :num_odd_tags]
    even_logits = logits[..., num_odd_tags:num_odd_tags + num_even_tags]
    odd_labels = labels // (num_even_tags + 1) - 1
    even_labels = labels % (num_even_tags + 1) - 1
    odd_logits = odd_logits.reshape(-1, num_odd_tags)
    even_logits = even_logits.reshape(-1, num_even_tags)
    odd_labels = odd_labels.reshape(-1)
    even_labels = even_labels.reshape(-1)
    if attention_mask is not None:
        active = attention_mask.reshape(-1) == 1
        even_labels = jnp.where(active, even_labels, -1)
        odd_labels = jnp.where(active, odd_labels, -1)
    return (_ce_ignore_index(even_logits, even_labels)
            + _ce_ignore_index(odd_logits, odd_labels))


# ----------------------------- model forward -----------------------------

def bert_lstm_forward(pp, input_ids, attention_mask=None, labels=None):
    T = pp["num_tags"]
    Hp = pp["h_pad"]
    B, S = input_ids.shape
    L = 2 * S

    # TODO(synk): the pretrained BertForTokenClassification encoder cannot be
    # reproduced here; it is replaced by a deterministic embedding lookup + a
    # Pallas linear classifier emitting token logits of width 2*num_tags.
    emb = pp["embedding"][input_ids]                                   # (B, S, hid)
    cls = pallas_linear(emb.reshape(B * S, -1), pp["cls_w"], pp["cls_b"],
                        out_dtype=jnp.bfloat16)                        # (B*S, 2*Hp) bf16
    # The two T-wide halves live in two 128-lane blocks, so the
    # (B,S,2T)->(B,2S,T) reshape is a pure leading-dim reshape.
    em = cls.reshape(B, S, 2, Hp).reshape(B, L, Hp)                    # (B, 2S, Hp) bf16

    # TODO(synk): fold this transpose into the LSTM kernel's in_spec.
    x = jnp.transpose(em, (1, 0, 2))                                   # (L, B, Hp) bf16

    b_tile = _pick_b_tile(L, B, Hp, Hp)
    Bp = _round_up(max(B, b_tile), b_tile)
    if Bp != B:
        x = jnp.pad(x, ((0, 0), (0, Bp - B), (0, 0)))

    y = pallas_bilstm_stack(x, pp["lstm"], h_pad=Hp, b_tile=b_tile)    # (L, Bp, 2Hp) bf16

    out = pallas_linear_logsoftmax(y.reshape(L * Bp, 2 * Hp),
                                   pp["h2t_w"], pp["h2t_b"], n_valid=T)
    out = out.reshape(L, Bp, Hp)[:, :B, :T]                            # (L, B, T)
    # TODO(synk): fold this transpose into the log-softmax kernel's out_spec.
    lstm_out = jnp.transpose(out, (1, 0, 2)).reshape(B, S, 2 * T)      # (B, S, 2T)

    loss = None
    if labels is not None:
        loss = calc_loss_helper(lstm_out, labels, attention_mask, T, T)
    return loss, lstm_out


# ----------------------------- parameter init & padding -----------------------------

def init_params(key, vocab_size, bert_hidden, num_tags):
    T = num_tags
    H = T
    ks = jax.random.split(key, 20)

    def u(k, shape, scale):
        return jax.random.uniform(k, shape, jnp.float32, -scale, scale)

    params = {
        "num_tags": T,
        "embedding": jax.random.normal(ks[0], (vocab_size, bert_hidden),
                                       jnp.float32) * 0.02,
        "cls_w": u(ks[1], (bert_hidden, 2 * T), 1.0 / bert_hidden ** 0.5),
        "cls_b": u(ks[2], (2 * T,), 1.0 / bert_hidden ** 0.5),
        "h2t_w": u(ks[3], (2 * T, T), 1.0 / (2 * T) ** 0.5),
        "h2t_b": u(ks[4], (T,), 1.0 / (2 * T) ** 0.5),
    }

    lstm = []
    kidx = 5
    for layer in range(2):
        d_in = T if layer == 0 else 2 * H
        s = 1.0 / H ** 0.5
        layer_p = {}
        for dname in ("fwd", "bwd"):
            wih = u(ks[kidx], (d_in, 4 * H), s); kidx += 1
            whh = u(ks[kidx], (H, 4 * H), s); kidx += 1
            # combined bias (b_ih + b_hh): forward math identical to PyTorch's two biases
            b = u(ks[kidx], (4 * H,), s); kidx += 1
            layer_p[dname] = (wih, whh, b)
        lstm.append(layer_p)
    params["lstm"] = lstm
    return params


# unpadded gate order (i, f, g, o) -> padded lane-block order (i, f, o, g)
GATE_PERM = (0, 1, 3, 2)   # GATE_PERM[dst_block] = src_block


def _pad_gate_cols(w, H, Hp):
    # w: (rows, 4H) with gate cols in (i,f,g,o) order -> (rows, 4*Hp) in (i,f,o,g).
    out = jnp.zeros((w.shape[0], 4 * Hp), w.dtype)
    for dst, src in enumerate(GATE_PERM):
        out = out.at[:, dst * Hp:dst * Hp + H].set(w[:, src * H:(src + 1) * H])
    return out


def _pad_cols_blocks(w, n_blocks, blk, lane_pad):
    # scatter column block j (width blk) to lane offset j*lane_pad; rest zero.
    out = jnp.zeros((w.shape[0], n_blocks * lane_pad), w.dtype)
    for j in range(n_blocks):
        out = out.at[:, j * lane_pad:j * lane_pad + blk].set(
            w[:, j * blk:(j + 1) * blk])
    return out


def _pad_rows_blocks(w, n_blocks, blk, row_pad):
    out = jnp.zeros((n_blocks * row_pad, w.shape[1]), w.dtype)
    for j in range(n_blocks):
        out = out.at[j * row_pad:j * row_pad + blk, :].set(
            w[j * blk:(j + 1) * blk, :])
    return out


def prepare_padded_params(params):
    """Pad weights to 128-lane aligned layouts; cast matmul weights to bf16.

    LSTM per layer:  wih (d_in_pad, 8*Hp)  = [fwd gates | bwd gates], gate
    order (i,f,o,g); whh (2*Hp, 8*Hp) block-diagonal [whh_f | whh_b];
    bias (1, 8*Hp) fp32.
    """
    T = params["num_tags"]
    H = T
    Hp = LANE
    pp = {"num_tags": T, "h_pad": Hp, "embedding": params["embedding"]}

    # classifier: (hid, 2T) -> (hid, 2*Hp), two T-wide halves in two lane blocks.
    pp["cls_w"] = _bf16(_pad_cols_blocks(params["cls_w"], 2, T, Hp))
    pp["cls_b"] = _pad_cols_blocks(params["cls_b"].reshape(1, -1), 2, T, Hp)

    # hidden2tag: (2T, T) -> (2*Hp, Hp); rows follow the [fwd | bwd] lane blocks
    # of the padded LSTM output, cols are the (padded) tag logits.
    h2t = _pad_cols_blocks(params["h2t_w"], 1, T, Hp)
    pp["h2t_w"] = _bf16(_pad_rows_blocks(h2t, 2, T, Hp))
    pp["h2t_b"] = _pad_cols_blocks(params["h2t_b"].reshape(1, -1), 1, T, Hp)

    lstm_padded = []
    for li, layer in enumerate(params["lstm"]):
        wih_blocks, bias_blocks = [], []
        whh_bd = jnp.zeros((2 * Hp, 8 * Hp), jnp.float32)
        for di, dname in enumerate(("fwd", "bwd")):
            wih, whh, b = layer[dname]
            wih_g = _pad_gate_cols(wih, H, Hp)                    # (d_in, 4*Hp)
            if li == 0:
                wih_g = _pad_rows_blocks(wih_g, 1, wih_g.shape[0], Hp)   # (Hp, 4*Hp)
            else:
                wih_g = _pad_rows_blocks(wih_g, 2, H, Hp)                # (2*Hp, 4*Hp)
            wih_blocks.append(wih_g)
            whh_g = _pad_gate_cols(whh, H, Hp)                    # (H, 4*Hp)
            whh_bd = whh_bd.at[di * Hp:di * Hp + H,
                               di * 4 * Hp:(di + 1) * 4 * Hp].set(whh_g)
            bias_blocks.append(_pad_gate_cols(b.reshape(1, -1), H, Hp))
        wih_full = jnp.concatenate(wih_blocks, axis=1)            # (d_in_pad, 8*Hp)
        bias_full = jnp.concatenate(bias_blocks, axis=1)          # (1, 8*Hp)
        lstm_padded.append((_bf16(wih_full), _bf16(whh_bd), bias_full))
    pp["lstm"] = lstm_padded
    return pp


# ----------------------------- pure-JAX reference -----------------------------

def _bfr(x):
    return x.astype(jnp.bfloat16).astype(jnp.float32)


def _ref_lstm_direction(x, wih, whh, b, reverse):
    H = whh.shape[0]
    B = x.shape[1]
    # hoisted input projection, rounded to bf16 exactly like the kernel scratch
    pre = _bfr(_bfr(x) @ _bfr(wih) + b)                               # (L, B, 4H)
    whh_r = _bfr(whh)

    def step(carry, pre_t):
        h, c = carry
        gates = pre_t + _bfr(h) @ whh_r
        i = jax.nn.sigmoid(gates[:, 0 * H:1 * H])
        f = jax.nn.sigmoid(gates[:, 1 * H:2 * H])
        g = jnp.tanh(gates[:, 2 * H:3 * H])
        o = jax.nn.sigmoid(gates[:, 3 * H:4 * H])
        c = f * c + i * g
        h = o * jnp.tanh(c)
        return (h, c), h

    xs = pre[::-1] if reverse else pre
    init = (jnp.zeros((B, H), jnp.float32), jnp.zeros((B, H), jnp.float32))
    _, hs = lax.scan(step, init, xs)
    return hs[::-1] if reverse else hs


def reference_forward(params, input_ids, attention_mask, labels):
    T = params["num_tags"]
    B, S = input_ids.shape
    emb = params["embedding"][input_ids]
    logits = _bfr(emb) @ _bfr(params["cls_w"]) + params["cls_b"]       # (B,S,2T)
    em = logits.reshape(B, 2 * S, T)
    x = jnp.transpose(em, (1, 0, 2))                                   # (L,B,T)
    for layer in params["lstm"]:
        fwd = _ref_lstm_direction(x, *layer["fwd"], reverse=False)
        bwd = _ref_lstm_direction(x, *layer["bwd"], reverse=True)
        x = jnp.concatenate([fwd, bwd], axis=-1)
    y = _bfr(x) @ _bfr(params["h2t_w"]) + params["h2t_b"]
    y = jax.nn.log_softmax(y, axis=-1)
    lstm_out = jnp.transpose(y, (1, 0, 2)).reshape(B, S, 2 * T)
    loss = calc_loss_helper(lstm_out, labels, attention_mask, T, T)
    return loss, lstm_out


# ----------------------------- main -----------------------------

if __name__ == "__main__":
    B, S, T = 2, 8, 8            # batch, seq, num_tags (bert logits width = 2T)
    vocab, hid = 100, 32

    root = jax.random.PRNGKey(0)
    kp, ki, kl1, kl2 = jax.random.split(root, 4)
    params = init_params(kp, vocab, hid, T)
    pp = prepare_padded_params(params)

    input_ids = jax.random.randint(ki, (B, S), 0, vocab, dtype=jnp.int32)
    attention_mask = jnp.ones((B, S), jnp.int32).at[1, S - 2:].set(0)
    odd = jax.random.randint(kl1, (B, S), 0, T, dtype=jnp.int32)
    even = jax.random.randint(kl2, (B, S), 0, T, dtype=jnp.int32)
    labels = (odd + 1) * (T + 1) + (even + 1)

    fwd_fn = jax.jit(lambda ids, m, lab: bert_lstm_forward(pp, ids, m, lab))
    loss, lstm_out = fwd_fn(input_ids, attention_mask, labels)
    jax.block_until_ready((loss, lstm_out))

    ref_loss, ref_out = jax.jit(
        lambda ids, m, lab: reference_forward(params, ids, m, lab)
    )(input_ids, attention_mask, labels)

    assert lstm_out.shape == (B, S, 2 * T), lstm_out.shape
    assert bool(jnp.all(jnp.isfinite(lstm_out))) and bool(jnp.isfinite(loss))
    assert bool(jnp.allclose(lstm_out, ref_out, atol=3e-2, rtol=3e-2)), (
        float(jnp.max(jnp.abs(lstm_out - ref_out))))
    assert bool(jnp.allclose(loss, ref_loss, atol=3e-2, rtol=3e-2)), (
        float(loss), float(ref_loss))
    print("KERNEL_OK")
</pallas_src>

<mosaic_0001>
module attributes {stable_mosaic.version = 11 : i64} {
  func.func @_linear_kernel(%arg0: i32, %arg1: memref<16x32xf32, #tpu.memory_space<vmem>>, %arg2: memref<32x256xbf16, #tpu.memory_space<vmem>>, %arg3: memref<1x256xf32, #tpu.memory_space<vmem>>, %arg4: memref<16x256xbf16, #tpu.memory_space<vmem>>) attributes {dimension_semantics = [#tpu.dimension_semantics<parallel>], iteration_bounds = array<i64: 1>, scalar_prefetch = 0 : i64, scratch_operands = 0 : i64, tpu.core_type = #tpu.core_type<tc>, window_params = [{transform_indices = @transform_0, window_bounds = array<i64: 16, 32>}, {pipeline_mode = #tpu.pipeline_mode<synchronous>, transform_indices = @transform_1, window_bounds = array<i64: 32, 256>}, {pipeline_mode = #tpu.pipeline_mode<synchronous>, transform_indices = @transform_2, window_bounds = array<i64: 1, 256>}, {transform_indices = @transform_3, window_bounds = array<i64: 16, 256>}]} {
    %c0 = arith.constant 0 : index
    %c0_0 = arith.constant 0 : index
    %0 = vector.load %arg1[%c0, %c0_0] : memref<16x32xf32, #tpu.memory_space<vmem>>, vector<16x32xf32>
    %1 = arith.truncf %0 : vector<16x32xf32> to vector<16x32xbf16>
    %c0_1 = arith.constant 0 : index
    %c0_2 = arith.constant 0 : index
    %2 = vector.load %arg2[%c0_1, %c0_2] : memref<32x256xbf16, #tpu.memory_space<vmem>>, vector<32x256xbf16>
    %cst = arith.constant dense<0.000000e+00> : vector<16x256xf32>
    %3 = tpu.matmul %1, %2, %cst {dimension_numbers = #tpu.dot_dimension_numbers<[1], [0], [0], [1], [0, 0, 1, 1], [], []>} : vector<16x32xbf16>, vector<32x256xbf16>, vector<16x256xf32> -> vector<16x256xf32>
    %c0_3 = arith.constant 0 : index
    %c0_4 = arith.constant 0 : index
    %4 = vector.load %arg3[%c0_3, %c0_4] : memref<1x256xf32, #tpu.memory_space<vmem>>, vector<1x256xf32>
    %5 = vector.broadcast %4 : vector<1x256xf32> to vector<16x256xf32>
    %6 = arith.addf %3, %5 : vector<16x256xf32>
    %7 = arith.truncf %6 : vector<16x256xf32> to vector<16x256xbf16>
    %c0_5 = arith.constant 0 : index
    %c0_6 = arith.constant 0 : index
    %8 = vector.load %arg4[%c0_5, %c0_6] : memref<16x256xbf16, #tpu.memory_space<vmem>>, vector<16x256xbf16>
    tpu.vector_store %arg4[%c0_5, %c0_6], %7 {strides = array<i32>} : memref<16x256xbf16, #tpu.memory_space<vmem>>, vector<16x256xbf16>,
    return
  }
  func.func @transform_0(%arg0: i32) -> (i32, i32) {
    %c0_i32 = arith.constant 0 : i32
    %c0_i32_0 = arith.constant 0 : i32
    return %arg0, %c0_i32 : i32, i32
  }
  func.func @transform_1(%arg0: i32) -> (i32, i32) {
    %c0_i32 = arith.constant 0 : i32
    %c0_i32_0 = arith.constant 0 : i32
    %c0_i32_1 = arith.constant 0 : i32
    return %c0_i32, %c0_i32_0 : i32, i32
  }
  func.func @transform_2(%arg0: i32) -> (i32, i32) {
    %c0_i32 = arith.constant 0 : i32
    %c0_i32_0 = arith.constant 0 : i32
    %c0_i32_1 = arith.constant 0 : i32
    return %c0_i32, %c0_i32_0 : i32, i32
  }
  func.func @transform_3(%arg0: i32) -> (i32, i32) {
    %c0_i32 = arith.constant 0 : i32
    %c0_i32_0 = arith.constant 0 : i32
    return %arg0, %c0_i32 : i32, i32
  }
}

module attributes {stable_mosaic.version = 11 : i64} {
  func.func @_linear_logsoftmax_kernel(%arg0: i32, %arg1: memref<128x256xbf16, #tpu.memory_space<vmem>>, %arg2: memref<256x128xbf16, #tpu.memory_space<vmem>>, %arg3: memref<1x128xf32, #tpu.memory_space<vmem>>, %arg4: memref<128x128xf32, #tpu.memory_space<vmem>>) attributes {dimension_semantics = [#tpu.dimension_semantics<parallel>], iteration_bounds = array<i64: 1>, scalar_prefetch = 0 : i64, scratch_operands = 0 : i64, tpu.core_type = #tpu.core_type<tc>, window_params = [{transform_indices = @transform_0, window_bounds = array<i64: 128, 256>}, {pipeline_mode = #tpu.pipeline_mode<synchronous>, transform_indices = @transform_1, window_bounds = array<i64: 256, 128>}, {pipeline_mode = #tpu.pipeline_mode<synchronous>, transform_indices = @transform_2, window_bounds = array<i64: 1, 128>}, {transform_indices = @transform_3, window_bounds = array<i64: 128, 128>}]} {
    %c0 = arith.constant 0 : index
    %c0_0 = arith.constant 0 : index
    %0 = vector.load %arg1[%c0, %c0_0] : memref<128x256xbf16, #tpu.memory_space<vmem>>, vector<128x256xbf16>
    %c0_1 = arith.constant 0 : index
    %c0_2 = arith.constant 0 : index
    %1 = vector.load %arg2[%c0_1, %c0_2] : memref<256x128xbf16, #tpu.memory_space<vmem>>, vector<256x128xbf16>
    %cst = arith.constant dense<0.000000e+00> : vector<128x128xf32>
    %2 = tpu.matmul %0, %1, %cst {dimension_numbers = #tpu.dot_dimension_numbers<[1], [0], [0], [1], [0, 0, 1, 1], [], []>} : vector<128x256xbf16>, vector<256x128xbf16>, vector<128x128xf32> -> vector<128x128xf32>
    %c0_3 = arith.constant 0 : index
    %c0_4 = arith.constant 0 : index
    %3 = vector.load %arg3[%c0_3, %c0_4] : memref<1x128xf32, #tpu.memory_space<vmem>>, vector<1x128xf32>
    %4 = vector.broadcast %3 : vector<1x128xf32> to vector<128x128xf32>
    %5 = arith.addf %2, %4 : vector<128x128xf32>
    %6 = tpu.iota {dimensions = array<i32: 1>} : vector<128x128xi32>
    %c8_i32 = arith.constant 8 : i32
    %7 = vector.broadcast %c8_i32 : i32 to vector<128x128xi32>
    %8 = arith.cmpi slt, %6, %7 : vector<128x128xi32>
    %cst_5 = arith.constant -1.000000e+30 : f32
    %9 = vector.broadcast %cst_5 : f32 to vector<128x128xf32>
    %10 = arith.select %8, %5, %9 : vector<128x128xi1>, vector<128x128xf32>
    %cst_6 = arith.constant dense<0xFF800000> : vector<128xf32>
    %11 = vector.multi_reduction <maximumf>, %10, %cst_6 [1] : vector<128x128xf32> to vector<128xf32>
    %12 = vector.shape_cast %11 : vector<128xf32> to vector<128x1xf32>
    %13 = vector.broadcast %12 : vector<128x1xf32> to vector<128x128xf32>
    %14 = arith.subf %10, %13 : vector<128x128xf32>
    %15 = math.exp %14 : vector<128x128xf32>
    %cst_7 = arith.constant 0.000000e+00 : f32
    %16 = vector.broadcast %cst_7 : f32 to vector<128x128xf32>
    %17 = arith.select %8, %15, %16 : vector<128x128xi1>, vector<128x128xf32>
    %cst_8 = arith.constant dense<0.000000e+00> : vector<128xf32>
    %18 = vector.multi_reduction <add>, %17, %cst_8 [1] : vector<128x128xf32> to vector<128xf32>
    %19 = vector.shape_cast %18 : vector<128xf32> to vector<128x1xf32>
    %20 = math.log %19 : vector<128x1xf32>
    %21 = vector.broadcast %20 : vector<128x1xf32> to vector<128x128xf32>
    %22 = arith.subf %14, %21 : vector<128x128xf32>
    %c0_9 = arith.constant 0 : index
    %c0_10 = arith.constant 0 : index
    %23 = vector.load %arg4[%c0_9, %c0_10] : memref<128x128xf32, #tpu.memory_space<vmem>>, vector<128x128xf32>
    tpu.vector_store %arg4[%c0_9, %c0_10], %22 {strides = array<i32>} : memref<128x128xf32, #tpu.memory_space<vmem>>, vector<128x128xf32>,
    return
  }
  func.func @transform_0(%arg0: i32) -> (i32, i32) {
    %c0_i32 = arith.constant 0 : i32
    %c0_i32_0 = arith.constant 0 : i32
    return %arg0, %c0_i32 : i32, i32
  }
  func.func @transform_1(%arg0: i32) -> (i32, i32) {
    %c0_i32 = arith.constant 0 : i32
    %c0_i32_0 = arith.constant 0 : i32
    %c0_i32_1 = arith.constant 0 : i32
    return %c0_i32, %c0_i32_0 : i32, i32
  }
  func.func @transform_2(%arg0: i32) -> (i32, i32) {
    %c0_i32 = arith.constant 0 : i32
    %c0_i32_0 = arith.constant 0 : i32
    %c0_i32_1 = arith.constant 0 : i32
    return %c0_i32, %c0_i32_0 : i32, i32
  }
  func.func @transform_3(%arg0: i32) -> (i32, i32) {
    %c0_i32 = arith.constant 0 : i32
    %c0_i32_0 = arith.constant 0 : i32
    return %arg0, %c0_i32 : i32, i32
  }
}

module attributes {stable_mosaic.version = 11 : i64} {
  func.func @_bilstm2_kernel(%arg0: i32, %arg1: memref<16x8x128xbf16, #tpu.memory_space<vmem>>, %arg2: memref<128x1024xbf16, #tpu.memory_space<vmem>>, %arg3: memref<256x1024xbf16, #tpu.memory_space<vmem>>, %arg4: memref<1x1024xf32, #tpu.memory_space<vmem>>, %arg5: memref<256x1024xbf16, #tpu.memory_space<vmem>>, %arg6: memref<256x1024xbf16, #tpu.memory_space<vmem>>, %arg7: memref<1x1024xf32, #tpu.memory_space<vmem>>, %arg8: memref<16x8x256xbf16, #tpu.memory_space<vmem>>, %arg9: memref<16x8x1024xbf16, #tpu.memory_space<vmem>>, %arg10: memref<16x8x256xbf16, #tpu.memory_space<vmem>>) attributes {dimension_semantics = [#tpu.dimension_semantics<parallel>], iteration_bounds = array<i64: 1>, scalar_prefetch = 0 : i64, scratch_operands = 2 : i64, tpu.core_type = #tpu.core_type<tc>, window_params = [{transform_indices = @transform_0, window_bounds = array<i64: 16, 8, 128>}, {pipeline_mode = #tpu.pipeline_mode<synchronous>, transform_indices = @transform_1, window_bounds = array<i64: 128, 1024>}, {pipeline_mode = #tpu.pipeline_mode<synchronous>, transform_indices = @transform_2, window_bounds = array<i64: 256, 1024>}, {pipeline_mode = #tpu.pipeline_mode<synchronous>, transform_indices = @transform_3, window_bounds = array<i64: 1, 1024>}, {pipeline_mode = #tpu.pipeline_mode<synchronous>, transform_indices = @transform_4, window_bounds = array<i64: 256, 1024>}, {pipeline_mode = #tpu.pipeline_mode<synchronous>, transform_indices = @transform_5, window_bounds = array<i64: 256, 1024>}, {pipeline_mode = #tpu.pipeline_mode<synchronous>, transform_indices = @transform_6, window_bounds = array<i64: 1, 1024>}, {transform_indices = @transform_7, window_bounds = array<i64: 16, 8, 256>}]} {
    %c0 = arith.constant 0 : index
    %c0_0 = arith.constant 0 : index
    %c0_1 = arith.constant 0 : index
    %0 = vector.load %arg1[%c0, %c0_0, %c0_1] : memref<16x8x128xbf16, #tpu.memory_space<vmem>>, vector<16x8x128xbf16>
    %1 = vector.shape_cast %0 : vector<16x8x128xbf16> to vector<128x128xbf16>
    %c0_2 = arith.constant 0 : index
    %c0_3 = arith.constant 0 : index
    %2 = vector.load %arg2[%c0_2, %c0_3] : memref<128x1024xbf16, #tpu.memory_space<vmem>>, vector<128x1024xbf16>
    %cst = arith.constant dense<0.000000e+00> : vector<128x1024xf32>
    %3 = tpu.matmul %1, %2, %cst {dimension_numbers = #tpu.dot_dimension_numbers<[1], [0], [0], [1], [0, 0, 1, 1], [], []>} : vector<128x128xbf16>, vector<128x1024xbf16>, vector<128x1024xf32> -> vector<128x1024xf32>
    %c0_4 = arith.constant 0 : index
    %c0_5 = arith.constant 0 : index
    %4 = vector.load %arg4[%c0_4, %c0_5] : memref<1x1024xf32, #tpu.memory_space<vmem>>, vector<1x1024xf32>
    %5 = vector.broadcast %4 : vector<1x1024xf32> to vector<128x1024xf32>
    %6 = arith.addf %3, %5 : vector<128x1024xf32>
    %7 = arith.truncf %6 : vector<128x1024xf32> to vector<128x1024xbf16>
    %8 = vector.shape_cast %7 : vector<128x1024xbf16> to vector<16x8x1024xbf16>
    %c0_6 = arith.constant 0 : index
    %c0_7 = arith.constant 0 : index
    %c0_8 = arith.constant 0 : index
    %9 = vector.load %arg9[%c0_6, %c0_7, %c0_8] : memref<16x8x1024xbf16, #tpu.memory_space<vmem>>, vector<16x8x1024xbf16>
    tpu.vector_store %arg9[%c0_6, %c0_7, %c0_8], %8 {strides = array<i32>} : memref<16x8x1024xbf16, #tpu.memory_space<vmem>>, vector<16x8x1024xbf16>,
    %cst_9 = arith.constant 0.000000e+00 : f32
    %10 = vector.broadcast %cst_9 : f32 to vector<8x256xf32>
    %cst_10 = arith.constant 0.000000e+00 : f32
    %11 = vector.broadcast %cst_10 : f32 to vector<8x128xf32>
    %c0_i32 = arith.constant 0 : i32
    %c16_i32 = arith.constant 16 : i32
    %12 = arith.addi %c0_i32, %c16_i32 : i32
    %c1_i32 = arith.constant 1 : i32
    %13:3 = scf.for %arg11 = %c0_i32 to %12 step %c1_i32 iter_args(%arg12 = %10, %arg13 = %11, %arg14 = %11) -> (vector<8x256xf32>, vector<8x128xf32>, vector<8x128xf32>)  : i32 {
      %28 = arith.truncf %arg12 : vector<8x256xf32> to vector<8x256xbf16>
      %c0_29 = arith.constant 0 : index
      %c0_30 = arith.constant 0 : index
      %29 = vector.load %arg3[%c0_29, %c0_30] : memref<256x1024xbf16, #tpu.memory_space<vmem>>, vector<256x1024xbf16>
      %cst_31 = arith.constant dense<0.000000e+00> : vector<8x1024xf32>
      %30 = tpu.matmul %28, %29, %cst_31 {dimension_numbers = #tpu.dot_dimension_numbers<[1], [0], [0], [1], [0, 0, 1, 1], [], []>} : vector<8x256xbf16>, vector<256x1024xbf16>, vector<8x1024xf32> -> vector<8x1024xf32>
      %c15_i32 = arith.constant 15 : i32
      %31 = arith.subi %c15_i32, %arg11 : i32
      %32 = arith.index_cast %arg11 : i32 to index
      %c0_32 = arith.constant 0 : index
      %c0_33 = arith.constant 0 : index
      %33 = vector.load %arg9[%32, %c0_32, %c0_33] : memref<16x8x1024xbf16, #tpu.memory_space<vmem>>, vector<1x8x512xbf16>
      %34 = vector.shape_cast %33 : vector<1x8x512xbf16> to vector<8x512xbf16>
      %35 = arith.extf %34 : vector<8x512xbf16> to vector<8x512xf32>
      %36 = vector.extract_strided_slice %30 {offsets = [0, 0], sizes = [8, 512], strides = [1, 1]} : vector<8x1024xf32> to vector<8x512xf32>
      %37 = arith.addf %35, %36 : vector<8x512xf32>
      %38 = arith.index_cast %31 : i32 to index
      %c0_34 = arith.constant 0 : index
      %c512 = arith.constant 512 : index
      %39 = vector.load %arg9[%38, %c0_34, %c512] : memref<16x8x1024xbf16, #tpu.memory_space<vmem>>, vector<1x8x512xbf16>
      %40 = vector.shape_cast %39 : vector<1x8x512xbf16> to vector<8x512xbf16>
      %41 = arith.extf %40 : vector<8x512xbf16> to vector<8x512xf32>
      %42 = vector.extract_strided_slice %30 {offsets = [0, 512], sizes = [8, 512], strides = [1, 1]} : vector<8x1024xf32> to vector<8x512xf32>
      %43 = arith.addf %41, %42 : vector<8x512xf32>
      %44 = vector.extract_strided_slice %37 {offsets = [0, 0], sizes = [8, 384], strides = [1, 1]} : vector<8x512xf32> to vector<8x384xf32>
      %45 = arith.negf %44 : vector<8x384xf32>
      %46 = math.exp %45 : vector<8x384xf32>
      %cst_35 = arith.constant 1.000000e+00 : f32
      %47 = vector.broadcast %cst_35 : f32 to vector<8x384xf32>
      %48 = arith.addf %47, %46 : vector<8x384xf32>
      %49 = arith.divf %47, %48 : vector<8x384xf32>
      %50 = vector.extract_strided_slice %43 {offsets = [0, 0], sizes = [8, 384], strides = [1, 1]} : vector<8x512xf32> to vector<8x384xf32>
      %51 = arith.negf %50 : vector<8x384xf32>
      %52 = math.exp %51 : vector<8x384xf32>
      %cst_36 = arith.constant 1.000000e+00 : f32
      %53 = vector.broadcast %cst_36 : f32 to vector<8x384xf32>
      %54 = arith.addf %53, %52 : vector<8x384xf32>
      %55 = arith.divf %53, %54 : vector<8x384xf32>
      %56 = vector.extract_strided_slice %49 {offsets = [0, 128], sizes = [8, 128], strides = [1, 1]} : vector<8x384xf32> to vector<8x128xf32>
      %57 = arith.mulf %56, %arg13 : vector<8x128xf32>
      %58 = vector.extract_strided_slice %49 {offsets = [0, 0], sizes = [8, 128], strides = [1, 1]} : vector<8x384xf32> to vector<8x128xf32>
      %59 = vector.extract_strided_slice %37 {offsets = [0, 384], sizes = [8, 128], strides = [1, 1]} : vector<8x512xf32> to vector<8x128xf32>
      %60 = math.tanh %59 : vector<8x128xf32>
      %61 = arith.mulf %58, %60 : vector<8x128xf32>
      %62 = arith.addf %57, %61 : vector<8x128xf32>
      %63 = vector.extract_strided_slice %55 {offsets = [0, 128], sizes = [8, 128], strides = [1, 1]} : vector<8x384xf32> to vector<8x128xf32>
      %64 = arith.mulf %63, %arg14 : vector<8x128xf32>
      %65 = vector.extract_strided_slice %55 {offsets = [0, 0], sizes = [8, 128], strides = [1, 1]} : vector<8x384xf32> to vector<8x128xf32>
      %66 = vector.extract_strided_slice %43 {offsets = [0, 384], sizes = [8, 128], strides = [1, 1]} : vector<8x512xf32> to vector<8x128xf32>
      %67 = math.tanh %66 : vector<8x128xf32>
      %68 = arith.mulf %65, %67 : vector<8x128xf32>
      %69 = arith.addf %64, %68 : vector<8x128xf32>
      %70 = vector.extract_strided_slice %49 {offsets = [0, 256], sizes = [8, 128], strides = [1, 1]} : vector<8x384xf32> to vector<8x128xf32>
      %71 = math.tanh %62 : vector<8x128xf32>
      %72 = arith.mulf %70, %71 : vector<8x128xf32>
      %73 = vector.extract_strided_slice %55 {offsets = [0, 256], sizes = [8, 128], strides = [1, 1]} : vector<8x384xf32> to vector<8x128xf32>
      %74 = math.tanh %69 : vector<8x128xf32>
      %75 = arith.mulf %73, %74 : vector<8x128xf32>
      %76 = arith.truncf %72 : vector<8x128xf32> to vector<8x128xbf16>
      %77 = arith.index_cast %arg11 : i32 to index
      %c0_37 = arith.constant 0 : index
      %c0_38 = arith.constant 0 : index
      %78 = vector.load %arg10[%77, %c0_37, %c0_38] : memref<16x8x256xbf16, #tpu.memory_space<vmem>>, vector<1x8x128xbf16>
      %79 = vector.shape_cast %78 : vector<1x8x128xbf16> to vector<8x128xbf16>
      %80 = vector.shape_cast %76 : vector<8x128xbf16> to vector<1x8x128xbf16>
      tpu.vector_store %arg10[%77, %c0_37, %c0_38], %80 {strides = array<i32>} : memref<16x8x256xbf16, #tpu.memory_space<vmem>>, vector<1x8x128xbf16>,
      %81 = arith.truncf %75 : vector<8x128xf32> to vector<8x128xbf16>
      %82 = arith.index_cast %31 : i32 to index
      %c0_39 = arith.constant 0 : index
      %c128 = arith.constant 128 : index
      %83 = vector.load %arg10[%82, %c0_39, %c128] : memref<16x8x256xbf16, #tpu.memory_space<vmem>>, vector<1x8x128xbf16>
      %84 = vector.shape_cast %83 : vector<1x8x128xbf16> to vector<8x128xbf16>
      %85 = vector.shape_cast %81 : vector<8x128xbf16> to vector<1x8x128xbf16>
      tpu.vector_store %arg10[%82, %c0_39, %c128], %85 {strides = array<i32>} : memref<16x8x256xbf16, #tpu.memory_space<vmem>>, vector<1x8x128xbf16>,
      %86 = tpu.concatenate %72, %75 in 1 : vector<8x128xf32>, vector<8x128xf32> -> vector<8x256xf32>
      scf.yield %86, %62, %69 : vector<8x256xf32>, vector<8x128xf32>, vector<8x128xf32>
    }
    %c16_i32_11 = arith.constant 16 : i32
    %c0_12 = arith.constant 0 : index
    %c0_13 = arith.constant 0 : index
    %c0_14 = arith.constant 0 : index
    %14 = vector.load %arg10[%c0_12, %c0_13, %c0_14] : memref<16x8x256xbf16, #tpu.memory_space<vmem>>, vector<16x8x256xbf16>
    %15 = vector.shape_cast %14 : vector<16x8x256xbf16> to vector<128x256xbf16>
    %c0_15 = arith.constant 0 : index
    %c0_16 = arith.constant 0 : index
    %16 = vector.load %arg5[%c0_15, %c0_16] : memref<256x1024xbf16, #tpu.memory_space<vmem>>, vector<256x1024xbf16>
    %cst_17 = arith.constant dense<0.000000e+00> : vector<128x1024xf32>
    %17 = tpu.matmul %15, %16, %cst_17 {dimension_numbers = #tpu.dot_dimension_numbers<[1], [0], [0], [1], [0, 0, 1, 1], [], []>} : vector<128x256xbf16>, vector<256x1024xbf16>, vector<128x1024xf32> -> vector<128x1024xf32>
    %c0_18 = arith.constant 0 : index
    %c0_19 = arith.constant 0 : index
    %18 = vector.load %arg7[%c0_18, %c0_19] : memref<1x1024xf32, #tpu.memory_space<vmem>>, vector<1x1024xf32>
    %19 = vector.broadcast %18 : vector<1x1024xf32> to vector<128x1024xf32>
    %20 = arith.addf %17, %19 : vector<128x1024xf32>
    %21 = arith.truncf %20 : vector<128x1024xf32> to vector<128x1024xbf16>
    %22 = vector.shape_cast %21 : vector<128x1024xbf16> to vector<16x8x1024xbf16>
    %c0_20 = arith.constant 0 : index
    %c0_21 = arith.constant 0 : index
    %c0_22 = arith.constant 0 : index
    %23 = vector.load %arg9[%c0_20, %c0_21, %c0_22] : memref<16x8x1024xbf16, #tpu.memory_space<vmem>>, vector<16x8x1024xbf16>
    tpu.vector_store %arg9[%c0_20, %c0_21, %c0_22], %22 {strides = array<i32>} : memref<16x8x1024xbf16, #tpu.memory_space<vmem>>, vector<16x8x1024xbf16>,
    %cst_23 = arith.constant 0.000000e+00 : f32
    %24 = vector.broadcast %cst_23 : f32 to vector<8x256xf32>
    %cst_24 = arith.constant 0.000000e+00 : f32
    %25 = vector.broadcast %cst_24 : f32 to vector<8x128xf32>
    %c0_i32_25 = arith.constant 0 : i32
    %c16_i32_26 = arith.constant 16 : i32
    %26 = arith.addi %c0_i32_25, %c16_i32_26 : i32
    %c1_i32_27 = arith.constant 1 : i32
    %27:3 = scf.for %arg11 = %c0_i32_25 to %26 step %c1_i32_27 iter_args(%arg12 = %24, %arg13 = %25, %arg14 = %25) -> (vector<8x256xf32>, vector<8x128xf32>, vector<8x128xf32>)  : i32 {
      %28 = arith.truncf %arg12 : vector<8x256xf32> to vector<8x256xbf16>
      %c0_29 = arith.constant 0 : index
      %c0_30 = arith.constant 0 : index
      %29 = vector.load %arg6[%c0_29, %c0_30] : memref<256x1024xbf16, #tpu.memory_space<vmem>>, vector<256x1024xbf16>
      %cst_31 = arith.constant dense<0.000000e+00> : vector<8x1024xf32>
      %30 = tpu.matmul %28, %29, %cst_31 {dimension_numbers = #tpu.dot_dimension_numbers<[1], [0], [0], [1], [0, 0, 1, 1], [], []>} : vector<8x256xbf16>, vector<256x1024xbf16>, vector<8x1024xf32> -> vector<8x1024xf32>
      %c15_i32 = arith.constant 15 : i32
      %31 = arith.subi %c15_i32, %arg11 : i32
      %32 = arith.index_cast %arg11 : i32 to index
      %c0_32 = arith.constant 0 : index
      %c0_33 = arith.constant 0 : index
      %33 = vector.load %arg9[%32, %c0_32, %c0_33] : memref<16x8x1024xbf16, #tpu.memory_space<vmem>>, vector<1x8x512xbf16>
      %34 = vector.shape_cast %33 : vector<1x8x512xbf16> to vector<8x512xbf16>
      %35 = arith.extf %34 : vector<8x512xbf16> to vector<8x512xf32>
      %36 = vector.extract_strided_slice %30 {offsets = [0, 0], sizes = [8, 512], strides = [1, 1]} : vector<8x1024xf32> to vector<8x512xf32>
      %37 = arith.addf %35, %36 : vector<8x512xf32>
      %38 = arith.index_cast %31 : i32 to index
      %c0_34 = arith.constant 0 : index
      %c512 = arith.constant 512 : index
      %39 = vector.load %arg9[%38, %c0_34, %c512] : memref<16x8x1024xbf16, #tpu.memory_space<vmem>>, vector<1x8x512xbf16>
      %40 = vector.shape_cast %39 : vector<1x8x512xbf16> to vector<8x512xbf16>
      %41 = arith.extf %40 : vector<8x512xbf16> to vector<8x512xf32>
      %42 = vector.extract_strided_slice %30 {offsets = [0, 512], sizes = [8, 512], strides = [1, 1]} : vector<8x1024xf32> to vector<8x512xf32>
      %43 = arith.addf %41, %42 : vector<8x512xf32>
      %44 = vector.extract_strided_slice %37 {offsets = [0, 0], sizes = [8, 384], strides = [1, 1]} : vector<8x512xf32> to vector<8x384xf32>
      %45 = arith.negf %44 : vector<8x384xf32>
      %46 = math.exp %45 : vector<8x384xf32>
      %cst_35 = arith.constant 1.000000e+00 : f32
      %47 = vector.broadcast %cst_35 : f32 to vector<8x384xf32>
      %48 = arith.addf %47, %46 : vector<8x384xf32>
      %49 = arith.divf %47, %48 : vector<8x384xf32>
      %50 = vector.extract_strided_slice %43 {offsets = [0, 0], sizes = [8, 384], strides = [1, 1]} : vector<8x512xf32> to vector<8x384xf32>
      %51 = arith.negf %50 : vector<8x384xf32>
      %52 = math.exp %51 : vector<8x384xf32>
      %cst_36 = arith.constant 1.000000e+00 : f32
      %53 = vector.broadcast %cst_36 : f32 to vector<8x384xf32>
      %54 = arith.addf %53, %52 : vector<8x384xf32>
      %55 = arith.divf %53, %54 : vector<8x384xf32>
      %56 = vector.extract_strided_slice %49 {offsets = [0, 128], sizes = [8, 128], strides = [1, 1]} : vector<8x384xf32> to vector<8x128xf32>
      %57 = arith.mulf %56, %arg13 : vector<8x128xf32>
      %58 = vector.extract_strided_slice %49 {offsets = [0, 0], sizes = [8, 128], strides = [1, 1]} : vector<8x384xf32> to vector<8x128xf32>
      %59 = vector.extract_strided_slice %37 {offsets = [0, 384], sizes = [8, 128], strides = [1, 1]} : vector<8x512xf32> to vector<8x128xf32>
      %60 = math.tanh %59 : vector<8x128xf32>
      %61 = arith.mulf %58, %60 : vector<8x128xf32>
      %62 = arith.addf %57, %61 : vector<8x128xf32>
      %63 = vector.extract_strided_slice %55 {offsets = [0, 128], sizes = [8, 128], strides = [1, 1]} : vector<8x384xf32> to vector<8x128xf32>
      %64 = arith.mulf %63, %arg14 : vector<8x128xf32>
      %65 = vector.extract_strided_slice %55 {offsets = [0, 0], sizes = [8, 128], strides = [1, 1]} : vector<8x384xf32> to vector<8x128xf32>
      %66 = vector.extract_strided_slice %43 {offsets = [0, 384], sizes = [8, 128], strides = [1, 1]} : vector<8x512xf32> to vector<8x128xf32>
      %67 = math.tanh %66 : vector<8x128xf32>
      %68 = arith.mulf %65, %67 : vector<8x128xf32>
      %69 = arith.addf %64, %68 : vector<8x128xf32>
      %70 = vector.extract_strided_slice %49 {offsets = [0, 256], sizes = [8, 128], strides = [1, 1]} : vector<8x384xf32> to vector<8x128xf32>
      %71 = math.tanh %62 : vector<8x128xf32>
      %72 = arith.mulf %70, %71 : vector<8x128xf32>
      %73 = vector.extract_strided_slice %55 {offsets = [0, 256], sizes = [8, 128], strides = [1, 1]} : vector<8x384xf32> to vector<8x128xf32>
      %74 = math.tanh %69 : vector<8x128xf32>
      %75 = arith.mulf %73, %74 : vector<8x128xf32>
      %76 = arith.truncf %72 : vector<8x128xf32> to vector<8x128xbf16>
      %77 = arith.index_cast %arg11 : i32 to index
      %c0_37 = arith.constant 0 : index
      %c0_38 = arith.constant 0 : index
      %78 = vector.load %arg8[%77, %c0_37, %c0_38] : memref<16x8x256xbf16, #tpu.memory_space<vmem>>, vector<1x8x128xbf16>
      %79 = vector.shape_cast %78 : vector<1x8x128xbf16> to vector<8x128xbf16>
      %80 = vector.shape_cast %76 : vector<8x128xbf16> to vector<1x8x128xbf16>
      tpu.vector_store %arg8[%77, %c0_37, %c0_38], %80 {strides = array<i32>} : memref<16x8x256xbf16, #tpu.memory_space<vmem>>, vector<1x8x128xbf16>,
      %81 = arith.truncf %75 : vector<8x128xf32> to vector<8x128xbf16>
      %82 = arith.index_cast %31 : i32 to index
      %c0_39 = arith.constant 0 : index
      %c128 = arith.constant 128 : index
      %83 = vector.load %arg8[%82, %c0_39, %c128] : memref<16x8x256xbf16, #tpu.memory_space<vmem>>, vector<1x8x128xbf16>
      %84 = vector.shape_cast %83 : vector<1x8x128xbf16> to vector<8x128xbf16>
      %85 = vector.shape_cast %81 : vector<8x128xbf16> to vector<1x8x128xbf16>
      tpu.vector_store %arg8[%82, %c0_39, %c128], %85 {strides = array<i32>} : memref<16x8x256xbf16, #tpu.memory_space<vmem>>, vector<1x8x128xbf16>,
      %86 = tpu.concatenate %72, %75 in 1 : vector<8x128xf32>, vector<8x128xf32> -> vector<8x256xf32>
      scf.yield %86, %62, %69 : vector<8x256xf32>, vector<8x128xf32>, vector<8x128xf32>
    }
    %c16_i32_28 = arith.constant 16 : i32
    return
  }
  func.func @transform_0(%arg0: i32) -> (i32, i32, i32) {
    %c0_i32 = arith.constant 0 : i32
    %c0_i32_0 = arith.constant 0 : i32
    %c0_i32_1 = arith.constant 0 : i32
    return %c0_i32, %arg0, %c0_i32_0 : i32, i32, i32
  }
  func.func @transform_1(%arg0: i32) -> (i32, i32) {
    %c0_i32 = arith.constant 0 : i32
    %c0_i32_0 = arith.constant 0 : i32
    %c0_i32_1 = arith.constant 0 : i32
    return %c0_i32, %c0_i32_0 : i32, i32
  }
  func.func @transform_2(%arg0: i32) -> (i32, i32) {
    %c0_i32 = arith.constant 0 : i32
    %c0_i32_0 = arith.constant 0 : i32
    %c0_i32_1 = arith.constant 0 : i32
    return %c0_i32, %c0_i32_0 : i32, i32
  }
  func.func @transform_3(%arg0: i32) -> (i32, i32) {
    %c0_i32 = arith.constant 0 : i32
    %c0_i32_0 = arith.constant 0 : i32
    %c0_i32_1 = arith.constant 0 : i32
    return %c0_i32, %c0_i32_0 : i32, i32
  }
  func.func @transform_4(%arg0: i32) -> (i32, i32) {
    %c0_i32 = arith.constant 0 : i32
    %c0_i32_0 = arith.constant 0 : i32
    %c0_i32_1 = arith.constant 0 : i32
    return %c0_i32, %c0_i32_0 : i32, i32
  }
  func.func @transform_5(%arg0: i32) -> (i32, i32) {
    %c0_i32 = arith.constant 0 : i32
    %c0_i32_0 = arith.constant 0 : i32
    %c0_i32_1 = arith.constant 0 : i32
    return %c0_i32, %c0_i32_0 : i32, i32
  }
  func.func @transform_6(%arg0: i32) -> (i32, i32) {
    %c0_i32 = arith.constant 0 : i32
    %c0_i32_0 = arith.constant 0 : i32
    %c0_i32_1 = arith.constant 0 : i32
    return %c0_i32, %c0_i32_0 : i32, i32
  }
  func.func @transform_7(%arg0: i32) -> (i32, i32, i32) {
    %c0_i32 = arith.constant 0 : i32
    %c0_i32_0 = arith.constant 0 : i32
    %c0_i32_1 = arith.constant 0 : i32
    return %c0_i32, %arg0, %c0_i32_0 : i32, i32, i32
  }
}

</mosaic_0001>

<bundles_post_ra>
// kernel: _lambda_.3
= control target key start
LH: loop header
LB: loop body
LE: loop exit
PB: predicated region body
PF: predicated region fallthrough
CT: control target
= control target key end

     0   :  { %v135_v1 = vmov 0   ;;  %vm54_vm0 = vcmask 261120   ;;  %v24_v8 = vlaneseq  ;;  %s183_s1 = inlined_call_operand.vmem [shape: bf16[32,256], index: 1, kind: input, shape index: {}]   ;;  %s184_s0 = inlined_call_operand.vmem [shape: f32[16,32], index: 0, kind: input, shape index: {}]   ;;  %s185_s2 = inlined_call_operand.vmem [shape: f32[1,256], index: 2, kind: input, shape index: {}]   ;;  %s186_s3 = inlined_call_operand.vmem [shape: bf16[16,256], index: 3, kind: output, shape index: {}]  }
   0x1   :  { %v129_v0 = vld [vmem:[%s183_s1 + $0x4] ss:$8 sps:$4 sm:$0xff]   ;;  %90 = vmatprep.mubr.bf16.mxu0 %v135_v1  ;;  %v131_v2 = vld [vmem:[%s183_s1] ss:$8 sps:$4 sm:$0xff]   ;;  %v132_v3 = vld [vmem:[%s183_s1 + $0x14] ss:$8 sps:$4 sm:$0xff]  }
   0x2   :  { %58 = vmatprep.subr.bf16.mxu0 %v129_v0  ;;  %v134_v4 = vld [vmem:[%s183_s1 + $0x10] ss:$8 sps:$4 sm:$0xff]   ;;  %v15_v5 = vld [vmem:[%s184_s0] sm:$0xff]  ;;  %v16_v6 = vld [vmem:[%s184_s0 + $0x8] sm:$0xff]  ;;  %v25_v9 = vshrl.u32 %v24_v8, 7 }
   0x3   :  { %59 = vmatpush1.bf16.msra.mxu0 %v131_v2  ;;  %v17_v7 = vpack.c.bf16 %v16_v6, %v15_v5  ;;  %v22_v11 = vld [vmem:[%s185_s2] sm:$0x3] }
   0x4   :  { %60 = vmatprep.subr.bf16.mxu0 %v132_v3  ;;  %v26_v10 = vsub.s32 0, %v25_v9  ;;  %v30_v12 = vsub.s32 1, %v25_v9 }
   0x6   :  { %v27_v13 = vrot.slane %v22_v11, %v26_v10  ;;  %v31_v14 = vrot.slane %v22_v11, %v30_v12 }
   0x7   :  { %61 = vmatpush1.bf16.msra.mxu0 %v134_v4 }
   0xa   :  { %123 = vmatmul.mubr.msk.bf16.vlgmr.msra.gmra.mrb[0].mxu0 %vm54_vm0, %v17_v7 }
  0xdd   :  { %v92_v15 = vpop.f32.mrb[0].mxu0 }
  0xde   :  { %v93_v16 = vadd.f32 %v92_v15, %v27_v13  ;;  %v94_v17 = vpop.f32.mrb[1].mxu0 }
  0xdf   :  { %v95_v18 = vadd.f32 %v94_v17, %v31_v14  ;;  %v96_v19 = vpop.f32.mrb[2].mxu0 }
  0xe0   :  { %v97_v20 = vadd.f32 %v96_v19, %v27_v13  ;;  %v98_v21 = vpop.f32.mrb[3].mxu0 }
  0xe1   :  { %v126_v22 = vpack.c.bf16 %v95_v18, %v93_v16  ;;  %v99_v23 = vadd.f32 %v98_v21, %v31_v14 }
  0xe3   :  { %113 = vst [vmem:[%s186_s3] sm:$0xff] %v126_v22  ;;  %v127_v24 = vpack.c.bf16 %v99_v23, %v97_v20 }
  0xe5   :  { %114 = vst [vmem:[%s186_s3 + $0x8] sm:$0xff] %v127_v24 }

// kernel: _lambda_.5
= control target key start
LH: loop header
LB: loop body
LE: loop exit
PB: predicated region body
PF: predicated region fallthrough
CT: control target
= control target key end

     0   :  { %v343_v32 = vlaneseq  ;;  %s1155_s1 = inlined_call_operand.vmem [shape: bf16[256,128], index: 1, kind: input, shape index: {}]   ;;  %s1156_s0 = inlined_call_operand.vmem [shape: bf16[128,256], index: 0, kind: input, shape index: {}]   ;;  %s1157_s2 = inlined_call_operand.vmem [shape: f32[1,128], index: 2, kind: input, shape index: {}]   ;;  %s1158_s3 = inlined_call_operand.vmem [shape: f32[128,128], index: 3, kind: output, shape index: {}]  }
   0x1   :  { %v671_v0 = vld [vmem:[%s1155_s1 + $0x40] sm:$0xff]   ;;  %v673_v2 = vld [vmem:[%s1155_s1 + $0x48] sm:$0xff]   ;;  %v675_v4 = vld [vmem:[%s1155_s1 + $0x50] sm:$0xff]  }
   0x2   :  { %v672_v1 = vld [vmem:[%s1155_s1] sm:$0xff]   ;;  %591 = vmatprep.subr.bf16.mxu0 %v671_v0  ;;  %655 = vmatprep.subr.bf16.mxu1 %v671_v0  ;;  %v674_v3 = vld [vmem:[%s1155_s1 + $0x8] sm:$0xff]   ;;  %v676_v5 = vld [vmem:[%s1155_s1 + $0x10] sm:$0xff]   ;;  %v891_v33 = vand.u32 127, %v343_v32 }
   0x3   :  { %592 = vmatpush3.bf16.msra.mxu0 %v672_v1  ;;  %663 = vmatpush3.bf16.msra.mxu1 %v672_v1  ;;  %v677_v6 = vld [vmem:[%s1155_s1 + $0x58] sm:$0xff]   ;;  %v679_v8 = vld [vmem:[%s1155_s1 + $0x60] sm:$0xff]   ;;  %v681_v10 = vld [vmem:[%s1155_s1 + $0x68] sm:$0xff]  }
   0x4   :  { %593 = vmatprep.subr.bf16.mxu0 %v673_v2  ;;  %656 = vmatprep.subr.bf16.mxu1 %v673_v2  ;;  %v678_v7 = vld [vmem:[%s1155_s1 + $0x18] sm:$0xff]   ;;  %v680_v9 = vld [vmem:[%s1155_s1 + $0x20] sm:$0xff]   ;;  %v682_v13 = vld [vmem:[%s1155_s1 + $0x28] sm:$0xff]   ;;  %vm345_vm0 = vcmp.lt.s32.totalorder %v891_v33, 8 }
   0x5   :  { %v689_v11 = vld [vmem:[%s1156_s0 + $0x4] ss:$8 sps:$4 sm:$0xff]   ;;  %v683_v14 = vld [vmem:[%s1155_s1 + $0x70] sm:$0xff]   ;;  %v685_v16 = vld [vmem:[%s1155_s1 + $0x78] sm:$0xff]  }
   0x6   :  { %v692_v12 = vld [vmem:[%s1156_s0 + $0x44] ss:$8 sps:$4 sm:$0xff]   ;;  %278 = vmatprep.mubr.bf16.mxu0 %v689_v11  ;;  %v684_v15 = vld [vmem:[%s1155_s1 + $0x30] sm:$0xff]   ;;  %v686_v17 = vld [vmem:[%s1155_s1 + $0x38] sm:$0xff]  }
   0x7   :  { %594 = vmatpush3.bf16.msra.mxu0 %v674_v3  ;;  %664 = vmatpush3.bf16.msra.mxu1 %v674_v3  ;;  %v687_v18 = vld [vmem:[%s1156_s0] ss:$8 sps:$4 sm:$0xff]   ;;  %v693_v20 = vld [vmem:[%s1156_s0 + $0x14] ss:$8 sps:$4 sm:$0xff]   ;;  %v695_v22 = vld [vmem:[%s1156_s0 + $0x10] ss:$8 sps:$4 sm:$0xff]  }
   0x8   :  { %595 = vmatprep.subr.bf16.mxu0 %v675_v4  ;;  %657 = vmatprep.subr.bf16.mxu1 %v675_v4  ;;  %v690_v19 = vld [vmem:[%s1156_s0 + $0x40] ss:$8 sps:$4 sm:$0xff]   ;;  %v696_v21 = vld [vmem:[%s1156_s0 + $0x54] ss:$8 sps:$4 sm:$0xff]   ;;  %v698_v23 = vld [vmem:[%s1156_s0 + $0x50] ss:$8 sps:$4 sm:$0xff]  }
   0x9   :  { %310 = vmatprep.mubr.bf16.mxu1 %v692_v12  ;;  %v699_v24 = vld [vmem:[%s1156_s0 + $0x24] ss:$8 sps:$4 sm:$0xff]   ;;  %v701_v26 = vld [vmem:[%s1156_s0 + $0x20] ss:$8 sps:$4 sm:$0xff]   ;;  %v705_v28 = vld [vmem:[%s1156_s0 + $0x34] ss:$8 sps:$4 sm:$0xff]  }
   0xa   :  { %v702_v25 = vld [vmem:[%s1156_s0 + $0x64] ss:$8 sps:$4 sm:$0xff]   ;;  %v704_v27 = vld [vmem:[%s1156_s0 + $0x60] ss:$8 sps:$4 sm:$0xff]   ;;  %v708_v29 = vld [vmem:[%s1156_s0 + $0x74] ss:$8 sps:$4 sm:$0xff]  }
   0xb   :  { %596 = vmatpush3.bf16.msra.mxu0 %v676_v5  ;;  %665 = vmatpush3.bf16.msra.mxu1 %v676_v5  ;;  %v707_v30 = vld [vmem:[%s1156_s0 + $0x30] ss:$8 sps:$4 sm:$0xff]   ;;  %v896_v38 = vld [vmem:[%s1157_s2] ss:$0 sm:$0xff] }
   0xc   :  { %597 = vmatprep.subr.bf16.mxu0 %v677_v6  ;;  %658 = vmatprep.subr.bf16.mxu1 %v677_v6  ;;  %v710_v31 = vld [vmem:[%s1156_s0 + $0x70] ss:$8 sps:$4 sm:$0xff]  }
   0xf   :  { %598 = vmatpush3.bf16.msra.mxu0 %v678_v7  ;;  %666 = vmatpush3.bf16.msra.mxu1 %v678_v7 }
  0x10   :  { %599 = vmatprep.subr.bf16.mxu0 %v679_v8  ;;  %659 = vmatprep.subr.bf16.mxu1 %v679_v8 }
  0x13   :  { %600 = vmatpush3.bf16.msra.mxu0 %v680_v9  ;;  %667 = vmatpush3.bf16.msra.mxu1 %v680_v9 }
  0x14   :  { %601 = vmatprep.subr.bf16.mxu0 %v681_v10  ;;  %660 = vmatprep.subr.bf16.mxu1 %v681_v10 }
  0x17   :  { %602 = vmatpush3.bf16.msra.mxu0 %v682_v13  ;;  %668 = vmatpush3.bf16.msra.mxu1 %v682_v13 }
  0x18   :  { %603 = vmatprep.subr.bf16.mxu0 %v683_v14  ;;  %661 = vmatprep.subr.bf16.mxu1 %v683_v14 }
  0x1b   :  { %604 = vmatpush3.bf16.msra.mxu0 %v684_v15  ;;  %669 = vmatpush3.bf16.msra.mxu1 %v684_v15 }
  0x1c   :  { %605 = vmatprep.subr.bf16.mxu0 %v685_v16  ;;  %662 = vmatprep.subr.bf16.mxu1 %v685_v16 }
  0x1f   :  { %606 = vmatpush3.bf16.msra.mxu0 %v686_v17  ;;  %670 = vmatpush3.bf16.msra.mxu1 %v686_v17 }
  0x22   :  { %279 = vmatmul.mubr.bf16.vlgmr.msra.gmra.mrb[0].mxu0 %v687_v18  ;;  %311 = vmatmul.mubr.bf16.vlgmr.msra.gmra.mrb[0].mxu1 %v690_v19 }
  0x23   :  { %286 = vmatprep.mubr.bf16.mxu0 %v693_v20  ;;  %318 = vmatprep.mubr.bf16.mxu1 %v696_v21 }
  0x2a   :  { %287 = vmatmul.mubr.bf16.gmra.mrb[4].mxu0 %v695_v22  ;;  %319 = vmatmul.mubr.bf16.gmra.mrb[4].mxu1 %v698_v23 }
  0x2b   :  { %294 = vmatprep.mubr.bf16.mxu0 %v699_v24  ;;  %326 = vmatprep.mubr.bf16.mxu1 %v702_v25 }
  0x32   :  { %295 = vmatmul.mubr.bf16.gmra.mrb[8].mxu0 %v701_v26  ;;  %327 = vmatmul.mubr.bf16.gmra.mrb[8].mxu1 %v704_v27 }
  0x33   :  { %302 = vmatprep.mubr.bf16.mxu0 %v705_v28  ;;  %334 = vmatprep.mubr.bf16.mxu1 %v708_v29 }
  0x3a   :  { %303 = vmatmul.mubr.bf16.gmra.mrb[12].mxu0 %v707_v30  ;;  %335 = vmatmul.mubr.bf16.gmra.mrb[12].mxu1 %v710_v31 }
  0xf5   :  { %v607_v34 = vpop.f32.mrb[0].mxu0  ;;  %v631_v35 = vpop.f32.mrb[0].mxu1 }
  0xf6   :  { %v608_v36 = vpop.f32.mrb[1].mxu0  ;;  %v632_v37 = vpop.f32.mrb[1].mxu1 }
  0xf7   :  { %v609_v39 = vadd.f32 %v608_v36, %v607_v34  ;;  %v633_v40 = vadd.f32 %v632_v37, %v631_v35  ;;  %v610_v41 = vpop.f32.mrb[2].mxu0  ;;  %v634_v42 = vpop.f32.mrb[2].mxu1 }
  0xf8   :  { %v611_v43 = vpop.f32.mrb[3].mxu0  ;;  %v635_v44 = vpop.f32.mrb[3].mxu1 }
  0xf9   :  { %v612_v45 = vadd.f32 %v611_v43, %v610_v41  ;;  %v636_v46 = vadd.f32 %v635_v44, %v634_v42  ;;  %v281_v47 = vadd.f32 %v609_v39, %v896_v38  ;;  %v313_v48 = vadd.f32 %v633_v40, %v896_v38 }
  0xfb   :  { %v903_v49 = vsel %vm345_vm0, %v281_v47, -1e+30  ;;  %v316_v50 = vadd.f32 %v636_v46, %v896_v38  ;;  %v913_v53 = vsel %vm345_vm0, %v313_v48, -1e+30  ;;  %v284_v60 = vadd.f32 %v612_v45, %v896_v38 }
  0xfc   :  { %362 = vmax.xlane.f32.xlu0 %v903_v49 }
  0xfd   :  { %v613_v51 = vpop.f32.mrb[4].mxu0  ;;  %v909_v52 = vsel %vm345_vm0, %v316_v50, -1e+30  ;;  %v637_v54 = vpop.f32.mrb[4].mxu1  ;;  %v926_v5 = vsel %vm345_vm0, %v284_v60, -1e+30 }
  0xfe   :  { %380 = vmax.xlane.f32.xlu1 %v909_v52  ;;  %v614_v55 = vpop.f32.mrb[5].mxu0  ;;  %v638_v56 = vpop.f32.mrb[5].mxu1 }
  0xff   :  { %v615_v57 = vadd.f32 %v614_v55, %v613_v51  ;;  %v616_v58 = vpop.f32.mrb[6].mxu0  ;;  %v639_v59 = vadd.f32 %v638_v56, %v637_v54  ;;  %v640_v61 = vpop.f32.mrb[6].mxu1 }
 0x100   :  { %378 = vmax.xlane.f32.xlu0 %v913_v53  ;;  %v617_v62 = vpop.f32.mrb[7].mxu0  ;;  %v641_v63 = vpop.f32.mrb[7].mxu1 }
 0x101   :  { %v618_v0 = vadd.f32 %v617_v62, %v616_v58  ;;  %v289_v1 = vadd.f32 %v615_v57, %v896_v38  ;;  %v642_v2 = vadd.f32 %v641_v63, %v640_v61  ;;  %v321_v3 = vadd.f32 %v639_v59, %v896_v38 }
 0x103   :  { %v922_v4 = vsel %vm345_vm0, %v289_v1, -1e+30  ;;  %v292_v6 = vadd.f32 %v618_v0, %v896_v38  ;;  %v324_v7 = vadd.f32 %v642_v2, %v896_v38  ;;  %v938_v10 = vsel %vm345_vm0, %v321_v3, -1e+30 }
 0x104   :  { %366 = vmax.xlane.f32.xlu1 %v922_v4  ;;  %364 = vmax.xlane.f32.xlu0 %v926_v5 }
 0x105   :  { %v619_v8 = vpop.f32.mrb[8].mxu0  ;;  %v934_v9 = vsel %vm345_vm0, %v292_v6, -1e+30  ;;  %v643_v11 = vpop.f32.mrb[8].mxu1  ;;  %v944_v19 = vsel %vm345_vm0, %v324_v7, -1e+30 }
 0x106   :  { %v620_v12 = vpop.f32.mrb[9].mxu0  ;;  %v644_v13 = vpop.f32.mrb[9].mxu1 }
 0x107   :  { %v621_v14 = vadd.f32 %v620_v12, %v619_v8  ;;  %v622_v15 = vpop.f32.mrb[10].mxu0  ;;  %v645_v16 = vadd.f32 %v644_v13, %v643_v11  ;;  %v646_v17 = vpop.f32.mrb[10].mxu1 }
 0x108   :  { %368 = vmax.xlane.f32.xlu1 %v934_v9  ;;  %382 = vmax.xlane.f32.xlu0 %v938_v10  ;;  %v623_v18 = vpop.f32.mrb[11].mxu0  ;;  %v647_v20 = vpop.f32.mrb[11].mxu1 }
 0x109   :  { %v624_v21 = vadd.f32 %v623_v18, %v622_v15  ;;  %v297_v22 = vadd.f32 %v621_v14, %v896_v38  ;;  %v648_v23 = vadd.f32 %v647_v20, %v646_v17  ;;  %v329_v24 = vadd.f32 %v645_v16, %v896_v38 }
 0x10b   :  { %v950_v25 = vsel %vm345_vm0, %v297_v22, -1e+30  ;;  %v300_v26 = vadd.f32 %v624_v21, %v896_v38  ;;  %v332_v27 = vadd.f32 %v648_v23, %v896_v38  ;;  %v962_v30 = vsel %vm345_vm0, %v329_v24, -1e+30 }
 0x10c   :  { %384 = vmax.xlane.f32.xlu1 %v944_v19  ;;  %370 = vmax.xlane.f32.xlu0 %v950_v25 }
 0x10d   :  { %v625_v28 = vpop.f32.mrb[12].mxu0  ;;  %v958_v29 = vsel %vm345_vm0, %v300_v26, -1e+30  ;;  %v649_v31 = vpop.f32.mrb[12].mxu1  ;;  %v968_v41 = vsel %vm345_vm0, %v332_v27, -1e+30 }
 0x10e   :  { %v626_v32 = vpop.f32.mrb[13].mxu0  ;;  %v650_v34 = vpop.f32.mrb[13].mxu1 }
 0x10f   :  { %v627_v35 = vadd.f32 %v626_v32, %v625_v28  ;;  %v628_v36 = vpop.f32.mrb[14].mxu0  ;;  %v651_v37 = vadd.f32 %v650_v34, %v649_v31  ;;  %v652_v39 = vpop.f32.mrb[14].mxu1 }
 0x110   :  { %372 = vmax.xlane.f32.xlu1 %v958_v29  ;;  %386 = vmax.xlane.f32.xlu0 %v962_v30  ;;  %v629_v40 = vpop.f32.mrb[15].mxu0  ;;  %v653_v42 = vpop.f32.mrb[15].mxu1 }
 0x111   :  { %v630_v43 = vadd.f32 %v629_v40, %v628_v36  ;;  %v305_v44 = vadd.f32 %v627_v35, %v896_v38  ;;  %v654_v45 = vadd.f32 %v653_v42, %v652_v39  ;;  %v337_v46 = vadd.f32 %v651_v37, %v896_v38 }
 0x113   :  { %v974_v47 = vsel %vm345_vm0, %v305_v44, -1e+30  ;;  %v308_v48 = vadd.f32 %v630_v43, %v896_v38  ;;  %v985_v51 = vsel %vm345_vm0, %v337_v46, -1e+30  ;;  %v340_v54 = vadd.f32 %v654_v45, %v896_v38 }
 0x114   :  { %388 = vmax.xlane.f32.xlu1 %v968_v41  ;;  %374 = vmax.xlane.f32.xlu0 %v974_v47 }
 0x115   :  { %v981_v50 = vsel %vm345_vm0, %v308_v48, -1e+30  ;;  %v992_v55 = vsel %vm345_vm0, %v340_v54, -1e+30 }
 0x118   :  { %376 = vmax.xlane.f32.xlu1 %v981_v50  ;;  %390 = vmax.xlane.f32.xlu0 %v985_v51 }
 0x11c   :  { %392 = vmax.xlane.f32.xlu1 %v992_v55 }
 0x189   :  { %v363_v56 = vpop.xlane.xlu0 %362 }
 0x18a   :  { %v996_v57 = vsub.f32 %v903_v49, %v363_v56 }
 0x18b   :  { %v381_v59 = vpop.xlane.xlu1 %380 }
 0x18c   :  { %v410_v58 = vmul.f32 1.442695, %v996_v57  ;;  %v1004_v62 = vsub.f32 %v909_v52, %v381_v59 }
 0x18d   :  { %v379_v60 = vpop.xlane.xlu0 %378 }
 0x18e   :  { %711 = vpow2.f32 %v410_v58  ;;  %v1000_v38 = vsub.f32 %v913_v53, %v379_v60  ;;  %v428_v53 = vmul.f32 1.442695, %v1004_v62 }
 0x190   :  { %v426_v61 = vmul.f32 1.442695, %v1000_v38 }
 0x191   :  { %v367_v63 = vpop.xlane.xlu1 %366  ;;  %v365_v0 = vpop.xlane.xlu0 %364 }
 0x192   :  { %713 = vpow2.f32 %v426_v61  ;;  %v1007_v1 = vsub.f32 %v922_v4, %v367_v63  ;;  %v1010_v49 = vsub.f32 %v926_v5, %v365_v0 }
 0x194   :  { %v414_v2 = vmul.f32 1.442695, %v1007_v1  ;;  %v412_v3 = vmul.f32 1.442695, %v1010_v49 }
 0x195   :  { %v369_v6 = vpop.xlane.xlu1 %368  ;;  %v383_v7 = vpop.xlane.xlu0 %382 }
 0x196   :  { %715 = vpow2.f32 %v414_v2  ;;  %v1016_v52 = vsub.f32 %v934_v9, %v369_v6  ;;  %v1019_v8 = vsub.f32 %v938_v10, %v383_v7 }
 0x197   :  { %717 = vpow2.f32 %v412_v3 }
 0x198   :  { %v712_v4 = vpop.eup %711  ;;  %v430_v5 = vmul.f32 1.442695, %v1019_v8  ;;  %719 = vpow2.f32 %v428_v53  ;;  %v416_v11 = vmul.f32 1.442695, %v1016_v52 }
 0x199   :  { %v385_v12 = vpop.xlane.xlu1 %384  ;;  %v371_v13 = vpop.xlane.xlu0 %370  ;;  %v442_v14 = vsel %vm345_vm0, %v712_v4, 0.0 }
 0x19a   :  { %v1026_v15 = vsub.f32 %v944_v19, %v385_v12  ;;  %v1029_v9 = vsub.f32 %v950_v25, %v371_v13  ;;  %458 = vadd.xlane.f32.xlu0 %v442_v14  ;;  %721 = vpow2.f32 %v430_v5 }
 0x19b   :  { %723 = vpow2.f32 %v416_v11 }
 0x19c   :  { %v714_v10 = vpop.eup %713  ;;  %v418_v16 = vmul.f32 1.442695, %v1029_v9  ;;  %v432_v17 = vmul.f32 1.442695, %v1026_v15 }
 0x19d   :  { %v373_v18 = vpop.xlane.xlu1 %372  ;;  %v387_v20 = vpop.xlane.xlu0 %386  ;;  %v450_v21 = vsel %vm345_vm0, %v714_v10, 0.0 }
 0x19e   :  { %v1036_v22 = vsub.f32 %v958_v29, %v373_v18  ;;  %v1039_v19 = vsub.f32 %v962_v30, %v387_v20  ;;  %474 = vadd.xlane.f32.xlu0 %v450_v21  ;;  %725 = vpow2.f32 %v418_v16 }
 0x19f   :  { %727 = vpow2.f32 %v432_v17 }
 0x1a0   :  { %v716_v23 = vpop.eup %715  ;;  %v434_v24 = vmul.f32 1.442695, %v1039_v19  ;;  %v420_v26 = vmul.f32 1.442695, %v1036_v22 }
 0x1a1   :  { %v718_v25 = vpop.eup %717  ;;  %v389_v27 = vpop.xlane.xlu1 %388  ;;  %v444_v31 = vsel %vm345_vm0, %v716_v23, 0.0 }
 0x1a2   :  { %v375_v28 = vpop.xlane.xlu0 %374  ;;  %v1046_v29 = vsub.f32 %v968_v41, %v389_v27  ;;  %462 = vadd.xlane.f32.xlu0 %v444_v31  ;;  %v443_v32 = vsel %vm345_vm0, %v718_v25, 0.0  ;;  %v720_v34 = vpop.eup %719  ;;  %729 = vpow2.f32 %v434_v24 }
 0x1a3   :  { %v1049_v30 = vsub.f32 %v974_v47, %v375_v28  ;;  %460 = vadd.xlane.f32.xlu1 %v443_v32  ;;  %731 = vpow2.f32 %v420_v26  ;;  %v451_v43 = vsel %vm345_vm0, %v720_v34, 0.0 }
 0x1a4   :  { %v722_v36 = vpop.eup %721  ;;  %v436_v37 = vmul.f32 1.442695, %v1046_v29 }
 0x1a5   :  { %v422_v35 = vmul.f32 1.442695, %v1049_v30  ;;  %v377_v39 = vpop.xlane.xlu1 %376  ;;  %v452_v44 = vsel %vm345_vm0, %v722_v36, 0.0  ;;  %v724_v45 = vpop.eup %723 }
 0x1a6   :  { %v391_v40 = vpop.xlane.xlu0 %390  ;;  %v1056_v41 = vsub.f32 %v981_v50, %v377_v39  ;;  %478 = vadd.xlane.f32.xlu0 %v452_v44  ;;  %v445_v54 = vsel %vm345_vm0, %v724_v45, 0.0 }
 0x1a7   :  { %v1059_v42 = vsub.f32 %v985_v51, %v391_v40  ;;  %733 = vpow2.f32 %v422_v35  ;;  %476 = vadd.xlane.f32.xlu1 %v451_v43 }
 0x1a8   :  { %v726_v47 = vpop.eup %725  ;;  %735 = vpow2.f32 %v436_v37  ;;  %v424_v48 = vmul.f32 1.442695, %v1056_v41 }
 0x1a9   :  { %v438_v46 = vmul.f32 1.442695, %v1059_v42  ;;  %v393_v50 = vpop.xlane.xlu1 %392  ;;  %v446_v56 = vsel %vm345_vm0, %v726_v47, 0.0  ;;  %v728_v58 = vpop.eup %727 }
 0x1aa   :  { %v1068_v51 = vsub.f32 %v992_v55, %v393_v50  ;;  %466 = vadd.xlane.f32.xlu0 %v446_v56  ;;  %v453_v61 = vsel %vm345_vm0, %v728_v58, 0.0 }
 0x1ab   :  { %737 = vpow2.f32 %v438_v46  ;;  %464 = vadd.xlane.f32.xlu1 %v445_v54 }
 0x1ac   :  { %v730_v59 = vpop.eup %729  ;;  %739 = vpow2.f32 %v424_v48  ;;  %v440_v60 = vmul.f32 1.442695, %v1068_v51 }
 0x1ad   :  { %v454_v55 = vsel %vm345_vm0, %v730_v59, 0.0  ;;  %v732_v63 = vpop.eup %731 }
 0x1ae   :  { %482 = vadd.xlane.f32.xlu0 %v454_v55  ;;  %741 = vpow2.f32 %v440_v60  ;;  %v447_v2 = vsel %vm345_vm0, %v732_v63, 0.0 }
 0x1af   :  { %480 = vadd.xlane.f32.xlu1 %v453_v61 }
 0x1b1   :  { %v734_v0 = vpop.eup %733 }
 0x1b2   :  { %v448_v3 = vsel %vm345_vm0, %v734_v0, 0.0  ;;  %v736_v53 = vpop.eup %735 }
 0x1b3   :  { %468 = vadd.xlane.f32.xlu1 %v447_v2  ;;  %470 = vadd.xlane.f32.xlu0 %v448_v3  ;;  %v455_v7 = vsel %vm345_vm0, %v736_v53, 0.0 }
 0x1b5   :  { %v738_v6 = vpop.eup %737 }
 0x1b6   :  { %v456_v4 = vsel %vm345_vm0, %v738_v6, 0.0  ;;  %v740_v5 = vpop.eup %739 }
 0x1b7   :  { %484 = vadd.xlane.f32.xlu1 %v455_v7  ;;  %486 = vadd.xlane.f32.xlu0 %v456_v4  ;;  %v449_v11 = vsel %vm345_vm0, %v740_v5, 0.0 }
 0x1b8   :  { %v742_v12 = vpop.eup %741 }
 0x1b9   :  { %v457_v13 = vsel %vm345_vm0, %v742_v12, 0.0 }
 0x1bb   :  { %472 = vadd.xlane.f32.xlu1 %v449_v11 }
 0x1bf   :  { %488 = vadd.xlane.f32.xlu1 %v457_v13 }
 0x227   :  { %v459_v14 = vpop.xlane.xlu0 %458 }
 0x228   :  { %743 = vlog2.f32 %v459_v14 }
 0x22b   :  { %v475_v10 = vpop.xlane.xlu0 %474 }
 0x22c   :  { %745 = vlog2.f32 %v475_v10 }
 0x22f   :  { %v463_v16 = vpop.xlane.xlu0 %462 }
 0x230   :  { %v461_v17 = vpop.xlane.xlu1 %460  ;;  %747 = vlog2.f32 %v463_v16 }
 0x231   :  { %749 = vlog2.f32 %v461_v17 }
 0x232   :  { %v744_v18 = vpop.eup %743 }
 0x233   :  { %v491_v20 = vmul.f32 0.6931472, %v744_v18  ;;  %v479_v23 = vpop.xlane.xlu0 %478 }
 0x234   :  { %v477_v21 = vpop.xlane.xlu1 %476 }
 0x235   :  { %v522_v24 = vsub.f32 %v996_v57, %v491_v20  ;;  %751 = vlog2.f32 %v477_v21 }
 0x236   :  { %v746_v25 = vpop.eup %745  ;;  %753 = vlog2.f32 %v479_v23 }
 0x237   :  { %538 = vst [vmem:[%s1158_s3] sm:$0xff] %v522_v24  ;;  %v507_v33 = vmul.f32 0.6931472, %v746_v25  ;;  %v467_v27 = vpop.xlane.xlu0 %466 }
 0x238   :  { %v465_v26 = vpop.xlane.xlu1 %464 }
 0x239   :  { %v530_v28 = vsub.f32 %v1000_v38, %v507_v33  ;;  %755 = vlog2.f32 %v465_v26 }
 0x23a   :  { %v748_v31 = vpop.eup %747  ;;  %757 = vlog2.f32 %v467_v27 }
 0x23b   :  { %v750_v32 = vpop.eup %749  ;;  %546 = vst [vmem:[%s1158_s3 + $0x40] sm:$0xff] %v530_v28  ;;  %v495_v57 = vmul.f32 0.6931472, %v748_v31  ;;  %v483_v36 = vpop.xlane.xlu0 %482 }
 0x23c   :  { %v493_v34 = vmul.f32 0.6931472, %v750_v32  ;;  %v481_v35 = vpop.xlane.xlu1 %480 }
 0x23d   :  { %v524_v37 = vsub.f32 %v1007_v1, %v495_v57  ;;  %759 = vlog2.f32 %v481_v35 }
 0x23e   :  { %v523_v39 = vsub.f32 %v1010_v49, %v493_v34  ;;  %761 = vlog2.f32 %v483_v36 }
 0x23f   :  { %v752_v40 = vpop.eup %751  ;;  %540 = vst [vmem:[%s1158_s3 + $0x10] sm:$0xff] %v524_v37 }
 0x240   :  { %v754_v38 = vpop.eup %753  ;;  %539 = vst [vmem:[%s1158_s3 + $0x8] sm:$0xff] %v523_v39  ;;  %v509_v43 = vmul.f32 0.6931472, %v752_v40  ;;  %v469_v44 = vpop.xlane.xlu1 %468 }
 0x241   :  { %v471_v45 = vpop.xlane.xlu0 %470  ;;  %v511_v46 = vmul.f32 0.6931472, %v754_v38  ;;  %763 = vlog2.f32 %v469_v44 }
 0x242   :  { %v531_v1 = vsub.f32 %v1004_v62, %v509_v43  ;;  %765 = vlog2.f32 %v471_v45 }
 0x243   :  { %v756_v49 = vpop.eup %755  ;;  %v532_v47 = vsub.f32 %v1019_v8, %v511_v46 }
 0x244   :  { %v758_v48 = vpop.eup %757  ;;  %547 = vst [vmem:[%s1158_s3 + $0x48] sm:$0xff] %v531_v1  ;;  %v497_v50 = vmul.f32 0.6931472, %v756_v49  ;;  %v485_v54 = vpop.xlane.xlu1 %484 }
 0x245   :  { %v487_v56 = vpop.xlane.xlu0 %486  ;;  %548 = vst [vmem:[%s1158_s3 + $0x50] sm:$0xff] %v532_v47  ;;  %v499_v58 = vmul.f32 0.6931472, %v758_v48  ;;  %767 = vlog2.f32 %v485_v54 }
 0x246   :  { %v525_v62 = vsub.f32 %v1016_v52, %v497_v50  ;;  %769 = vlog2.f32 %v487_v56 }
 0x247   :  { %v760_v59 = vpop.eup %759  ;;  %v526_v8 = vsub.f32 %v1029_v9, %v499_v58 }
 0x248   :  { %v762_v60 = vpop.eup %761  ;;  %541 = vst [vmem:[%s1158_s3 + $0x18] sm:$0xff] %v525_v62  ;;  %v513_v61 = vmul.f32 0.6931472, %v760_v59  ;;  %v473_v55 = vpop.xlane.xlu1 %472 }
 0x249   :  { %542 = vst [vmem:[%s1158_s3 + $0x20] sm:$0xff] %v526_v8  ;;  %v515_v63 = vmul.f32 0.6931472, %v762_v60  ;;  %771 = vlog2.f32 %v473_v55 }
 0x24a   :  { %v533_v0 = vsub.f32 %v1026_v15, %v513_v61 }
 0x24b   :  { %v764_v52 = vpop.eup %763  ;;  %v534_v2 = vsub.f32 %v1039_v19, %v515_v63 }
 0x24c   :  { %v766_v3 = vpop.eup %765  ;;  %549 = vst [vmem:[%s1158_s3 + $0x58] sm:$0xff] %v533_v0  ;;  %v501_v9 = vmul.f32 0.6931472, %v764_v52  ;;  %v489_v53 = vpop.xlane.xlu1 %488 }
 0x24d   :  { %550 = vst [vmem:[%s1158_s3 + $0x60] sm:$0xff] %v534_v2  ;;  %v503_v6 = vmul.f32 0.6931472, %v766_v3  ;;  %773 = vlog2.f32 %v489_v53 }
 0x24e   :  { %v527_v7 = vsub.f32 %v1036_v22, %v501_v9 }
 0x24f   :  { %v768_v4 = vpop.eup %767  ;;  %v528_v15 = vsub.f32 %v1049_v30, %v503_v6 }
 0x250   :  { %v770_v5 = vpop.eup %769  ;;  %543 = vst [vmem:[%s1158_s3 + $0x28] sm:$0xff] %v527_v7  ;;  %v517_v19 = vmul.f32 0.6931472, %v768_v4 }
 0x251   :  { %544 = vst [vmem:[%s1158_s3 + $0x30] sm:$0xff] %v528_v15  ;;  %v519_v11 = vmul.f32 0.6931472, %v770_v5 }
 0x252   :  { %v535_v12 = vsub.f32 %v1046_v29, %v517_v19 }
 0x253   :  { %v772_v13 = vpop.eup %771  ;;  %v536_v14 = vsub.f32 %v1059_v42, %v519_v11 }
 0x254   :  { %551 = vst [vmem:[%s1158_s3 + $0x68] sm:$0xff] %v535_v12  ;;  %v505_v22 = vmul.f32 0.6931472, %v772_v13 }
 0x255   :  { %552 = vst [vmem:[%s1158_s3 + $0x70] sm:$0xff] %v536_v14 }
 0x256   :  { %v529_v30 = vsub.f32 %v1056_v41, %v505_v22 }
 0x257   :  { %v774_v10 = vpop.eup %773 }
 0x258   :  { %545 = vst [vmem:[%s1158_s3 + $0x38] sm:$0xff] %v529_v30  ;;  %v521_v29 = vmul.f32 0.6931472, %v774_v10 }
 0x25a   :  { %v537_v16 = vsub.f32 %v1068_v51, %v521_v29 }
 0x25c   :  { %553 = vst [vmem:[%s1158_s3 + $0x78] sm:$0xff] %v537_v16 }

// kernel: _lambda_.4
= control target key start
LH: loop header
LB: loop body
LE: loop exit
PB: predicated region body
PF: predicated region fallthrough
CT: control target
= control target key end

     0   :  { %v6356_v3 = vmov 0   ;;  %s8381_s1 = inlined_call_operand.vmem [shape: bf16[128,1024], index: 1, kind: input, shape index: {}]   ;;  %s8382_s2 = inlined_call_operand.vmem [shape: bf16[256,1024], index: 2, kind: input, shape index: {}]   ;;  %s8383_s4 = inlined_call_operand.vmem [shape: bf16[256,1024], index: 4, kind: input, shape index: {}]   ;;  %s8384_s5 = inlined_call_operand.vmem [shape: bf16[256,1024], index: 5, kind: input, shape index: {}]   ;;  %s8385_s6 = inlined_call_operand.vmem [shape: f32[1,1024], index: 6, kind: input, shape index: {}]   ;;  %s8386_s7 = inlined_call_operand.vmem [shape: bf16[16,8,256], index: 7, kind: output, shape index: {}]   ;;  %s8387_s0 = inlined_call_operand.vmem [shape: bf16[16,8,128], index: 0, kind: input, shape index: {}]   ;;  %s8388_s3 = inlined_call_operand.vmem [shape: f32[1,1024], index: 3, kind: input, shape index: {}]  }
   0x1   :  { %v43_v0 = vld [vmem:[%s8381_s1] sm:$0xff]  ;;  %v44_v2 = vld [vmem:[%s8381_s1 + $0x8] sm:$0xff]  ;;  %549 = vmatprep.mubr.bf16.mxu0 %v6356_v3  ;;  %662 = vmatprep.mubr.bf16.mxu1 %v6356_v3  ;;  %v45_v63 = vld [vmem:[%s8381_s1 + $0x10] sm:$0xff] }
   0x2   :  { %v47_v1 = vld [vmem:[%s8381_s1 + $0x20] sm:$0xff]  ;;  %v48_v5 = vld [vmem:[%s8381_s1 + $0x28] sm:$0xff] }
   0x3   :  { %v5344_v4 = vcombine.high %v43_v0, %v47_v1  ;;  %v5343_v6 = vcombine.low %v43_v0, %v47_v1  ;;  %v51_v7 = vld [vmem:[%s8381_s1 + $0x40] sm:$0xff]  ;;  %v5346_v9 = vcombine.high %v44_v2, %v48_v5  ;;  %v5345_v10 = vcombine.low %v44_v2, %v48_v5  ;;  %v52_v12 = vld [vmem:[%s8381_s1 + $0x48] sm:$0xff]  ;;  %v49_v0 = vld [vmem:[%s8381_s1 + $0x30] sm:$0xff] }
   0x4   :  { %v55_v8 = vld [vmem:[%s8381_s1 + $0x60] sm:$0xff]  ;;  %v56_v13 = vld [vmem:[%s8381_s1 + $0x68] sm:$0xff]  ;;  %v46_v1 = vld [vmem:[%s8381_s1 + $0x18] sm:$0xff] }
   0x5   :  { %v5352_v11 = vcombine.high %v51_v7, %v55_v8  ;;  %v59_v14 = vld [vmem:[%s8381_s1 + $0x80] sm:$0xff]  ;;  %517 = vmatprep.subr.bf16.mxu0 %v5344_v4  ;;  %v5354_v15 = vcombine.high %v52_v12, %v56_v13  ;;  %v60_v17 = vld [vmem:[%s8381_s1 + $0x88] sm:$0xff]  ;;  %630 = vmatprep.subr.bf16.mxu1 %v5346_v9  ;;  %v5351_v19 = vcombine.low %v51_v7, %v55_v8  ;;  %v50_v2 = vld [vmem:[%s8381_s1 + $0x38] sm:$0xff] }
   0x6   :  { %v63_v16 = vld [vmem:[%s8381_s1 + $0xa0] sm:$0xff]  ;;  %v64_v18 = vld [vmem:[%s8381_s1 + $0xa8] sm:$0xff]  ;;  %518 = vmatpush1.bf16.msra.mxu0 %v5343_v6  ;;  %631 = vmatpush1.bf16.msra.mxu1 %v5345_v10  ;;  %v5353_v20 = vcombine.low %v52_v12, %v56_v13  ;;  %v5348_v6 = vcombine.high %v45_v63, %v49_v0  ;;  %v5350_v7 = vcombine.high %v46_v1, %v50_v2  ;;  %v53_v9 = vld [vmem:[%s8381_s1 + $0x50] sm:$0xff] }
   0x7   :  { %519 = vmatprep.subr.bf16.mxu0 %v5352_v11  ;;  %v5360_v21 = vcombine.high %v59_v14, %v63_v16  ;;  %632 = vmatprep.subr.bf16.mxu1 %v5354_v15  ;;  %v5362_v22 = vcombine.high %v60_v17, %v64_v18  ;;  %v67_v23 = vld [vmem:[%s8381_s1 + $0xc0] sm:$0xff]  ;;  %v68_v25 = vld [vmem:[%s8381_s1 + $0xc8] sm:$0xff]  ;;  %v5359_v27 = vcombine.low %v59_v14, %v63_v16  ;;  %v57_v10 = vld [vmem:[%s8381_s1 + $0x70] sm:$0xff] }
   0x8   :  { %v71_v24 = vld [vmem:[%s8381_s1 + $0xe0] sm:$0xff]  ;;  %v72_v26 = vld [vmem:[%s8381_s1 + $0xe8] sm:$0xff]  ;;  %v5361_v28 = vcombine.low %v60_v17, %v64_v18  ;;  %v5347_v11 = vcombine.low %v45_v63, %v49_v0  ;;  %v54_v12 = vld [vmem:[%s8381_s1 + $0x58] sm:$0xff]  ;;  %v5349_v14 = vcombine.low %v46_v1, %v50_v2  ;;  %v5356_v15 = vcombine.high %v53_v9, %v57_v10 }
   0x9   :  { %v5368_v29 = vcombine.high %v67_v23, %v71_v24  ;;  %v5370_v30 = vcombine.high %v68_v25, %v72_v26  ;;  %v75_v31 = vld [vmem:[%s8381_s1 + $0x100] sm:$0xff]  ;;  %v76_v33 = vld [vmem:[%s8381_s1 + $0x108] sm:$0xff]  ;;  %v5367_v35 = vcombine.low %v67_v23, %v71_v24  ;;  %v5369_v36 = vcombine.low %v68_v25, %v72_v26  ;;  %v58_v13 = vld [vmem:[%s8381_s1 + $0x78] sm:$0xff] }
   0xa   :  { %520 = vmatpush1.bf16.msra.mxu0 %v5351_v19  ;;  %633 = vmatpush1.bf16.msra.mxu1 %v5353_v20  ;;  %v79_v32 = vld [vmem:[%s8381_s1 + $0x120] sm:$0xff]  ;;  %v80_v34 = vld [vmem:[%s8381_s1 + $0x128] sm:$0xff]  ;;  %v61_v16 = vld [vmem:[%s8381_s1 + $0x90] sm:$0xff]  ;;  %v5358_v18 = vcombine.high %v54_v12, %v58_v13 }
   0xb   :  { %521 = vmatprep.subr.bf16.mxu0 %v5360_v21  ;;  %634 = vmatprep.subr.bf16.mxu1 %v5362_v22  ;;  %v5376_v37 = vcombine.high %v75_v31, %v79_v32  ;;  %v5378_v38 = vcombine.high %v76_v33, %v80_v34  ;;  %v83_v39 = vld [vmem:[%s8381_s1 + $0x140] sm:$0xff]  ;;  %v84_v41 = vld [vmem:[%s8381_s1 + $0x148] sm:$0xff]  ;;  %v5375_v43 = vcombine.low %v75_v31, %v79_v32  ;;  %v65_v17 = vld [vmem:[%s8381_s1 + $0xb0] sm:$0xff] }
   0xc   :  { %v87_v40 = vld [vmem:[%s8381_s1 + $0x160] sm:$0xff]  ;;  %v88_v42 = vld [vmem:[%s8381_s1 + $0x168] sm:$0xff]  ;;  %v5377_v44 = vcombine.low %v76_v33, %v80_v34  ;;  %v62_v19 = vld [vmem:[%s8381_s1 + $0x98] sm:$0xff]  ;;  %v5355_v21 = vcombine.low %v53_v9, %v57_v10  ;;  %v5357_v22 = vcombine.low %v54_v12, %v58_v13  ;;  %v5364_v23 = vcombine.high %v61_v16, %v65_v17 }
   0xd   :  { %v5384_v45 = vcombine.high %v83_v39, %v87_v40  ;;  %v5386_v46 = vcombine.high %v84_v41, %v88_v42  ;;  %v91_v47 = vld [vmem:[%s8381_s1 + $0x180] sm:$0xff]  ;;  %v92_v49 = vld [vmem:[%s8381_s1 + $0x188] sm:$0xff]  ;;  %v5383_v51 = vcombine.low %v83_v39, %v87_v40  ;;  %v5385_v52 = vcombine.low %v84_v41, %v88_v42  ;;  %v66_v20 = vld [vmem:[%s8381_s1 + $0xb8] sm:$0xff] }
   0xe   :  { %522 = vmatpush1.bf16.msra.mxu0 %v5359_v27  ;;  %635 = vmatpush1.bf16.msra.mxu1 %v5361_v28  ;;  %v95_v48 = vld [vmem:[%s8381_s1 + $0x1a0] sm:$0xff]  ;;  %v96_v50 = vld [vmem:[%s8381_s1 + $0x1a8] sm:$0xff]  ;;  %v5366_v24 = vcombine.high %v62_v19, %v66_v20  ;;  %v69_v26 = vld [vmem:[%s8381_s1 + $0xd0] sm:$0xff]  ;;  %v5365_v31 = vcombine.low %v62_v19, %v66_v20 }
   0xf   :  { %523 = vmatprep.subr.bf16.mxu0 %v5368_v29  ;;  %636 = vmatprep.subr.bf16.mxu1 %v5370_v30  ;;  %v5392_v53 = vcombine.high %v91_v47, %v95_v48  ;;  %v99_v54 = vld [vmem:[%s8381_s1 + $0x1c0] sm:$0xff]  ;;  %v5394_v55 = vcombine.high %v92_v49, %v96_v50  ;;  %v100_v57 = vld [vmem:[%s8381_s1 + $0x1c8] sm:$0xff]  ;;  %v5391_v59 = vcombine.low %v91_v47, %v95_v48  ;;  %v73_v27 = vld [vmem:[%s8381_s1 + $0xf0] sm:$0xff] }
  0x10   :  { %v103_v56 = vld [vmem:[%s8381_s1 + $0x1e0] sm:$0xff]  ;;  %v104_v58 = vld [vmem:[%s8381_s1 + $0x1e8] sm:$0xff]  ;;  %v5393_v60 = vcombine.low %v92_v49, %v96_v50  ;;  %v70_v28 = vld [vmem:[%s8381_s1 + $0xd8] sm:$0xff]  ;;  %v5363_v30 = vcombine.low %v61_v16, %v65_v17  ;;  %v5372_v32 = vcombine.high %v69_v26, %v73_v27 }
  0x11   :  { %v5400_v61 = vcombine.high %v99_v54, %v103_v56  ;;  %v5402_v62 = vcombine.high %v100_v57, %v104_v58  ;;  %v5399_v4 = vcombine.low %v99_v54, %v103_v56  ;;  %v5401_v5 = vcombine.low %v100_v57, %v104_v58  ;;  %v6510_v8 = vld [vmem:[%s8387_s0] sm:$0xff]   ;;  %v6543_v25 = vld [vmem:[%s8387_s0 + $0x8] sm:$0xff]   ;;  %v74_v29 = vld [vmem:[%s8381_s1 + $0xf8] sm:$0xff] }
  0x12   :  { %524 = vmatpush1.bf16.msra.mxu0 %v5367_v35  ;;  %637 = vmatpush1.bf16.msra.mxu1 %v5369_v36  ;;  %v5374_v33 = vcombine.high %v70_v28, %v74_v29  ;;  %v77_v34 = vld [vmem:[%s8381_s1 + $0x110] sm:$0xff]  ;;  %v78_v36 = vld [vmem:[%s8381_s1 + $0x118] sm:$0xff]  ;;  %v5373_v39 = vcombine.low %v70_v28, %v74_v29  ;;  %v6185_v9 = vld [vmem:[%s8387_s0 + $0x28] sm:$0xff]  }
  0x13   :  { %525 = vmatprep.subr.bf16.mxu0 %v5376_v37  ;;  %638 = vmatprep.subr.bf16.mxu1 %v5378_v38  ;;  %v81_v35 = vld [vmem:[%s8381_s1 + $0x130] sm:$0xff]  ;;  %v82_v37 = vld [vmem:[%s8381_s1 + $0x138] sm:$0xff]  ;;  %v5371_v38 = vcombine.low %v69_v26, %v73_v27 }
  0x14   :  { %v5380_v40 = vcombine.high %v77_v34, %v81_v35  ;;  %v6576_v41 = vld [vmem:[%s8387_s0 + $0x10] sm:$0xff]   ;;  %v5382_v42 = vcombine.high %v78_v36, %v82_v37  ;;  %v5379_v47 = vcombine.low %v77_v34, %v81_v35  ;;  %v5381_v48 = vcombine.low %v78_v36, %v82_v37  ;;  %v98_v54 = vld [vmem:[%s8381_s1 + $0x1b8] sm:$0xff] }
  0x15   :  { %v6183_v58 = vld [vmem:[%s8387_s0 + $0x18] sm:$0xff]   ;;  %v6186_v10 = vld [vmem:[%s8387_s0 + $0x30] sm:$0xff]  }
  0x16   :  { %526 = vmatpush1.bf16.msra.mxu0 %v5375_v43  ;;  %639 = vmatpush1.bf16.msra.mxu1 %v5377_v44  ;;  %v85_v43 = vld [vmem:[%s8381_s1 + $0x150] sm:$0xff]  ;;  %v106_v63 = vld [vmem:[%s8381_s1 + $0x1f8] sm:$0xff] }
  0x17   :  { %527 = vmatprep.subr.bf16.mxu0 %v5384_v45  ;;  %640 = vmatprep.subr.bf16.mxu1 %v5386_v46  ;;  %v89_v44 = vld [vmem:[%s8381_s1 + $0x170] sm:$0xff]  ;;  %v86_v45 = vld [vmem:[%s8381_s1 + $0x158] sm:$0xff] }
  0x18   :  { %v90_v46 = vld [vmem:[%s8381_s1 + $0x178] sm:$0xff]  ;;  %v5388_v49 = vcombine.high %v85_v43, %v89_v44 }
  0x19   :  { %v5390_v50 = vcombine.high %v86_v45, %v90_v46  ;;  %v5389_v56 = vcombine.low %v86_v45, %v90_v46 }
  0x1a   :  { %528 = vmatpush1.bf16.msra.mxu0 %v5383_v51  ;;  %641 = vmatpush1.bf16.msra.mxu1 %v5385_v52  ;;  %v93_v51 = vld [vmem:[%s8381_s1 + $0x190] sm:$0xff] }
  0x1b   :  { %529 = vmatprep.subr.bf16.mxu0 %v5392_v53  ;;  %642 = vmatprep.subr.bf16.mxu1 %v5394_v55  ;;  %v97_v52 = vld [vmem:[%s8381_s1 + $0x1b0] sm:$0xff]  ;;  %v94_v53 = vld [vmem:[%s8381_s1 + $0x198] sm:$0xff]  ;;  %v5387_v55 = vcombine.low %v85_v43, %v89_v44 }
  0x1c   :  { %v5396_v57 = vcombine.high %v93_v51, %v97_v52  ;;  %v5395_v0 = vcombine.low %v93_v51, %v97_v52  ;;  %v5397_v1 = vcombine.low %v94_v53, %v98_v54 }
  0x1e   :  { %530 = vmatpush1.bf16.msra.mxu0 %v5391_v59  ;;  %643 = vmatpush1.bf16.msra.mxu1 %v5393_v60  ;;  %v5398_v59 = vcombine.high %v94_v53, %v98_v54  ;;  %v101_v60 = vld [vmem:[%s8381_s1 + $0x1d0] sm:$0xff] }
  0x1f   :  { %531 = vmatprep.subr.bf16.mxu0 %v5400_v61  ;;  %644 = vmatprep.subr.bf16.mxu1 %v5402_v62  ;;  %v105_v61 = vld [vmem:[%s8381_s1 + $0x1f0] sm:$0xff]  ;;  %v102_v62 = vld [vmem:[%s8381_s1 + $0x1d8] sm:$0xff] }
  0x20   :  { %v5404_v2 = vcombine.high %v101_v60, %v105_v61 }
  0x22   :  { %532 = vmatpush1.bf16.msra.mxu0 %v5399_v4  ;;  %645 = vmatpush1.bf16.msra.mxu1 %v5401_v5  ;;  %v5406_v4 = vcombine.high %v102_v62, %v106_v63  ;;  %v5403_v5 = vcombine.low %v101_v60, %v105_v61 }
  0x23   :  { %743 = vmatprep.subr.bf16.mxu0 %v5348_v6  ;;  %856 = vmatprep.subr.bf16.mxu1 %v5350_v7  ;;  %v5405_v6 = vcombine.low %v102_v62, %v106_v63  ;;  %v6184_v7 = vld [vmem:[%s8387_s0 + $0x20] sm:$0xff]  }
  0x25   :  { %550 = vmatmul.mubr.bf16.vlgmr.msra.gmra.mrb[0].mxu0 %v6510_v8  ;;  %663 = vmatmul.mubr.bf16.vlgmr.msra.gmra.mrb[0].mxu1 %v6510_v8 }
  0x26   :  { %744 = vmatpush1.bf16.msra.mxu0 %v5347_v11  ;;  %857 = vmatpush1.bf16.msra.mxu1 %v5349_v14  ;;  %v6187_v11 = vld [vmem:[%s8387_s0 + $0x38] sm:$0xff]   ;;  %v6669_v14 = vld [vmem:[%s8388_s3] sm:$0xff]  ;;  %s6854_s3 = smov 0  }
  0x27   :  { %559 = vmatprep.mubr.bf16.mxu0 %v6356_v3  ;;  %672 = vmatprep.mubr.bf16.mxu1 %v6356_v3 }
  0x28   :  { %745 = vmatprep.subr.bf16.mxu0 %v5356_v15  ;;  %858 = vmatprep.subr.bf16.mxu1 %v5358_v18 }
  0x2a   :  { %746 = vmatpush1.bf16.msra.mxu0 %v5355_v21  ;;  %859 = vmatpush1.bf16.msra.mxu1 %v5357_v22 }
  0x2b   :  { %747 = vmatprep.subr.bf16.mxu0 %v5364_v23  ;;  %860 = vmatprep.subr.bf16.mxu1 %v5366_v24 }
  0x2d   :  { %560 = vmatmul.mubr.bf16.gmra.mrb[4].mxu0 %v6543_v25  ;;  %673 = vmatmul.mubr.bf16.gmra.mrb[4].mxu1 %v6543_v25 }
  0x2e   :  { %569 = vmatprep.mubr.bf16.mxu0 %v6356_v3  ;;  %682 = vmatprep.mubr.bf16.mxu1 %v6356_v3 }
  0x2f   :  { %748 = vmatpush1.bf16.msra.mxu0 %v5363_v30  ;;  %861 = vmatpush1.bf16.msra.mxu1 %v5365_v31 }
  0x30   :  { %749 = vmatprep.subr.bf16.mxu0 %v5372_v32  ;;  %862 = vmatprep.subr.bf16.mxu1 %v5374_v33 }
  0x33   :  { %750 = vmatpush1.bf16.msra.mxu0 %v5371_v38  ;;  %863 = vmatpush1.bf16.msra.mxu1 %v5373_v39 }
  0x34   :  { %751 = vmatprep.subr.bf16.mxu0 %v5380_v40  ;;  %864 = vmatprep.subr.bf16.mxu1 %v5382_v42 }
  0x35   :  { %570 = vmatmul.mubr.bf16.gmra.mrb[8].mxu0 %v6576_v41  ;;  %683 = vmatmul.mubr.bf16.gmra.mrb[8].mxu1 %v6576_v41 }
  0x36   :  { %579 = vmatprep.mubr.bf16.mxu0 %v6356_v3  ;;  %692 = vmatprep.mubr.bf16.mxu1 %v6356_v3 }
  0x37   :  { %752 = vmatpush1.bf16.msra.mxu0 %v5379_v47  ;;  %865 = vmatpush1.bf16.msra.mxu1 %v5381_v48 }
  0x38   :  { %753 = vmatprep.subr.bf16.mxu0 %v5388_v49  ;;  %866 = vmatprep.subr.bf16.mxu1 %v5390_v50 }
  0x3b   :  { %754 = vmatpush1.bf16.msra.mxu0 %v5387_v55  ;;  %867 = vmatpush1.bf16.msra.mxu1 %v5389_v56 }
  0x3c   :  { %755 = vmatprep.subr.bf16.mxu0 %v5396_v57  ;;  %868 = vmatprep.subr.bf16.mxu1 %v5398_v59 }
  0x3d   :  { %580 = vmatmul.mubr.bf16.gmra.mrb[12].mxu0 %v6183_v58  ;;  %693 = vmatmul.mubr.bf16.gmra.mrb[12].mxu1 %v6183_v58 }
  0x3e   :  { %589 = vmatprep.mubr.bf16.mxu0 %v6356_v3  ;;  %702 = vmatprep.mubr.bf16.mxu1 %v6356_v3 }
  0x3f   :  { %756 = vmatpush1.bf16.msra.mxu0 %v5395_v0  ;;  %869 = vmatpush1.bf16.msra.mxu1 %v5397_v1 }
  0x40   :  { %757 = vmatprep.subr.bf16.mxu0 %v5404_v2  ;;  %870 = vmatprep.subr.bf16.mxu1 %v5406_v4 }
  0x43   :  { %758 = vmatpush1.bf16.msra.mxu0 %v5403_v5  ;;  %871 = vmatpush1.bf16.msra.mxu1 %v5405_v6 }
  0x45   :  { %590 = vmatmul.mubr.bf16.gmra.mrb[16].mxu0 %v6184_v7  ;;  %703 = vmatmul.mubr.bf16.gmra.mrb[16].mxu1 %v6184_v7 }
  0x46   :  { %599 = vmatprep.mubr.bf16.mxu0 %v6356_v3  ;;  %712 = vmatprep.mubr.bf16.mxu1 %v6356_v3 }
  0x4d   :  { %600 = vmatmul.mubr.bf16.gmra.mrb[20].mxu0 %v6185_v9  ;;  %713 = vmatmul.mubr.bf16.gmra.mrb[20].mxu1 %v6185_v9 }
  0x4e   :  { %609 = vmatprep.mubr.bf16.mxu0 %v6356_v3  ;;  %722 = vmatprep.mubr.bf16.mxu1 %v6356_v3 }
  0x55   :  { %610 = vmatmul.mubr.bf16.gmra.mrb[24].mxu0 %v6186_v10  ;;  %723 = vmatmul.mubr.bf16.gmra.mrb[24].mxu1 %v6186_v10 }
  0x56   :  { %619 = vmatprep.mubr.bf16.mxu0 %v6356_v3  ;;  %732 = vmatprep.mubr.bf16.mxu1 %v6356_v3 }
  0x5d   :  { %620 = vmatmul.mubr.bf16.gmra.mrb[28].mxu0 %v6187_v11  ;;  %733 = vmatmul.mubr.bf16.gmra.mrb[28].mxu1 %v6187_v11 }
  0x5e   :  { %775 = vmatprep.mubr.bf16.mxu0 %v6356_v3  ;;  %888 = vmatprep.mubr.bf16.mxu1 %v6356_v3 }
  0x65   :  { %776 = vmatmul.mubr.bf16.vlgmr.msra.gmra.mrb[32].mxu0 %v6510_v8  ;;  %889 = vmatmul.mubr.bf16.vlgmr.msra.gmra.mrb[32].mxu1 %v6510_v8  ;;  %v109_v8 = vlaneseq }
  0x66   :  { %785 = vmatprep.mubr.bf16.mxu0 %v6356_v3  ;;  %898 = vmatprep.mubr.bf16.mxu1 %v6356_v3 }
  0x67   :  { %v6663_v12 = vshrl.u32 %v109_v8, 7 }
  0x69   :  { %v111_v13 = vsub.s32 0, %v6663_v12  ;;  %v119_v15 = vsub.s32 2, %v6663_v12  ;;  %v115_v16 = vsub.s32 1, %v6663_v12  ;;  %v123_v17 = vsub.s32 3, %v6663_v12 }
  0x6b   :  { %v6682_v18 = vrot.slane %v6669_v14, %v119_v15  ;;  %v6687_v19 = vrot.slane %v6669_v14, %v115_v16  ;;  %v6692_v20 = vrot.slane %v6669_v14, %v123_v17 }
  0x6d   :  { %786 = vmatmul.mubr.bf16.gmra.mrb[36].mxu0 %v6543_v25  ;;  %899 = vmatmul.mubr.bf16.gmra.mrb[36].mxu1 %v6543_v25 }
  0x6e   :  { %795 = vmatprep.mubr.bf16.mxu0 %v6356_v3  ;;  %908 = vmatprep.mubr.bf16.mxu1 %v6356_v3 }
  0x75   :  { %796 = vmatmul.mubr.bf16.gmra.mrb[40].mxu0 %v6576_v41  ;;  %909 = vmatmul.mubr.bf16.gmra.mrb[40].mxu1 %v6576_v41 }
  0x76   :  { %805 = vmatprep.mubr.bf16.mxu0 %v6356_v3  ;;  %918 = vmatprep.mubr.bf16.mxu1 %v6356_v3 }
  0x7d   :  { %806 = vmatmul.mubr.bf16.gmra.mrb[44].mxu0 %v6183_v58  ;;  %919 = vmatmul.mubr.bf16.gmra.mrb[44].mxu1 %v6183_v58 }
  0x7e   :  { %815 = vmatprep.mubr.bf16.mxu0 %v6356_v3  ;;  %928 = vmatprep.mubr.bf16.mxu1 %v6356_v3 }
  0x85   :  { %816 = vmatmul.mubr.bf16.gmra.mrb[48].mxu0 %v6184_v7  ;;  %929 = vmatmul.mubr.bf16.gmra.mrb[48].mxu1 %v6184_v7 }
  0x86   :  { %825 = vmatprep.mubr.bf16.mxu0 %v6356_v3  ;;  %938 = vmatprep.mubr.bf16.mxu1 %v6356_v3 }
  0x8d   :  { %826 = vmatmul.mubr.bf16.gmra.mrb[52].mxu0 %v6185_v9  ;;  %939 = vmatmul.mubr.bf16.gmra.mrb[52].mxu1 %v6185_v9 }
  0x8e   :  { %835 = vmatprep.mubr.bf16.mxu0 %v6356_v3  ;;  %948 = vmatprep.mubr.bf16.mxu1 %v6356_v3 }
  0x95   :  { %836 = vmatmul.mubr.bf16.gmra.mrb[56].mxu0 %v6186_v10  ;;  %949 = vmatmul.mubr.bf16.gmra.mrb[56].mxu1 %v6186_v10 }
  0x96   :  { %845 = vmatprep.mubr.bf16.mxu0 %v6356_v3  ;;  %958 = vmatprep.mubr.bf16.mxu1 %v6356_v3  ;;  %v6677_v3 = vrot.slane %v6669_v14, %v111_v13 }
  0x9d   :  { %846 = vmatmul.mubr.bf16.gmra.mrb[60].mxu0 %v6187_v11  ;;  %959 = vmatmul.mubr.bf16.gmra.mrb[60].mxu1 %v6187_v11 }
  0xf8   :  { %v551_v21 = vpop.f32.mrb[0].mxu0  ;;  %v664_v23 = vpop.f32.mrb[0].mxu1 }
  0xf9   :  { %v552_v22 = vadd.f32 %v551_v21, %v6677_v3  ;;  %v553_v24 = vpop.f32.mrb[1].mxu0  ;;  %v665_v25 = vadd.f32 %v664_v23, %v6682_v18  ;;  %v666_v27 = vpop.f32.mrb[1].mxu1 }
  0xfa   :  { %v554_v26 = vadd.f32 %v553_v24, %v6687_v19  ;;  %v555_v28 = vpop.f32.mrb[2].mxu0  ;;  %v667_v29 = vadd.f32 %v666_v27, %v6692_v20  ;;  %v668_v31 = vpop.f32.mrb[2].mxu1 }
  0xfb   :  { %v556_v30 = vadd.f32 %v555_v28, %v6677_v3  ;;  %v557_v32 = vpop.f32.mrb[3].mxu0  ;;  %v669_v34 = vadd.f32 %v668_v31, %v6682_v18  ;;  %v670_v36 = vpop.f32.mrb[3].mxu1 }
  0xfc   :  { %v5963_v33 = vpack.c.bf16 %v554_v26, %v552_v22  ;;  %v558_v35 = vadd.f32 %v557_v32, %v6687_v19  ;;  %v5964_v37 = vpack.c.bf16 %v667_v29, %v665_v25  ;;  %v671_v38 = vadd.f32 %v670_v36, %v6692_v20 }
  0xfe   :  { %1353 = vst [vmem:[#allocation2] sm:$0xff] %v5963_v33  ;;  %v5967_v39 = vpack.c.bf16 %v558_v35, %v556_v30  ;;  %1354 = vst [vmem:[#allocation2 + $0x8] sm:$0xff] %v5964_v37  ;;  %v5968_v40 = vpack.c.bf16 %v671_v38, %v669_v34 }
 0x100   :  { %1357 = vst [vmem:[#allocation2 + $0x20] sm:$0xff] %v5967_v39  ;;  %v561_v41 = vpop.f32.mrb[4].mxu0  ;;  %1358 = vst [vmem:[#allocation2 + $0x28] sm:$0xff] %v5968_v40  ;;  %v674_v43 = vpop.f32.mrb[4].mxu1 }
 0x101   :  { %v562_v42 = vadd.f32 %v561_v41, %v6677_v3  ;;  %v563_v44 = vpop.f32.mrb[5].mxu0  ;;  %v675_v45 = vadd.f32 %v674_v43, %v6682_v18  ;;  %v676_v47 = vpop.f32.mrb[5].mxu1 }
 0x102   :  { %v564_v46 = vadd.f32 %v563_v44, %v6687_v19  ;;  %v565_v48 = vpop.f32.mrb[6].mxu0  ;;  %v677_v49 = vadd.f32 %v676_v47, %v6692_v20  ;;  %v678_v51 = vpop.f32.mrb[6].mxu1 }
 0x103   :  { %v566_v50 = vadd.f32 %v565_v48, %v6677_v3  ;;  %v567_v52 = vpop.f32.mrb[7].mxu0  ;;  %v679_v54 = vadd.f32 %v678_v51, %v6682_v18  ;;  %v680_v56 = vpop.f32.mrb[7].mxu1 }
 0x104   :  { %v5971_v53 = vpack.c.bf16 %v564_v46, %v562_v42  ;;  %v568_v55 = vadd.f32 %v567_v52, %v6687_v19  ;;  %v5972_v57 = vpack.c.bf16 %v677_v49, %v675_v45  ;;  %v681_v58 = vadd.f32 %v680_v56, %v6692_v20 }
 0x106   :  { %1361 = vst [vmem:[#allocation2 + $0x40] sm:$0xff] %v5971_v53  ;;  %v5975_v59 = vpack.c.bf16 %v568_v55, %v566_v50  ;;  %1362 = vst [vmem:[#allocation2 + $0x48] sm:$0xff] %v5972_v57  ;;  %v5976_v60 = vpack.c.bf16 %v681_v58, %v679_v54 }
 0x108   :  { %1365 = vst [vmem:[#allocation2 + $0x60] sm:$0xff] %v5975_v59  ;;  %v571_v61 = vpop.f32.mrb[8].mxu0  ;;  %1366 = vst [vmem:[#allocation2 + $0x68] sm:$0xff] %v5976_v60  ;;  %v684_v63 = vpop.f32.mrb[8].mxu1 }
 0x109   :  { %v572_v62 = vadd.f32 %v571_v61, %v6677_v3  ;;  %v573_v0 = vpop.f32.mrb[9].mxu0  ;;  %v685_v1 = vadd.f32 %v684_v63, %v6682_v18  ;;  %v686_v4 = vpop.f32.mrb[9].mxu1 }
 0x10a   :  { %v574_v2 = vadd.f32 %v573_v0, %v6687_v19  ;;  %v575_v5 = vpop.f32.mrb[10].mxu0  ;;  %v687_v6 = vadd.f32 %v686_v4, %v6692_v20  ;;  %v688_v9 = vpop.f32.mrb[10].mxu1 }
 0x10b   :  { %v576_v7 = vadd.f32 %v575_v5, %v6677_v3  ;;  %v577_v10 = vpop.f32.mrb[11].mxu0  ;;  %v689_v8 = vadd.f32 %v688_v9, %v6682_v18  ;;  %v690_v22 = vpop.f32.mrb[11].mxu1 }
 0x10c   :  { %v5979_v11 = vpack.c.bf16 %v574_v2, %v572_v62  ;;  %v578_v21 = vadd.f32 %v577_v10, %v6687_v19  ;;  %v5980_v23 = vpack.c.bf16 %v687_v6, %v685_v1  ;;  %v691_v24 = vadd.f32 %v690_v22, %v6692_v20 }
 0x10e   :  { %1369 = vst [vmem:[#allocation2 + $0x80] sm:$0xff] %v5979_v11  ;;  %v5983_v25 = vpack.c.bf16 %v578_v21, %v576_v7  ;;  %1370 = vst [vmem:[#allocation2 + $0x88] sm:$0xff] %v5980_v23  ;;  %v5984_v26 = vpack.c.bf16 %v691_v24, %v689_v8 }
 0x110   :  { %1373 = vst [vmem:[#allocation2 + $0xa0] sm:$0xff] %v5983_v25  ;;  %v581_v27 = vpop.f32.mrb[12].mxu0  ;;  %1374 = vst [vmem:[#allocation2 + $0xa8] sm:$0xff] %v5984_v26  ;;  %v694_v29 = vpop.f32.mrb[12].mxu1 }
 0x111   :  { %v582_v28 = vadd.f32 %v581_v27, %v6677_v3  ;;  %v583_v30 = vpop.f32.mrb[13].mxu0  ;;  %v695_v31 = vadd.f32 %v694_v29, %v6682_v18  ;;  %v696_v33 = vpop.f32.mrb[13].mxu1 }
 0x112   :  { %v584_v32 = vadd.f32 %v583_v30, %v6687_v19  ;;  %v585_v34 = vpop.f32.mrb[14].mxu0  ;;  %v697_v35 = vadd.f32 %v696_v33, %v6692_v20  ;;  %v698_v37 = vpop.f32.mrb[14].mxu1 }
 0x113   :  { %v586_v36 = vadd.f32 %v585_v34, %v6677_v3  ;;  %v587_v38 = vpop.f32.mrb[15].mxu0  ;;  %v699_v40 = vadd.f32 %v698_v37, %v6682_v18  ;;  %v700_v42 = vpop.f32.mrb[15].mxu1 }
 0x114   :  { %v5987_v39 = vpack.c.bf16 %v584_v32, %v582_v28  ;;  %v588_v41 = vadd.f32 %v587_v38, %v6687_v19  ;;  %v5988_v43 = vpack.c.bf16 %v697_v35, %v695_v31  ;;  %v701_v44 = vadd.f32 %v700_v42, %v6692_v20 }
 0x116   :  { %1377 = vst [vmem:[#allocation2 + $0xc0] sm:$0xff] %v5987_v39  ;;  %v5991_v45 = vpack.c.bf16 %v588_v41, %v586_v36  ;;  %1378 = vst [vmem:[#allocation2 + $0xc8] sm:$0xff] %v5988_v43  ;;  %v5992_v46 = vpack.c.bf16 %v701_v44, %v699_v40 }
 0x118   :  { %1381 = vst [vmem:[#allocation2 + $0xe0] sm:$0xff] %v5991_v45  ;;  %v591_v47 = vpop.f32.mrb[16].mxu0  ;;  %1382 = vst [vmem:[#allocation2 + $0xe8] sm:$0xff] %v5992_v46  ;;  %v704_v49 = vpop.f32.mrb[16].mxu1 }
 0x119   :  { %v592_v48 = vadd.f32 %v591_v47, %v6677_v3  ;;  %v593_v50 = vpop.f32.mrb[17].mxu0  ;;  %v705_v51 = vadd.f32 %v704_v49, %v6682_v18  ;;  %v706_v53 = vpop.f32.mrb[17].mxu1 }
 0x11a   :  { %v594_v52 = vadd.f32 %v593_v50, %v6687_v19  ;;  %v595_v54 = vpop.f32.mrb[18].mxu0  ;;  %v707_v55 = vadd.f32 %v706_v53, %v6692_v20  ;;  %v708_v57 = vpop.f32.mrb[18].mxu1 }
 0x11b   :  { %v596_v56 = vadd.f32 %v595_v54, %v6677_v3  ;;  %v597_v58 = vpop.f32.mrb[19].mxu0  ;;  %v709_v60 = vadd.f32 %v708_v57, %v6682_v18  ;;  %v710_v62 = vpop.f32.mrb[19].mxu1  ;;  %v127_v57 = vsub.s32 4, %v6663_v12 }
 0x11c   :  { %v5995_v59 = vpack.c.bf16 %v594_v52, %v592_v48  ;;  %v598_v61 = vadd.f32 %v597_v58, %v6687_v19  ;;  %v5996_v63 = vpack.c.bf16 %v707_v55, %v705_v51  ;;  %v711_v0 = vadd.f32 %v710_v62, %v6692_v20 }
 0x11d   :  { %v135_v62 = vsub.s32 6, %v6663_v12 }
 0x11e   :  { %1385 = vst [vmem:[#allocation2 + $0x100] sm:$0xff] %v5995_v59  ;;  %v5999_v1 = vpack.c.bf16 %v598_v61, %v596_v56  ;;  %1386 = vst [vmem:[#allocation2 + $0x108] sm:$0xff] %v5996_v63  ;;  %v6000_v2 = vpack.c.bf16 %v711_v0, %v709_v60  ;;  %v131_v63 = vsub.s32 5, %v6663_v12 }
 0x120   :  { %1389 = vst [vmem:[#allocation2 + $0x120] sm:$0xff] %v5999_v1  ;;  %v601_v4 = vpop.f32.mrb[20].mxu0  ;;  %1390 = vst [vmem:[#allocation2 + $0x128] sm:$0xff] %v6000_v2  ;;  %v714_v6 = vpop.f32.mrb[20].mxu1 }
 0x121   :  { %v602_v5 = vadd.f32 %v601_v4, %v6677_v3  ;;  %v603_v7 = vpop.f32.mrb[21].mxu0  ;;  %v715_v9 = vadd.f32 %v714_v6, %v6682_v18  ;;  %v716_v11 = vpop.f32.mrb[21].mxu1 }
 0x122   :  { %v604_v10 = vadd.f32 %v603_v7, %v6687_v19  ;;  %v605_v8 = vpop.f32.mrb[22].mxu0  ;;  %v717_v21 = vadd.f32 %v716_v11, %v6692_v20  ;;  %v718_v23 = vpop.f32.mrb[22].mxu1 }
 0x123   :  { %v606_v22 = vadd.f32 %v605_v8, %v6677_v3  ;;  %v607_v24 = vpop.f32.mrb[23].mxu0  ;;  %v719_v26 = vadd.f32 %v718_v23, %v6682_v18  ;;  %v720_v28 = vpop.f32.mrb[23].mxu1 }
 0x124   :  { %v6003_v25 = vpack.c.bf16 %v604_v10, %v602_v5  ;;  %v608_v27 = vadd.f32 %v607_v24, %v6687_v19  ;;  %v6004_v29 = vpack.c.bf16 %v717_v21, %v715_v9  ;;  %v721_v30 = vadd.f32 %v720_v28, %v6692_v20 }
 0x125   :  { %v139_v5 = vsub.s32 7, %v6663_v12  ;;  %v6765_v21 = vrot.slane %v6669_v14, %v127_v57 }
 0x126   :  { %1393 = vst [vmem:[#allocation2 + $0x140] sm:$0xff] %v6003_v25  ;;  %v6007_v31 = vpack.c.bf16 %v608_v27, %v606_v22  ;;  %1394 = vst [vmem:[#allocation2 + $0x148] sm:$0xff] %v6004_v29  ;;  %v6008_v32 = vpack.c.bf16 %v721_v30, %v719_v26  ;;  %v6770_v22 = vrot.slane %v6669_v14, %v135_v62 }
 0x128   :  { %1397 = vst [vmem:[#allocation2 + $0x160] sm:$0xff] %v6007_v31  ;;  %v611_v33 = vpop.f32.mrb[24].mxu0  ;;  %1398 = vst [vmem:[#allocation2 + $0x168] sm:$0xff] %v6008_v32  ;;  %v724_v35 = vpop.f32.mrb[24].mxu1 }
 0x129   :  { %v612_v34 = vadd.f32 %v611_v33, %v6677_v3  ;;  %v613_v36 = vpop.f32.mrb[25].mxu0  ;;  %v725_v37 = vadd.f32 %v724_v35, %v6682_v18  ;;  %v726_v39 = vpop.f32.mrb[25].mxu1 }
 0x12a   :  { %v614_v38 = vadd.f32 %v613_v36, %v6687_v19  ;;  %v615_v40 = vpop.f32.mrb[26].mxu0  ;;  %v727_v41 = vadd.f32 %v726_v39, %v6692_v20  ;;  %v728_v43 = vpop.f32.mrb[26].mxu1 }
 0x12b   :  { %v616_v42 = vadd.f32 %v615_v40, %v6677_v3  ;;  %v617_v44 = vpop.f32.mrb[27].mxu0  ;;  %v729_v46 = vadd.f32 %v728_v43, %v6682_v18  ;;  %v730_v48 = vpop.f32.mrb[27].mxu1 }
 0x12c   :  { %v6011_v45 = vpack.c.bf16 %v614_v38, %v612_v34  ;;  %v618_v47 = vadd.f32 %v617_v44, %v6687_v19  ;;  %v6012_v49 = vpack.c.bf16 %v727_v41, %v725_v37  ;;  %v731_v50 = vadd.f32 %v730_v48, %v6692_v20 }
 0x12e   :  { %1401 = vst [vmem:[#allocation2 + $0x180] sm:$0xff] %v6011_v45  ;;  %v6015_v51 = vpack.c.bf16 %v618_v47, %v616_v42  ;;  %1402 = vst [vmem:[#allocation2 + $0x188] sm:$0xff] %v6012_v49  ;;  %v6016_v52 = vpack.c.bf16 %v731_v50, %v729_v46 }
 0x130   :  { %1405 = vst [vmem:[#allocation2 + $0x1a0] sm:$0xff] %v6015_v51  ;;  %v621_v53 = vpop.f32.mrb[28].mxu0  ;;  %1406 = vst [vmem:[#allocation2 + $0x1a8] sm:$0xff] %v6016_v52  ;;  %v734_v55 = vpop.f32.mrb[28].mxu1 }
 0x131   :  { %v622_v54 = vadd.f32 %v621_v53, %v6677_v3  ;;  %v623_v56 = vpop.f32.mrb[29].mxu0  ;;  %v735_v58 = vadd.f32 %v734_v55, %v6682_v18  ;;  %v736_v60 = vpop.f32.mrb[29].mxu1 }
 0x132   :  { %v624_v59 = vadd.f32 %v623_v56, %v6687_v19  ;;  %v625_v61 = vpop.f32.mrb[30].mxu0  ;;  %v737_v0 = vadd.f32 %v736_v60, %v6692_v20  ;;  %v738_v2 = vpop.f32.mrb[30].mxu1 }
 0x133   :  { %v626_v1 = vadd.f32 %v625_v61, %v6677_v3  ;;  %v627_v4 = vpop.f32.mrb[31].mxu0  ;;  %v739_v7 = vadd.f32 %v738_v2, %v6682_v18  ;;  %v740_v10 = vpop.f32.mrb[31].mxu1  ;;  %v6775_v18 = vrot.slane %v6669_v14, %v131_v63 }
 0x134   :  { %v6019_v6 = vpack.c.bf16 %v624_v59, %v622_v54  ;;  %v628_v9 = vadd.f32 %v627_v4, %v6687_v19  ;;  %v6020_v11 = vpack.c.bf16 %v737_v0, %v735_v58  ;;  %v741_v8 = vadd.f32 %v740_v10, %v6692_v20 }
 0x135   :  { %v6780_v20 = vrot.slane %v6669_v14, %v139_v5 }
 0x136   :  { %1409 = vst [vmem:[#allocation2 + $0x1c0] sm:$0xff] %v6019_v6  ;;  %v6023_v3 = vpack.c.bf16 %v628_v9, %v626_v1  ;;  %1410 = vst [vmem:[#allocation2 + $0x1c8] sm:$0xff] %v6020_v11  ;;  %v6024_v19 = vpack.c.bf16 %v741_v8, %v739_v7 }
 0x138   :  { %1413 = vst [vmem:[#allocation2 + $0x1e0] sm:$0xff] %v6023_v3  ;;  %v777_v23 = vpop.f32.mrb[32].mxu0  ;;  %1414 = vst [vmem:[#allocation2 + $0x1e8] sm:$0xff] %v6024_v19  ;;  %v890_v25 = vpop.f32.mrb[32].mxu1 }
 0x139   :  { %v778_v24 = vadd.f32 %v777_v23, %v6765_v21  ;;  %v779_v26 = vpop.f32.mrb[33].mxu0  ;;  %v891_v27 = vadd.f32 %v890_v25, %v6770_v22  ;;  %v892_v29 = vpop.f32.mrb[33].mxu1 }
 0x13a   :  { %v780_v28 = vadd.f32 %v779_v26, %v6775_v18  ;;  %v781_v30 = vpop.f32.mrb[34].mxu0  ;;  %v893_v31 = vadd.f32 %v892_v29, %v6780_v20  ;;  %v894_v33 = vpop.f32.mrb[34].mxu1 }
 0x13b   :  { %v782_v32 = vadd.f32 %v781_v30, %v6765_v21  ;;  %v783_v14 = vpop.f32.mrb[35].mxu0  ;;  %v895_v35 = vadd.f32 %v894_v33, %v6770_v22  ;;  %v896_v37 = vpop.f32.mrb[35].mxu1 }
 0x13c   :  { %v5965_v34 = vpack.c.bf16 %v780_v28, %v778_v24  ;;  %v784_v36 = vadd.f32 %v783_v14, %v6775_v18  ;;  %v5966_v38 = vpack.c.bf16 %v893_v31, %v891_v27  ;;  %v897_v39 = vadd.f32 %v896_v37, %v6780_v20 }
 0x13e   :  { %1355 = vst [vmem:[#allocation2 + $0x10] sm:$0xff] %v5965_v34  ;;  %v5969_v40 = vpack.c.bf16 %v784_v36, %v782_v32  ;;  %1356 = vst [vmem:[#allocation2 + $0x18] sm:$0xff] %v5966_v38  ;;  %v5970_v41 = vpack.c.bf16 %v897_v39, %v895_v35 }
 0x140   :  { %1359 = vst [vmem:[#allocation2 + $0x30] sm:$0xff] %v5969_v40  ;;  %v787_v42 = vpop.f32.mrb[36].mxu0  ;;  %1360 = vst [vmem:[#allocation2 + $0x38] sm:$0xff] %v5970_v41  ;;  %v900_v44 = vpop.f32.mrb[36].mxu1 }
 0x141   :  { %v788_v43 = vadd.f32 %v787_v42, %v6765_v21  ;;  %v789_v45 = vpop.f32.mrb[37].mxu0  ;;  %v901_v46 = vadd.f32 %v900_v44, %v6770_v22  ;;  %v902_v48 = vpop.f32.mrb[37].mxu1 }
 0x142   :  { %v790_v47 = vadd.f32 %v789_v45, %v6775_v18  ;;  %v791_v49 = vpop.f32.mrb[38].mxu0  ;;  %v903_v50 = vadd.f32 %v902_v48, %v6780_v20  ;;  %v904_v52 = vpop.f32.mrb[38].mxu1 }
 0x143   :  { %v792_v51 = vadd.f32 %v791_v49, %v6765_v21  ;;  %v793_v53 = vpop.f32.mrb[39].mxu0  ;;  %v905_v55 = vadd.f32 %v904_v52, %v6770_v22  ;;  %v906_v58 = vpop.f32.mrb[39].mxu1 }
 0x144   :  { %v5973_v54 = vpack.c.bf16 %v790_v47, %v788_v43  ;;  %v794_v56 = vadd.f32 %v793_v53, %v6775_v18  ;;  %v5974_v59 = vpack.c.bf16 %v903_v50, %v901_v46  ;;  %v907_v60 = vadd.f32 %v906_v58, %v6780_v20 }
 0x146   :  { %1363 = vst [vmem:[#allocation2 + $0x50] sm:$0xff] %v5973_v54  ;;  %v5977_v61 = vpack.c.bf16 %v794_v56, %v792_v51  ;;  %1364 = vst [vmem:[#allocation2 + $0x58] sm:$0xff] %v5974_v59  ;;  %v5978_v0 = vpack.c.bf16 %v907_v60, %v905_v55 }
 0x148   :  { %1367 = vst [vmem:[#allocation2 + $0x70] sm:$0xff] %v5977_v61  ;;  %v797_v1 = vpop.f32.mrb[40].mxu0  ;;  %1368 = vst [vmem:[#allocation2 + $0x78] sm:$0xff] %v5978_v0  ;;  %v910_v4 = vpop.f32.mrb[40].mxu1 }
 0x149   :  { %v798_v2 = vadd.f32 %v797_v1, %v6765_v21  ;;  %v799_v6 = vpop.f32.mrb[41].mxu0  ;;  %v911_v7 = vadd.f32 %v910_v4, %v6770_v22  ;;  %v912_v10 = vpop.f32.mrb[41].mxu1 }
 0x14a   :  { %v800_v9 = vadd.f32 %v799_v6, %v6775_v18  ;;  %v801_v11 = vpop.f32.mrb[42].mxu0  ;;  %v913_v8 = vadd.f32 %v912_v10, %v6780_v20  ;;  %v914_v19 = vpop.f32.mrb[42].mxu1 }
 0x14b   :  { %v802_v3 = vadd.f32 %v801_v11, %v6765_v21  ;;  %v803_v23 = vpop.f32.mrb[43].mxu0  ;;  %v915_v25 = vadd.f32 %v914_v19, %v6770_v22  ;;  %v916_v27 = vpop.f32.mrb[43].mxu1 }
 0x14c   :  { %v5981_v24 = vpack.c.bf16 %v800_v9, %v798_v2  ;;  %v804_v26 = vadd.f32 %v803_v23, %v6775_v18  ;;  %v5982_v28 = vpack.c.bf16 %v913_v8, %v911_v7  ;;  %v917_v29 = vadd.f32 %v916_v27, %v6780_v20 }
 0x14e   :  { %1371 = vst [vmem:[#allocation2 + $0x90] sm:$0xff] %v5981_v24  ;;  %v5985_v30 = vpack.c.bf16 %v804_v26, %v802_v3  ;;  %1372 = vst [vmem:[#allocation2 + $0x98] sm:$0xff] %v5982_v28  ;;  %v5986_v31 = vpack.c.bf16 %v917_v29, %v915_v25 }
 0x150   :  { %1375 = vst [vmem:[#allocation2 + $0xb0] sm:$0xff] %v5985_v30  ;;  %v807_v32 = vpop.f32.mrb[44].mxu0  ;;  %1376 = vst [vmem:[#allocation2 + $0xb8] sm:$0xff] %v5986_v31  ;;  %v920_v14 = vpop.f32.mrb[44].mxu1 }
 0x151   :  { %v808_v33 = vadd.f32 %v807_v32, %v6765_v21  ;;  %v809_v34 = vpop.f32.mrb[45].mxu0  ;;  %v921_v35 = vadd.f32 %v920_v14, %v6770_v22  ;;  %v922_v37 = vpop.f32.mrb[45].mxu1 }
 0x152   :  { %v810_v36 = vadd.f32 %v809_v34, %v6775_v18  ;;  %v811_v38 = vpop.f32.mrb[46].mxu0  ;;  %v923_v39 = vadd.f32 %v922_v37, %v6780_v20  ;;  %v924_v41 = vpop.f32.mrb[46].mxu1 }
 0x153   :  { %v812_v40 = vadd.f32 %v811_v38, %v6765_v21  ;;  %v813_v42 = vpop.f32.mrb[47].mxu0  ;;  %v925_v44 = vadd.f32 %v924_v41, %v6770_v22  ;;  %v926_v46 = vpop.f32.mrb[47].mxu1 }
 0x154   :  { %v5989_v43 = vpack.c.bf16 %v810_v36, %v808_v33  ;;  %v814_v45 = vadd.f32 %v813_v42, %v6775_v18  ;;  %v5990_v47 = vpack.c.bf16 %v923_v39, %v921_v35  ;;  %v927_v48 = vadd.f32 %v926_v46, %v6780_v20 }
 0x156   :  { %1379 = vst [vmem:[#allocation2 + $0xd0] sm:$0xff] %v5989_v43  ;;  %v5993_v49 = vpack.c.bf16 %v814_v45, %v812_v40  ;;  %1380 = vst [vmem:[#allocation2 + $0xd8] sm:$0xff] %v5990_v47  ;;  %v5994_v50 = vpack.c.bf16 %v927_v48, %v925_v44 }
 0x158   :  { %1383 = vst [vmem:[#allocation2 + $0xf0] sm:$0xff] %v5993_v49  ;;  %v817_v51 = vpop.f32.mrb[48].mxu0  ;;  %1384 = vst [vmem:[#allocation2 + $0xf8] sm:$0xff] %v5994_v50  ;;  %v930_v53 = vpop.f32.mrb[48].mxu1 }
 0x159   :  { %v818_v52 = vadd.f32 %v817_v51, %v6765_v21  ;;  %v819_v54 = vpop.f32.mrb[49].mxu0  ;;  %v931_v55 = vadd.f32 %v930_v53, %v6770_v22  ;;  %v932_v58 = vpop.f32.mrb[49].mxu1 }
 0x15a   :  { %v820_v56 = vadd.f32 %v819_v54, %v6775_v18  ;;  %v821_v59 = vpop.f32.mrb[50].mxu0  ;;  %v933_v60 = vadd.f32 %v932_v58, %v6780_v20  ;;  %v934_v0 = vpop.f32.mrb[50].mxu1 }
 0x15b   :  { %v822_v61 = vadd.f32 %v821_v59, %v6765_v21  ;;  %v823_v1 = vpop.f32.mrb[51].mxu0  ;;  %v935_v4 = vadd.f32 %v934_v0, %v6770_v22  ;;  %v936_v7 = vpop.f32.mrb[51].mxu1 }
 0x15c   :  { %v5997_v2 = vpack.c.bf16 %v820_v56, %v818_v52  ;;  %v824_v6 = vadd.f32 %v823_v1, %v6775_v18  ;;  %v5998_v9 = vpack.c.bf16 %v933_v60, %v931_v55  ;;  %v937_v10 = vadd.f32 %v936_v7, %v6780_v20 }
 0x15e   :  { %1387 = vst [vmem:[#allocation2 + $0x110] sm:$0xff] %v5997_v2  ;;  %v6001_v11 = vpack.c.bf16 %v824_v6, %v822_v61  ;;  %1388 = vst [vmem:[#allocation2 + $0x118] sm:$0xff] %v5998_v9  ;;  %v6002_v8 = vpack.c.bf16 %v937_v10, %v935_v4 }
 0x160   :  { %1391 = vst [vmem:[#allocation2 + $0x130] sm:$0xff] %v6001_v11  ;;  %v827_v3 = vpop.f32.mrb[52].mxu0  ;;  %1392 = vst [vmem:[#allocation2 + $0x138] sm:$0xff] %v6002_v8  ;;  %v940_v23 = vpop.f32.mrb[52].mxu1 }
 0x161   :  { %v828_v19 = vadd.f32 %v827_v3, %v6765_v21  ;;  %v829_v24 = vpop.f32.mrb[53].mxu0  ;;  %v941_v25 = vadd.f32 %v940_v23, %v6770_v22  ;;  %v942_v27 = vpop.f32.mrb[53].mxu1 }
 0x162   :  { %v830_v26 = vadd.f32 %v829_v24, %v6775_v18  ;;  %v831_v28 = vpop.f32.mrb[54].mxu0  ;;  %v943_v29 = vadd.f32 %v942_v27, %v6780_v20  ;;  %v944_v31 = vpop.f32.mrb[54].mxu1 }
 0x163   :  { %v832_v30 = vadd.f32 %v831_v28, %v6765_v21  ;;  %v833_v32 = vpop.f32.mrb[55].mxu0  ;;  %v945_v14 = vadd.f32 %v944_v31, %v6770_v22  ;;  %v946_v35 = vpop.f32.mrb[55].mxu1  ;;  %v6850_v31 = vmov 0.0  }
 0x164   :  { %v6005_v33 = vpack.c.bf16 %v830_v26, %v828_v19  ;;  %v834_v34 = vadd.f32 %v833_v32, %v6775_v18  ;;  %v6006_v36 = vpack.c.bf16 %v943_v29, %v941_v25  ;;  %v947_v37 = vadd.f32 %v946_v35, %v6780_v20 }
 0x165   :  { %v6852_v32 = vmov 0.0  }
 0x166   :  { %1395 = vst [vmem:[#allocation2 + $0x150] sm:$0xff] %v6005_v33  ;;  %v6009_v38 = vpack.c.bf16 %v834_v34, %v832_v30  ;;  %1396 = vst [vmem:[#allocation2 + $0x158] sm:$0xff] %v6006_v36  ;;  %v6010_v39 = vpack.c.bf16 %v947_v37, %v945_v14  ;;  %v6846_v30 = vmov 0.0  }
 0x168   :  { %1399 = vst [vmem:[#allocation2 + $0x170] sm:$0xff] %v6009_v38  ;;  %v837_v40 = vpop.f32.mrb[56].mxu0  ;;  %1400 = vst [vmem:[#allocation2 + $0x178] sm:$0xff] %v6010_v39  ;;  %v950_v42 = vpop.f32.mrb[56].mxu1 }
 0x169   :  { %v838_v41 = vadd.f32 %v837_v40, %v6765_v21  ;;  %v839_v43 = vpop.f32.mrb[57].mxu0  ;;  %v951_v44 = vadd.f32 %v950_v42, %v6770_v22  ;;  %v952_v46 = vpop.f32.mrb[57].mxu1 }
 0x16a   :  { %v840_v45 = vadd.f32 %v839_v43, %v6775_v18  ;;  %v841_v47 = vpop.f32.mrb[58].mxu0  ;;  %v953_v48 = vadd.f32 %v952_v46, %v6780_v20  ;;  %v954_v50 = vpop.f32.mrb[58].mxu1 }
 0x16b   :  { %v842_v49 = vadd.f32 %v841_v47, %v6765_v21  ;;  %v843_v51 = vpop.f32.mrb[59].mxu0  ;;  %v955_v53 = vadd.f32 %v954_v50, %v6770_v22  ;;  %v956_v55 = vpop.f32.mrb[59].mxu1 }
 0x16c   :  { %v6013_v52 = vpack.c.bf16 %v840_v45, %v838_v41  ;;  %v844_v54 = vadd.f32 %v843_v51, %v6775_v18  ;;  %v6014_v56 = vpack.c.bf16 %v953_v48, %v951_v44  ;;  %v957_v58 = vadd.f32 %v956_v55, %v6780_v20 }
 0x16e   :  { %1403 = vst [vmem:[#allocation2 + $0x190] sm:$0xff] %v6013_v52  ;;  %v6017_v59 = vpack.c.bf16 %v844_v54, %v842_v49  ;;  %1404 = vst [vmem:[#allocation2 + $0x198] sm:$0xff] %v6014_v56  ;;  %v6018_v60 = vpack.c.bf16 %v957_v58, %v955_v53 }
 0x170   :  { %1407 = vst [vmem:[#allocation2 + $0x1b0] sm:$0xff] %v6017_v59  ;;  %v847_v61 = vpop.f32.mrb[60].mxu0  ;;  %1408 = vst [vmem:[#allocation2 + $0x1b8] sm:$0xff] %v6018_v60  ;;  %v960_v1 = vpop.f32.mrb[60].mxu1 }
 0x171   :  { %v848_v0 = vadd.f32 %v847_v61, %v6765_v21  ;;  %v849_v2 = vpop.f32.mrb[61].mxu0  ;;  %v961_v4 = vadd.f32 %v960_v1, %v6770_v22  ;;  %v962_v7 = vpop.f32.mrb[61].mxu1 }
 0x172   :  { %v850_v6 = vadd.f32 %v849_v2, %v6775_v18  ;;  %v851_v9 = vpop.f32.mrb[62].mxu0  ;;  %v963_v10 = vadd.f32 %v962_v7, %v6780_v20  ;;  %v964_v8 = vpop.f32.mrb[62].mxu1 }
 0x173   :  { %v852_v11 = vadd.f32 %v851_v9, %v6765_v21  ;;  %v853_v3 = vpop.f32.mrb[63].mxu0  ;;  %v965_v23 = vadd.f32 %v964_v8, %v6770_v22  ;;  %v966_v25 = vpop.f32.mrb[63].mxu1  ;;  %v6848_v21 = vmov 0.0  }
 0x174   :  { %v6021_v19 = vpack.c.bf16 %v850_v6, %v848_v0  ;;  %v854_v24 = vadd.f32 %v853_v3, %v6775_v18  ;;  %v6022_v26 = vpack.c.bf16 %v963_v10, %v961_v4  ;;  %v967_v27 = vadd.f32 %v966_v25, %v6780_v20 }
 0x176   :  { %1411 = vst [vmem:[#allocation2 + $0x1d0] sm:$0xff] %v6021_v19  ;;  %v6025_v28 = vpack.c.bf16 %v854_v24, %v852_v11  ;;  %1412 = vst [vmem:[#allocation2 + $0x1d8] sm:$0xff] %v6022_v26  ;;  %v6026_v29 = vpack.c.bf16 %v967_v27, %v965_v23 }
 0x178   :  { %1415 = vst [vmem:[#allocation2 + $0x1f0] sm:$0xff] %v6025_v28  ;;  %1416 = vst [vmem:[#allocation2 + $0x1f8] sm:$0xff] %v6026_v29 }
 0x179 LB: > { %v1429_v22 = vld [vmem:[%s8382_s2] sm:$0xff]  ;;  %v1430_v38 = vld [vmem:[%s8382_s2 + $0x8] sm:$0xff]  ;;  %v6893_v40 = vpack.c.bf16 %v6326_v31, %v6326_v31  ;;  %s6027_s13 = sshll.u32 %s6334_s3, 5  ;;  %s6029_s15 = sshll.u32 %s6334_s3, 3  ;;  %s6334_s3 = sphi %s6854_s3, %s1422_s3   ;;  %v6330_v32 = vphi %v6852_v32, %v2433_v32   ;;  %v6326_v31 = vphi %v6850_v31, %v2435_v31   ;;  %v6322_v21 = vphi %v6848_v21, %v2427_v21   ;;  %v6318_v30 = vphi %v6846_v30, %v2431_v30  }
 0x17a   : > { %v1433_v18 = vld [vmem:[%s8382_s2 + $0x20] sm:$0xff]  ;;  %v1434_v39 = vld [vmem:[%s8382_s2 + $0x28] sm:$0xff]  ;;  %s2364_s14 = scalar_lea.vmem [#allocation2], %s6027_s13  ;;  %s2439_s16 = scalar_lea.vmem [#allocation3], %s6029_s15 }
 0x17b   : > { %v1437_v20 = vld [vmem:[%s8382_s2 + $0x40] sm:$0xff]  ;;  %v5472_v33 = vcombine.high %v1429_v22, %v1433_v18  ;;  %v5471_v14 = vcombine.low %v1429_v22, %v1433_v18  ;;  %v5474_v42 = vcombine.high %v1430_v38, %v1434_v39  ;;  %v5473_v43 = vcombine.low %v1430_v38, %v1434_v39  ;;  %v1438_v44 = vld [vmem:[%s8382_s2 + $0x48] sm:$0xff]  ;;  %2229 = vmatprep.mubr.bf16.mxu0 %v6893_v40  ;;  %s2361_s17 = ssub.s32 15, %s6334_s3  ;;  %s1422_s3 = sadd.s32 1, %s6334_s3  }
 0x17c   : > { %v1441_v34 = vld [vmem:[%s8382_s2 + $0x60] sm:$0xff]  ;;  %v1442_v45 = vld [vmem:[%s8382_s2 + $0x68] sm:$0xff]  ;;  %2270 = vmatprep.mubr.bf16.mxu1 %v6893_v40  ;;  %s6028_s18 = sshll.u32 %s2361_s17, 5  ;;  %s6030_s20 = sshll.u32 %s2361_s17, 3 }
 0x17d   : > { %v5480_v35 = vcombine.high %v1437_v20, %v1441_v34  ;;  %v1445_v36 = vld [vmem:[%s8382_s2 + $0x80] sm:$0xff]  ;;  %2197 = vmatprep.subr.bf16.mxu0 %v5472_v33  ;;  %v5479_v41 = vcombine.low %v1437_v20, %v1441_v34  ;;  %v5482_v47 = vcombine.high %v1438_v44, %v1442_v45  ;;  %v1446_v48 = vld [vmem:[%s8382_s2 + $0x88] sm:$0xff]  ;;  %2238 = vmatprep.subr.bf16.mxu1 %v5474_v42  ;;  %s2377_s19 = scalar_lea.vmem [#allocation2], %s6028_s18  ;;  %s2444_s21 = scalar_lea.vmem [#allocation3], %s6030_s20 }
 0x17e   : > { %v1449_v37 = vld [vmem:[%s8382_s2 + $0xa0] sm:$0xff]  ;;  %2198 = vmatpush1.bf16.msra.mxu0 %v5471_v14  ;;  %v1450_v49 = vld [vmem:[%s8382_s2 + $0xa8] sm:$0xff]  ;;  %2239 = vmatpush1.bf16.msra.mxu1 %v5473_v43  ;;  %v5481_v52 = vcombine.low %v1438_v44, %v1442_v45  ;;  %p1419_p0 = scmp.ge.s32.totalorder %s1422_s3, 16  }
 0x17f   : > { %2199 = vmatprep.subr.bf16.mxu0 %v5480_v35  ;;  %v5488_v46 = vcombine.high %v1445_v36, %v1449_v37  ;;  %v1453_v50 = vld [vmem:[%s8382_s2 + $0xc0] sm:$0xff]  ;;  %v5487_v53 = vcombine.low %v1445_v36, %v1449_v37  ;;  %2240 = vmatprep.subr.bf16.mxu1 %v5482_v47  ;;  %v5490_v54 = vcombine.high %v1446_v48, %v1450_v49  ;;  %v1454_v56 = vld [vmem:[%s8382_s2 + $0xc8] sm:$0xff] }
 0x180   : > { %v1457_v51 = vld [vmem:[%s8382_s2 + $0xe0] sm:$0xff]  ;;  %v1458_v58 = vld [vmem:[%s8382_s2 + $0xe8] sm:$0xff]  ;;  %v5489_v61 = vcombine.low %v1446_v48, %v1450_v49 }
 0x181   : > { %v5496_v55 = vcombine.high %v1453_v50, %v1457_v51  ;;  %v1461_v59 = vld [vmem:[%s8382_s2 + $0x100] sm:$0xff]  ;;  %v5495_v0 = vcombine.low %v1453_v50, %v1457_v51  ;;  %v5498_v1 = vcombine.high %v1454_v56, %v1458_v58  ;;  %v1462_v4 = vld [vmem:[%s8382_s2 + $0x108] sm:$0xff]  ;;  %v5497_v10 = vcombine.low %v1454_v56, %v1458_v58 }
 0x182   : > { %2200 = vmatpush1.bf16.msra.mxu0 %v5479_v41  ;;  %v1465_v60 = vld [vmem:[%s8382_s2 + $0x120] sm:$0xff]  ;;  %2241 = vmatpush1.bf16.msra.mxu1 %v5481_v52  ;;  %v1466_v6 = vld [vmem:[%s8382_s2 + $0x128] sm:$0xff] }
 0x183   : > { %2201 = vmatprep.subr.bf16.mxu0 %v5488_v46  ;;  %2242 = vmatprep.subr.bf16.mxu1 %v5490_v54  ;;  %v5504_v2 = vcombine.high %v1461_v59, %v1465_v60  ;;  %v1469_v7 = vld [vmem:[%s8382_s2 + $0x140] sm:$0xff]  ;;  %v5503_v11 = vcombine.low %v1461_v59, %v1465_v60  ;;  %v5506_v8 = vcombine.high %v1462_v4, %v1466_v6  ;;  %v1470_v19 = vld [vmem:[%s8382_s2 + $0x148] sm:$0xff] }
 0x184   : > { %v1473_v9 = vld [vmem:[%s8382_s2 + $0x160] sm:$0xff]  ;;  %v1474_v23 = vld [vmem:[%s8382_s2 + $0x168] sm:$0xff]  ;;  %v5505_v26 = vcombine.low %v1462_v4, %v1466_v6 }
 0x185   : > { %v5512_v3 = vcombine.high %v1469_v7, %v1473_v9  ;;  %v1477_v24 = vld [vmem:[%s8382_s2 + $0x180] sm:$0xff]  ;;  %v5511_v27 = vcombine.low %v1469_v7, %v1473_v9  ;;  %v5514_v28 = vcombine.high %v1470_v19, %v1474_v23  ;;  %v1478_v31 = vld [vmem:[%s8382_s2 + $0x188] sm:$0xff]  ;;  %v5513_v33 = vcombine.low %v1470_v19, %v1474_v23 }
 0x186   : > { %2202 = vmatpush1.bf16.msra.mxu0 %v5487_v53  ;;  %2243 = vmatpush1.bf16.msra.mxu1 %v5489_v61  ;;  %v1481_v25 = vld [vmem:[%s8382_s2 + $0x1a0] sm:$0xff]  ;;  %v1482_v22 = vld [vmem:[%s8382_s2 + $0x1a8] sm:$0xff] }
 0x187   : > { %2203 = vmatprep.subr.bf16.mxu0 %v5496_v55  ;;  %2244 = vmatprep.subr.bf16.mxu1 %v5498_v1  ;;  %v5520_v29 = vcombine.high %v1477_v24, %v1481_v25  ;;  %v1485_v18 = vld [vmem:[%s8382_s2 + $0x1c0] sm:$0xff]  ;;  %v5519_v14 = vcombine.low %v1477_v24, %v1481_v25  ;;  %v5522_v34 = vcombine.high %v1478_v31, %v1482_v22  ;;  %v1486_v36 = vld [vmem:[%s8382_s2 + $0x1c8] sm:$0xff] }
 0x188   : > { %v1489_v20 = vld [vmem:[%s8382_s2 + $0x1e0] sm:$0xff]  ;;  %v1490_v37 = vld [vmem:[%s8382_s2 + $0x1e8] sm:$0xff]  ;;  %v5521_v41 = vcombine.low %v1478_v31, %v1482_v22 }
 0x189   : > { %v5528_v35 = vcombine.high %v1485_v18, %v1489_v20  ;;  %v1493_v38 = vld [vmem:[%s8382_s2 + $0x200] sm:$0xff]  ;;  %v5527_v42 = vcombine.low %v1485_v18, %v1489_v20  ;;  %v5530_v43 = vcombine.high %v1486_v36, %v1490_v37  ;;  %v1494_v45 = vld [vmem:[%s8382_s2 + $0x208] sm:$0xff]  ;;  %v5529_v49 = vcombine.low %v1486_v36, %v1490_v37 }
 0x18a   : > { %2204 = vmatpush1.bf16.msra.mxu0 %v5495_v0  ;;  %2245 = vmatpush1.bf16.msra.mxu1 %v5497_v10  ;;  %v1497_v39 = vld [vmem:[%s8382_s2 + $0x220] sm:$0xff]  ;;  %v1498_v46 = vld [vmem:[%s8382_s2 + $0x228] sm:$0xff] }
 0x18b   : > { %2205 = vmatprep.subr.bf16.mxu0 %v5504_v2  ;;  %2246 = vmatprep.subr.bf16.mxu1 %v5506_v8  ;;  %v5536_v44 = vcombine.high %v1493_v38, %v1497_v39  ;;  %v1501_v47 = vld [vmem:[%s8382_s2 + $0x240] sm:$0xff]  ;;  %v5535_v50 = vcombine.low %v1493_v38, %v1497_v39  ;;  %v5538_v51 = vcombine.high %v1494_v45, %v1498_v46  ;;  %v1502_v53 = vld [vmem:[%s8382_s2 + $0x248] sm:$0xff] }
 0x18c   : > { %v1505_v48 = vld [vmem:[%s8382_s2 + $0x260] sm:$0xff]  ;;  %v1506_v54 = vld [vmem:[%s8382_s2 + $0x268] sm:$0xff]  ;;  %v5537_v58 = vcombine.low %v1494_v45, %v1498_v46 }
 0x18d   : > { %v5544_v52 = vcombine.high %v1501_v47, %v1505_v48  ;;  %v1509_v55 = vld [vmem:[%s8382_s2 + $0x280] sm:$0xff]  ;;  %v5543_v59 = vcombine.low %v1501_v47, %v1505_v48  ;;  %v5546_v60 = vcombine.high %v1502_v53, %v1506_v54  ;;  %v1510_v0 = vld [vmem:[%s8382_s2 + $0x288] sm:$0xff]  ;;  %v5545_v6 = vcombine.low %v1502_v53, %v1506_v54  ;;  %v1435_v53 = vld [vmem:[%s8382_s2 + $0x30] sm:$0xff] }
 0x18e   : > { %2206 = vmatpush1.bf16.msra.mxu0 %v5503_v11  ;;  %2247 = vmatpush1.bf16.msra.mxu1 %v5505_v26  ;;  %v1513_v56 = vld [vmem:[%s8382_s2 + $0x2a0] sm:$0xff]  ;;  %v1514_v1 = vld [vmem:[%s8382_s2 + $0x2a8] sm:$0xff] }
 0x18f   : > { %2207 = vmatprep.subr.bf16.mxu0 %v5512_v3  ;;  %2248 = vmatprep.subr.bf16.mxu1 %v5514_v28  ;;  %v5552_v61 = vcombine.high %v1509_v55, %v1513_v56  ;;  %v1517_v2 = vld [vmem:[%s8382_s2 + $0x2c0] sm:$0xff]  ;;  %v5551_v7 = vcombine.low %v1509_v55, %v1513_v56  ;;  %v5554_v9 = vcombine.high %v1510_v0, %v1514_v1  ;;  %v1518_v11 = vld [vmem:[%s8382_s2 + $0x2c8] sm:$0xff] }
 0x190   : > { %v1521_v4 = vld [vmem:[%s8382_s2 + $0x2e0] sm:$0xff]  ;;  %v1522_v8 = vld [vmem:[%s8382_s2 + $0x2e8] sm:$0xff]  ;;  %v5553_v23 = vcombine.low %v1510_v0, %v1514_v1  ;;  %v1443_v0 = vld [vmem:[%s8382_s2 + $0x70] sm:$0xff]  ;;  %v7085_v1 = vpack.c.bf16 %v6330_v32, %v6330_v32 }
 0x191   : > { %v5560_v10 = vcombine.high %v1517_v2, %v1521_v4  ;;  %v1525_v3 = vld [vmem:[%s8382_s2 + $0x300] sm:$0xff]  ;;  %v5559_v24 = vcombine.low %v1517_v2, %v1521_v4  ;;  %v5562_v25 = vcombine.high %v1518_v11, %v1522_v8  ;;  %v1530_v28 = vld [vmem:[%s8382_s2 + $0x328] sm:$0xff]  ;;  %v5561_v22 = vcombine.low %v1518_v11, %v1522_v8  ;;  %v1447_v32 = vld [vmem:[%s8382_s2 + $0x90] sm:$0xff] }
 0x192   : > { %2208 = vmatpush1.bf16.msra.mxu0 %v5511_v27  ;;  %2249 = vmatpush1.bf16.msra.mxu1 %v5513_v33  ;;  %v1529_v19 = vld [vmem:[%s8382_s2 + $0x320] sm:$0xff]  ;;  %v1526_v27 = vld [vmem:[%s8382_s2 + $0x308] sm:$0xff]  ;;  %v1451_v11 = vld [vmem:[%s8382_s2 + $0xb0] sm:$0xff] }
 0x193   : > { %2209 = vmatprep.subr.bf16.mxu0 %v5520_v29  ;;  %2250 = vmatprep.subr.bf16.mxu1 %v5522_v34  ;;  %v5568_v26 = vcombine.high %v1525_v3, %v1529_v19  ;;  %v1533_v29 = vld [vmem:[%s8382_s2 + $0x340] sm:$0xff]  ;;  %v5567_v18 = vcombine.low %v1525_v3, %v1529_v19  ;;  %v5570_v20 = vcombine.high %v1526_v27, %v1530_v28  ;;  %v1538_v34 = vld [vmem:[%s8382_s2 + $0x368] sm:$0xff] }
 0x194   : > { %v1537_v31 = vld [vmem:[%s8382_s2 + $0x360] sm:$0xff]  ;;  %v5569_v37 = vcombine.low %v1526_v27, %v1530_v28  ;;  %v1459_v27 = vld [vmem:[%s8382_s2 + $0xf0] sm:$0xff] }
 0x195   : > { %v5576_v33 = vcombine.high %v1533_v29, %v1537_v31  ;;  %v1545_v36 = vld [vmem:[%s8382_s2 + $0x3a0] sm:$0xff]  ;;  %v5575_v38 = vcombine.low %v1533_v29, %v1537_v31  ;;  %v5491_v29 = vcombine.low %v1447_v32, %v1451_v11 }
 0x196   : > { %2210 = vmatpush1.bf16.msra.mxu0 %v5519_v14  ;;  %2251 = vmatpush1.bf16.msra.mxu1 %v5521_v41  ;;  %v1534_v14 = vld [vmem:[%s8382_s2 + $0x348] sm:$0xff]  ;;  %v1553_v45 = vld [vmem:[%s8382_s2 + $0x3e0] sm:$0xff] }
 0x197   : > { %2211 = vmatprep.subr.bf16.mxu0 %v5528_v35  ;;  %2252 = vmatprep.subr.bf16.mxu1 %v5530_v43  ;;  %v1541_v35 = vld [vmem:[%s8382_s2 + $0x380] sm:$0xff]  ;;  %v5578_v39 = vcombine.high %v1534_v14, %v1538_v34  ;;  %v1546_v43 = vld [vmem:[%s8382_s2 + $0x3a8] sm:$0xff]  ;;  %v5577_v46 = vcombine.low %v1534_v14, %v1538_v34 }
 0x198   : > { %v5584_v41 = vcombine.high %v1541_v35, %v1545_v36  ;;  %v5583_v47 = vcombine.low %v1541_v35, %v1545_v36 }
 0x19a   : > { %2212 = vmatpush1.bf16.msra.mxu0 %v5527_v42  ;;  %2253 = vmatpush1.bf16.msra.mxu1 %v5529_v49  ;;  %v1542_v42 = vld [vmem:[%s8382_s2 + $0x388] sm:$0xff] }
 0x19b   : > { %2213 = vmatprep.subr.bf16.mxu0 %v5536_v44  ;;  %2254 = vmatprep.subr.bf16.mxu1 %v5538_v51  ;;  %v1549_v44 = vld [vmem:[%s8382_s2 + $0x3c0] sm:$0xff]  ;;  %v5586_v48 = vcombine.high %v1542_v42, %v1546_v43  ;;  %v1554_v51 = vld [vmem:[%s8382_s2 + $0x3e8] sm:$0xff]  ;;  %v5585_v54 = vcombine.low %v1542_v42, %v1546_v43 }
 0x19c   : > { %v5592_v49 = vcombine.high %v1549_v44, %v1553_v45  ;;  %v5591_v55 = vcombine.low %v1549_v44, %v1553_v45 }
 0x19e   : > { %2214 = vmatpush1.bf16.msra.mxu0 %v5535_v50  ;;  %2255 = vmatpush1.bf16.msra.mxu1 %v5537_v58  ;;  %v1550_v50 = vld [vmem:[%s8382_s2 + $0x3c8] sm:$0xff] }
 0x19f   : > { %2215 = vmatprep.subr.bf16.mxu0 %v5544_v52  ;;  %2256 = vmatprep.subr.bf16.mxu1 %v5546_v60  ;;  %v1431_v52 = vld [vmem:[%s8382_s2 + $0x10] sm:$0xff]  ;;  %v5594_v56 = vcombine.high %v1550_v50, %v1554_v51  ;;  %v1436_v60 = vld [vmem:[%s8382_s2 + $0x38] sm:$0xff]  ;;  %v5593_v2 = vcombine.low %v1550_v50, %v1554_v51 }
 0x1a0   : > { %v5476_v58 = vcombine.high %v1431_v52, %v1435_v53  ;;  %v5475_v4 = vcombine.low %v1431_v52, %v1435_v53 }
 0x1a2   : > { %2216 = vmatpush1.bf16.msra.mxu0 %v5543_v59  ;;  %2257 = vmatpush1.bf16.msra.mxu1 %v5545_v6  ;;  %v1432_v59 = vld [vmem:[%s8382_s2 + $0x18] sm:$0xff] }
 0x1a3   : > { %2217 = vmatprep.subr.bf16.mxu0 %v5552_v61  ;;  %2258 = vmatprep.subr.bf16.mxu1 %v5554_v9  ;;  %v1439_v61 = vld [vmem:[%s8382_s2 + $0x50] sm:$0xff]  ;;  %v5478_v6 = vcombine.high %v1432_v59, %v1436_v60  ;;  %v1440_v9 = vld [vmem:[%s8382_s2 + $0x58] sm:$0xff]  ;;  %v5477_v8 = vcombine.low %v1432_v59, %v1436_v60 }
 0x1a4   : > { %v5483_v3 = vcombine.low %v1439_v61, %v1443_v0 }
 0x1a6   : > { %2218 = vmatpush1.bf16.msra.mxu0 %v5551_v7  ;;  %2259 = vmatpush1.bf16.msra.mxu1 %v5553_v23  ;;  %v5484_v7 = vcombine.high %v1439_v61, %v1443_v0  ;;  %v5492_v23 = vcombine.high %v1447_v32, %v1451_v11 }
 0x1a7   : > { %2219 = vmatprep.subr.bf16.mxu0 %v5560_v10  ;;  %2260 = vmatprep.subr.bf16.mxu1 %v5562_v25  ;;  %v1444_v10 = vld [vmem:[%s8382_s2 + $0x78] sm:$0xff] }
 0x1a8   : > { %v5486_v19 = vcombine.high %v1440_v9, %v1444_v10  ;;  %v1452_v25 = vld [vmem:[%s8382_s2 + $0xb8] sm:$0xff]  ;;  %v5485_v28 = vcombine.low %v1440_v9, %v1444_v10 }
 0x1aa   : > { %2220 = vmatpush1.bf16.msra.mxu0 %v5559_v24  ;;  %2261 = vmatpush1.bf16.msra.mxu1 %v5561_v22  ;;  %v1448_v24 = vld [vmem:[%s8382_s2 + $0x98] sm:$0xff] }
 0x1ab   : > { %2221 = vmatprep.subr.bf16.mxu0 %v5568_v26  ;;  %2262 = vmatprep.subr.bf16.mxu1 %v5570_v20  ;;  %v1455_v26 = vld [vmem:[%s8382_s2 + $0xd0] sm:$0xff]  ;;  %v5494_v31 = vcombine.high %v1448_v24, %v1452_v25  ;;  %v1460_v20 = vld [vmem:[%s8382_s2 + $0xf8] sm:$0xff]  ;;  %v5493_v14 = vcombine.low %v1448_v24, %v1452_v25 }
 0x1ac   : > { %v5500_v22 = vcombine.high %v1455_v26, %v1459_v27  ;;  %v5499_v34 = vcombine.low %v1455_v26, %v1459_v27 }
 0x1ae   : > { %2222 = vmatpush1.bf16.msra.mxu0 %v5567_v18  ;;  %2263 = vmatpush1.bf16.msra.mxu1 %v5569_v37  ;;  %v1456_v18 = vld [vmem:[%s8382_s2 + $0xd8] sm:$0xff] }
 0x1af   : > { %2223 = vmatprep.subr.bf16.mxu0 %v5576_v33  ;;  %2264 = vmatprep.subr.bf16.mxu1 %v5578_v39  ;;  %v1463_v33 = vld [vmem:[%s8382_s2 + $0x110] sm:$0xff]  ;;  %v5502_v35 = vcombine.high %v1456_v18, %v1460_v20  ;;  %v1464_v37 = vld [vmem:[%s8382_s2 + $0x118] sm:$0xff]  ;;  %v5501_v42 = vcombine.low %v1456_v18, %v1460_v20 }
 0x1b0   : > { %v1471_v39 = vld [vmem:[%s8382_s2 + $0x150] sm:$0xff] }
 0x1b2   : > { %2224 = vmatpush1.bf16.msra.mxu0 %v5575_v38  ;;  %2265 = vmatpush1.bf16.msra.mxu1 %v5577_v46  ;;  %v1468_v38 = vld [vmem:[%s8382_s2 + $0x138] sm:$0xff] }
 0x1b3   : > { %2225 = vmatprep.subr.bf16.mxu0 %v5584_v41  ;;  %2266 = vmatprep.subr.bf16.mxu1 %v5586_v48  ;;  %v1475_v41 = vld [vmem:[%s8382_s2 + $0x170] sm:$0xff]  ;;  %v5510_v44 = vcombine.high %v1464_v37, %v1468_v38  ;;  %v1472_v46 = vld [vmem:[%s8382_s2 + $0x158] sm:$0xff]  ;;  %v5509_v50 = vcombine.low %v1464_v37, %v1468_v38 }
 0x1b4   : > { %v5516_v45 = vcombine.high %v1471_v39, %v1475_v41  ;;  %v1479_v48 = vld [vmem:[%s8382_s2 + $0x190] sm:$0xff]  ;;  %v5515_v51 = vcombine.low %v1471_v39, %v1475_v41 }
 0x1b6   : > { %2226 = vmatpush1.bf16.msra.mxu0 %v5583_v47  ;;  %2267 = vmatpush1.bf16.msra.mxu1 %v5585_v54  ;;  %v1476_v47 = vld [vmem:[%s8382_s2 + $0x178] sm:$0xff] }
 0x1b7   : > { %2227 = vmatprep.subr.bf16.mxu0 %v5592_v49  ;;  %2268 = vmatprep.subr.bf16.mxu1 %v5594_v56  ;;  %v1483_v49 = vld [vmem:[%s8382_s2 + $0x1b0] sm:$0xff]  ;;  %v5518_v52 = vcombine.high %v1472_v46, %v1476_v47  ;;  %v1480_v54 = vld [vmem:[%s8382_s2 + $0x198] sm:$0xff]  ;;  %v5517_v59 = vcombine.low %v1472_v46, %v1476_v47 }
 0x1b8   : > { %v5524_v53 = vcombine.high %v1479_v48, %v1483_v49  ;;  %v1487_v56 = vld [vmem:[%s8382_s2 + $0x1d0] sm:$0xff]  ;;  %v5523_v60 = vcombine.low %v1479_v48, %v1483_v49 }
 0x1ba   : > { %2228 = vmatpush1.bf16.msra.mxu0 %v5591_v55  ;;  %2269 = vmatpush1.bf16.msra.mxu1 %v5593_v2  ;;  %v1484_v55 = vld [vmem:[%s8382_s2 + $0x1b8] sm:$0xff] }
 0x1bb   : > { %2279 = vmatprep.subr.bf16.mxu0 %v5476_v58  ;;  %2320 = vmatprep.subr.bf16.mxu1 %v5478_v6  ;;  %v1491_v58 = vld [vmem:[%s8382_s2 + $0x1f0] sm:$0xff]  ;;  %v5526_v61 = vcombine.high %v1480_v54, %v1484_v55  ;;  %v1488_v2 = vld [vmem:[%s8382_s2 + $0x1d8] sm:$0xff]  ;;  %v5525_v9 = vcombine.low %v1480_v54, %v1484_v55 }
 0x1bc   : > { %v5532_v0 = vcombine.high %v1487_v56, %v1491_v58  ;;  %v1495_v6 = vld [vmem:[%s8382_s2 + $0x210] sm:$0xff]  ;;  %v5531_v10 = vcombine.low %v1487_v56, %v1491_v58 }
 0x1bd   : > { %2230 = vmatmul.mubr.bf16.vlgmr.msra.gmra.mrb[0].mxu0 %v7085_v1  ;;  %2271 = vmatmul.mubr.bf16.vlgmr.msra.gmra.mrb[0].mxu1 %v7085_v1 }
 0x1be   : > { %2280 = vmatpush1.bf16.msra.mxu0 %v5475_v4  ;;  %2311 = vmatprep.mubr.bf16.mxu0 %v6893_v40  ;;  %v1492_v4 = vld [vmem:[%s8382_s2 + $0x1f8] sm:$0xff] }
 0x1bf   : > { %2281 = vmatprep.subr.bf16.mxu0 %v5484_v7  ;;  %2321 = vmatpush1.bf16.msra.mxu1 %v5477_v8  ;;  %v1499_v7 = vld [vmem:[%s8382_s2 + $0x230] sm:$0xff]  ;;  %v5534_v32 = vcombine.high %v1488_v2, %v1492_v4  ;;  %v1496_v8 = vld [vmem:[%s8382_s2 + $0x218] sm:$0xff]  ;;  %v5533_v24 = vcombine.low %v1488_v2, %v1492_v4 }
 0x1c0   : > { %2352 = vmatprep.mubr.bf16.mxu1 %v6893_v40  ;;  %2322 = vmatprep.subr.bf16.mxu1 %v5486_v19  ;;  %v1467_v40 = vld [vmem:[%s8382_s2 + $0x130] sm:$0xff]  ;;  %v5540_v11 = vcombine.high %v1495_v6, %v1499_v7  ;;  %v5539_v25 = vcombine.low %v1495_v6, %v1499_v7 }
 0x1c1   : > { %v5508_v36 = vcombine.high %v1463_v33, %v1467_v40  ;;  %v5507_v43 = vcombine.low %v1463_v33, %v1467_v40  ;;  %v1503_v19 = vld [vmem:[%s8382_s2 + $0x250] sm:$0xff] }
 0x1c2   : > { %2282 = vmatpush1.bf16.msra.mxu0 %v5483_v3  ;;  %v1500_v3 = vld [vmem:[%s8382_s2 + $0x238] sm:$0xff] }
 0x1c3   : > { %2283 = vmatprep.subr.bf16.mxu0 %v5492_v23  ;;  %2323 = vmatpush1.bf16.msra.mxu1 %v5485_v28  ;;  %v1507_v23 = vld [vmem:[%s8382_s2 + $0x270] sm:$0xff]  ;;  %v5542_v26 = vcombine.high %v1496_v8, %v1500_v3  ;;  %v1504_v28 = vld [vmem:[%s8382_s2 + $0x258] sm:$0xff]  ;;  %v5541_v18 = vcombine.low %v1496_v8, %v1500_v3 }
 0x1c4   : > { %2324 = vmatprep.subr.bf16.mxu1 %v5494_v31  ;;  %v5548_v27 = vcombine.high %v1503_v19, %v1507_v23  ;;  %v1511_v31 = vld [vmem:[%s8382_s2 + $0x290] sm:$0xff]  ;;  %v5547_v20 = vcombine.low %v1503_v19, %v1507_v23 }
 0x1c6   : > { %2284 = vmatpush1.bf16.msra.mxu0 %v5491_v29  ;;  %v1508_v29 = vld [vmem:[%s8382_s2 + $0x278] sm:$0xff] }
 0x1c7   : > { %2285 = vmatprep.subr.bf16.mxu0 %v5500_v22  ;;  %2325 = vmatpush1.bf16.msra.mxu1 %v5493_v14  ;;  %v1515_v22 = vld [vmem:[%s8382_s2 + $0x2b0] sm:$0xff]  ;;  %v5550_v33 = vcombine.high %v1504_v28, %v1508_v29  ;;  %v1512_v14 = vld [vmem:[%s8382_s2 + $0x298] sm:$0xff]  ;;  %v5549_v37 = vcombine.low %v1504_v28, %v1508_v29 }
 0x1c8   : > { %2326 = vmatprep.subr.bf16.mxu1 %v5502_v35  ;;  %v5556_v40 = vcombine.high %v1511_v31, %v1515_v22  ;;  %v1519_v35 = vld [vmem:[%s8382_s2 + $0x2d0] sm:$0xff]  ;;  %v5555_v38 = vcombine.low %v1511_v31, %v1515_v22  ;;  %v2365_v31 = vld [vmem:[%s2364_s14] sm:$0xff] }
 0x1c9   : > { %v2367_v22 = vunpack.c.l.bf16 %v2365_v31 }
 0x1ca   : > { %2286 = vmatpush1.bf16.msra.mxu0 %v5499_v34  ;;  %v1516_v34 = vld [vmem:[%s8382_s2 + $0x2b8] sm:$0xff] }
 0x1cb   : > { %2287 = vmatprep.subr.bf16.mxu0 %v5508_v36  ;;  %2327 = vmatpush1.bf16.msra.mxu1 %v5501_v42  ;;  %v1523_v36 = vld [vmem:[%s8382_s2 + $0x2f0] sm:$0xff]  ;;  %v5558_v39 = vcombine.high %v1512_v14, %v1516_v34  ;;  %v1520_v42 = vld [vmem:[%s8382_s2 + $0x2d8] sm:$0xff]  ;;  %v5557_v46 = vcombine.low %v1512_v14, %v1516_v34 }
 0x1cc   : > { %2328 = vmatprep.subr.bf16.mxu1 %v5510_v44  ;;  %v5564_v41 = vcombine.high %v1519_v35, %v1523_v36  ;;  %v1527_v44 = vld [vmem:[%s8382_s2 + $0x310] sm:$0xff]  ;;  %v5563_v47 = vcombine.low %v1519_v35, %v1523_v36 }
 0x1ce   : > { %2288 = vmatpush1.bf16.msra.mxu0 %v5507_v43  ;;  %v1524_v43 = vld [vmem:[%s8382_s2 + $0x2f8] sm:$0xff] }
 0x1cf   : > { %2289 = vmatprep.subr.bf16.mxu0 %v5516_v45  ;;  %2329 = vmatpush1.bf16.msra.mxu1 %v5509_v50  ;;  %v1531_v45 = vld [vmem:[%s8382_s2 + $0x330] sm:$0xff]  ;;  %v5566_v48 = vcombine.high %v1520_v42, %v1524_v43  ;;  %v1528_v50 = vld [vmem:[%s8382_s2 + $0x318] sm:$0xff]  ;;  %v5565_v54 = vcombine.low %v1520_v42, %v1524_v43 }
 0x1d0   : > { %2330 = vmatprep.subr.bf16.mxu1 %v5518_v52  ;;  %v5572_v49 = vcombine.high %v1527_v44, %v1531_v45  ;;  %v1535_v52 = vld [vmem:[%s8382_s2 + $0x350] sm:$0xff]  ;;  %v5571_v55 = vcombine.low %v1527_v44, %v1531_v45 }
 0x1d2   : > { %2290 = vmatpush1.bf16.msra.mxu0 %v5515_v51  ;;  %v1532_v51 = vld [vmem:[%s8382_s2 + $0x338] sm:$0xff] }
 0x1d3   : > { %2291 = vmatprep.subr.bf16.mxu0 %v5524_v53  ;;  %2331 = vmatpush1.bf16.msra.mxu1 %v5517_v59  ;;  %v1539_v53 = vld [vmem:[%s8382_s2 + $0x370] sm:$0xff]  ;;  %v5574_v56 = vcombine.high %v1528_v50, %v1532_v51  ;;  %v1536_v59 = vld [vmem:[%s8382_s2 + $0x358] sm:$0xff]  ;;  %v5573_v2 = vcombine.low %v1528_v50, %v1532_v51 }
 0x1d4   : > { %2332 = vmatprep.subr.bf16.mxu1 %v5526_v61  ;;  %v5580_v58 = vcombine.high %v1535_v52, %v1539_v53  ;;  %v1543_v61 = vld [vmem:[%s8382_s2 + $0x390] sm:$0xff]  ;;  %v5579_v4 = vcombine.low %v1535_v52, %v1539_v53 }
 0x1d6   : > { %2292 = vmatpush1.bf16.msra.mxu0 %v5523_v60  ;;  %v1540_v60 = vld [vmem:[%s8382_s2 + $0x378] sm:$0xff] }
 0x1d7   : > { %2293 = vmatprep.subr.bf16.mxu0 %v5532_v0  ;;  %2333 = vmatpush1.bf16.msra.mxu1 %v5525_v9  ;;  %v1547_v0 = vld [vmem:[%s8382_s2 + $0x3b0] sm:$0xff]  ;;  %v5582_v6 = vcombine.high %v1536_v59, %v1540_v60  ;;  %v1544_v9 = vld [vmem:[%s8382_s2 + $0x398] sm:$0xff]  ;;  %v5581_v8 = vcombine.low %v1536_v59, %v1540_v60 }
 0x1d8   : > { %2334 = vmatprep.subr.bf16.mxu1 %v5534_v32  ;;  %v5588_v7 = vcombine.high %v1543_v61, %v1547_v0  ;;  %v1551_v32 = vld [vmem:[%s8382_s2 + $0x3d0] sm:$0xff]  ;;  %v5587_v3 = vcombine.low %v1543_v61, %v1547_v0 }
 0x1da   : > { %2294 = vmatpush1.bf16.msra.mxu0 %v5531_v10  ;;  %v1548_v10 = vld [vmem:[%s8382_s2 + $0x3b8] sm:$0xff] }
 0x1db   : > { %2295 = vmatprep.subr.bf16.mxu0 %v5540_v11  ;;  %2335 = vmatpush1.bf16.msra.mxu1 %v5533_v24  ;;  %v1555_v11 = vld [vmem:[%s8382_s2 + $0x3f0] sm:$0xff]  ;;  %v5590_v19 = vcombine.high %v1544_v9, %v1548_v10  ;;  %v1552_v24 = vld [vmem:[%s8382_s2 + $0x3d8] sm:$0xff] }
 0x1dc   : > { %2336 = vmatprep.subr.bf16.mxu1 %v5542_v26  ;;  %v5596_v23 = vcombine.high %v1551_v32, %v1555_v11  ;;  %v5589_v26 = vcombine.low %v1544_v9, %v1548_v10  ;;  %v2379_v9 = vld [vmem:[%s2377_s19 + $0x18] sm:$0xff] }
 0x1de   : > { %2296 = vmatpush1.bf16.msra.mxu0 %v5539_v25  ;;  %v1556_v25 = vld [vmem:[%s8382_s2 + $0x3f8] sm:$0xff] }
 0x1df   : > { %2297 = vmatprep.subr.bf16.mxu0 %v5548_v27  ;;  %2337 = vmatpush1.bf16.msra.mxu1 %v5541_v18  ;;  %v5595_v27 = vcombine.low %v1551_v32, %v1555_v11  ;;  %v5598_v28 = vcombine.high %v1552_v24, %v1556_v25  ;;  %v5597_v29 = vcombine.low %v1552_v24, %v1556_v25  ;;  %v2368_v18 = vunpack.c.h.bf16 %v2365_v31 }
 0x1e0   : > { %2338 = vmatprep.subr.bf16.mxu1 %v5550_v33  ;;  %v2366_v33 = vld [vmem:[%s2364_s14 + $0x8] sm:$0xff]  ;;  %v2382_v25 = vunpack.c.l.bf16 %v2379_v9 }
 0x1e1   : > { %v2370_v45 = vunpack.c.h.bf16 %v2366_v33 }
 0x1e2   : > { %2298 = vmatpush1.bf16.msra.mxu0 %v5547_v20 }
 0x1e3   : > { %2299 = vmatprep.subr.bf16.mxu0 %v5556_v40  ;;  %2339 = vmatpush1.bf16.msra.mxu1 %v5549_v37 }
 0x1e4   : > { %2340 = vmatprep.subr.bf16.mxu1 %v5558_v39  ;;  %v2369_v39 = vunpack.c.l.bf16 %v2366_v33 }
 0x1e6   : > { %2300 = vmatpush1.bf16.msra.mxu0 %v5555_v38 }
 0x1e7   : > { %2301 = vmatprep.subr.bf16.mxu0 %v5564_v41  ;;  %2341 = vmatpush1.bf16.msra.mxu1 %v5557_v46 }
 0x1e8   : > { %2342 = vmatprep.subr.bf16.mxu1 %v5566_v48 }
 0x1ea   : > { %2302 = vmatpush1.bf16.msra.mxu0 %v5563_v47 }
 0x1eb   : > { %2303 = vmatprep.subr.bf16.mxu0 %v5572_v49  ;;  %2343 = vmatpush1.bf16.msra.mxu1 %v5565_v54 }
 0x1ec   : > { %2344 = vmatprep.subr.bf16.mxu1 %v5574_v56 }
 0x1ee   : > { %2304 = vmatpush1.bf16.msra.mxu0 %v5571_v55 }
 0x1ef   : > { %2305 = vmatprep.subr.bf16.mxu0 %v5580_v58  ;;  %2345 = vmatpush1.bf16.msra.mxu1 %v5573_v2  ;;  %v2378_v2 = vld [vmem:[%s2377_s19 + $0x10] sm:$0xff] }
 0x1f0   : > { %2346 = vmatprep.subr.bf16.mxu1 %v5582_v6  ;;  %v2381_v6 = vunpack.c.h.bf16 %v2378_v2 }
 0x1f2   : > { %2306 = vmatpush1.bf16.msra.mxu0 %v5579_v4  ;;  %v2380_v4 = vunpack.c.l.bf16 %v2378_v2 }
 0x1f3   : > { %2307 = vmatprep.subr.bf16.mxu0 %v5588_v7  ;;  %2347 = vmatpush1.bf16.msra.mxu1 %v5581_v8 }
 0x1f4   : > { %2348 = vmatprep.subr.bf16.mxu1 %v5590_v19 }
 0x1f6   : > { %2308 = vmatpush1.bf16.msra.mxu0 %v5587_v3 }
 0x1f7   : > { %2309 = vmatprep.subr.bf16.mxu0 %v5596_v23  ;;  %2349 = vmatpush1.bf16.msra.mxu1 %v5589_v26 }
 0x1f8   : > { %2350 = vmatprep.subr.bf16.mxu1 %v5598_v28 }
 0x1fa   : > { %2310 = vmatpush1.bf16.msra.mxu0 %v5595_v27 }
 0x1fb   : > { %2351 = vmatpush1.bf16.msra.mxu1 %v5597_v29 }
 0x1fd   : > { %2312 = vmatmul.mubr.bf16.vlgmr.msra.gmra.mrb[4].mxu0 %v7085_v1 }
 0x1fe   : > { %2353 = vmatmul.mubr.bf16.vlgmr.msra.gmra.mrb[4].mxu1 %v7085_v1 }
 0x290   : > { %v2231_v20 = vpop.f32.mrb[0].mxu0  ;;  %v2272_v38 = vpop.f32.mrb[0].mxu1 }
 0x291   : > { %v2371_v40 = vadd.f32 %v2367_v22, %v2231_v20  ;;  %v2233_v14 = vpop.f32.mrb[1].mxu0  ;;  %v2274_v42 = vpop.f32.mrb[1].mxu1  ;;  %v2373_v44 = vadd.f32 %v2369_v39, %v2272_v38  ;;  %v2383_v22 = vunpack.c.h.bf16 %v2379_v9  ;;  %v2487_v9 = vld [vmem:[%s8383_s4 + $0xc8] sm:$0xff] (%p1419_p0) }
 0x292   : > { %v2372_v34 = vadd.f32 %v2368_v18, %v2233_v14  ;;  %v2235_v35 = vpop.f32.mrb[2].mxu0  ;;  %v2276_v43 = vpop.f32.mrb[2].mxu1  ;;  %v2374_v47 = vadd.f32 %v2370_v45, %v2274_v42  ;;  %v2462_v45 = vld [vmem:[%s8383_s4] sm:$0xff] (%p1419_p0) }
 0x293   : > { %v5603_v36 = vmul.f32 -1.442695, %v2371_v40  ;;  %v2236_v37 = vpop.f32.mrb[3].mxu0  ;;  %v2277_v1 = vpop.f32.mrb[3].mxu1  ;;  %v5605_v46 = vmul.f32 -1.442695, %v2373_v44 }
 0x294   : > { %v5604_v41 = vmul.f32 -1.442695, %v2372_v34 }
 0x295   : > { %6188 = vpow2.f32 %v5603_v36 }
 0x296   : > { %6190 = vpow2.f32 %v5604_v41 }
 0x297   : > { %6192 = vpow2.f32 %v5605_v46  ;;  %v2466_v46 = vld [vmem:[%s8383_s4 + $0x20] sm:$0xff] (%p1419_p0) }
 0x298   : > { %6194 = vtanh.f32 %v2374_v47  ;;  %v2463_v47 = vld [vmem:[%s8383_s4 + $0x8] sm:$0xff] (%p1419_p0) }
 0x29f   : > { %v6189_v48 = vpop.eup %6188 }
 0x2a0   : > { %v6191_v49 = vpop.eup %6190  ;;  %v2397_v50 = vadd.f32 1.0, %v6189_v48  ;;  %v5630_v48 = vcombine.high (%p1419_p0), %v2462_v45, %v2466_v46 }
 0x2a1   : > { %v2398_v51 = vadd.f32 1.0, %v6191_v49  ;;  %v6193_v52 = vpop.eup %6192  ;;  %v5629_v49 = vcombine.low (%p1419_p0), %v2462_v45, %v2466_v46  ;;  %v2522_v45 = vld [vmem:[%s8383_s4 + $0x1e0] sm:$0xff] (%p1419_p0) }
 0x2a2   : > { %6196 = vrcp.f32 %v2397_v50  ;;  %v6195_v53 = vpop.eup %6194  ;;  %v2399_v55 = vadd.f32 1.0, %v6193_v52  ;;  %3352 = vmatprep.subr.bf16.mxu0 (%p1419_p0), %v5630_v48  ;;  %v2523_v48 = vld [vmem:[%s8383_s4 + $0x1e8] sm:$0xff] (%p1419_p0) }
 0x2a3   : > { %6198 = vrcp.f32 %v2398_v51  ;;  %3353 = vmatpush1.bf16.msra.mxu0 (%p1419_p0), %v5629_v49 }
 0x2a4   : > { %6200 = vrcp.f32 %v2399_v55  ;;  %v2478_v55 = vld [vmem:[%s8383_s4 + $0x80] sm:$0xff] (%p1419_p0) }
 0x2ac   : > { %v6197_v54 = vpop.eup %6196 }
 0x2ad   : > { %v6199_v56 = vpop.eup %6198  ;;  %v2426_v58 = vmul.f32 %v6197_v54, %v6195_v53  ;;  %v2471_v53 = vld [vmem:[%s8383_s4 + $0x48] sm:$0xff] (%p1419_p0) }
 0x2ae   : > { %v2424_v59 = vmul.f32 %v6322_v21, %v6199_v56  ;;  %v6201_v60 = vpop.eup %6200  ;;  %v2475_v54 = vld [vmem:[%s8383_s4 + $0x68] sm:$0xff] (%p1419_p0) }
 0x2af   :  { %v5640_v56 = vcombine.high (%p1419_p0), %v2471_v53, %v2475_v54 }
 0x2b0   : > { %v2427_v21 = vadd.f32 %v2426_v58, %v2424_v59   ;;  %v2482_v58 = vld [vmem:[%s8383_s4 + $0xa0] sm:$0xff] (%p1419_p0)  ;;  %v2479_v59 = vld [vmem:[%s8383_s4 + $0x88] sm:$0xff] (%p1419_p0) }
 0x2b1   :  { %v5646_v2 = vcombine.high (%p1419_p0), %v2478_v55, %v2482_v58 }
 0x2b2   : > { %6202 = vtanh.f32 %v2427_v21  ;;  %v2474_v21 = vld [vmem:[%s8383_s4 + $0x60] sm:$0xff] (%p1419_p0) }
 0x2bc   : > { %v6203_v61 = vpop.eup %6202 }
 0x2bd   : > { %v2433_v32 = vmul.f32 %v6203_v61, %v6201_v60   ;;  %v2483_v60 = vld [vmem:[%s8383_s4 + $0xa8] sm:$0xff] (%p1419_p0) }
 0x2bf   : > { %v2436_v0 = vpack.c.bf16 %v2433_v32, %v2433_v32  ;;  %v2467_v32 = vld [vmem:[%s8383_s4 + $0x28] sm:$0xff] (%p1419_p0) }
 0x2c0   :  { %v5632_v50 = vcombine.high (%p1419_p0), %v2463_v47, %v2467_v32  ;;  %v5631_v51 = vcombine.low (%p1419_p0), %v2463_v47, %v2467_v32  ;;  %v2519_v47 = vld [vmem:[%s8383_s4 + $0x1c8] sm:$0xff] (%p1419_p0) }
 0x2c1   : > { %2440 = vst [vmem:[%s2439_s16] sm:$0xf] %v2436_v0  ;;  %v5639_v0 = vcombine.low (%p1419_p0), %v2471_v53, %v2475_v54  ;;  %v2531_v53 = vld [vmem:[%s8383_s4 + $0x228] sm:$0xff] (%p1419_p0) }
 0x2c2   :  { %3465 = vmatprep.subr.bf16.mxu1 (%p1419_p0), %v5632_v50  ;;  %v2526_v50 = vld [vmem:[%s8383_s4 + $0x200] sm:$0xff] (%p1419_p0) }
 0x2c3   :  { %3466 = vmatpush1.bf16.msra.mxu1 (%p1419_p0), %v5631_v51  ;;  %v2530_v51 = vld [vmem:[%s8383_s4 + $0x220] sm:$0xff] (%p1419_p0) }
 0x2c4   :  { %3467 = vmatprep.subr.bf16.mxu1 (%p1419_p0), %v5640_v56  ;;  %v5694_v56 = vcombine.high (%p1419_p0), %v2526_v50, %v2530_v51 }
 0x2c7   :  { %3468 = vmatpush1.bf16.msra.mxu1 (%p1419_p0), %v5639_v0  ;;  %v2539_v0 = vld [vmem:[%s8383_s4 + $0x268] sm:$0xff] (%p1419_p0) }
 0x2d0   : > { %v2313_v7 = vpop.f32.mrb[4].mxu0 }
 0x2d1   : > { %v2384_v10 = vadd.f32 %v2380_v4, %v2313_v7  ;;  %v2315_v11 = vpop.f32.mrb[5].mxu0  ;;  %v2354_v24 = vpop.f32.mrb[4].mxu1  ;;  %v5648_v4 = vcombine.high (%p1419_p0), %v2479_v59, %v2483_v60  ;;  %v2490_v7 = vld [vmem:[%s8383_s4 + $0xe0] sm:$0xff] (%p1419_p0) }
 0x2d2   : > { %v2385_v8 = vadd.f32 %v2381_v6, %v2315_v11  ;;  %v2317_v3 = vpop.f32.mrb[6].mxu0  ;;  %v2356_v27 = vpop.f32.mrb[5].mxu1  ;;  %v2386_v31 = vadd.f32 %v2382_v25, %v2354_v24  ;;  %v2486_v6 = vld [vmem:[%s8383_s4 + $0xc0] sm:$0xff] (%p1419_p0)  ;;  %v5645_v11 = vcombine.low (%p1419_p0), %v2478_v55, %v2482_v58  ;;  %v2495_v25 = vld [vmem:[%s8383_s4 + $0x108] sm:$0xff] (%p1419_p0)  ;;  %v5687_v55 = vcombine.low (%p1419_p0), %v2519_v47, %v2523_v48 }
 0x2d3   : > { %v5606_v19 = vmul.f32 -1.442695, %v2384_v10  ;;  %v2318_v23 = vpop.f32.mrb[7].mxu0  ;;  %v2358_v28 = vpop.f32.mrb[6].mxu1  ;;  %v2387_v20 = vadd.f32 %v2383_v22, %v2356_v27  ;;  %v2491_v10 = vld [vmem:[%s8383_s4 + $0xe8] sm:$0xff] (%p1419_p0)  ;;  %v5654_v3 = vcombine.high (%p1419_p0), %v2486_v6, %v2490_v7  ;;  %3469 = vmatprep.subr.bf16.mxu1 (%p1419_p0), %v5648_v4  ;;  %v2498_v24 = vld [vmem:[%s8383_s4 + $0x120] sm:$0xff] (%p1419_p0)  ;;  %v5653_v27 = vcombine.low (%p1419_p0), %v2486_v6, %v2490_v7 }
 0x2d4   : > { %v5607_v26 = vmul.f32 -1.442695, %v2385_v8  ;;  %v2359_v29 = vpop.f32.mrb[7].mxu1  ;;  %v5608_v18 = vmul.f32 -1.442695, %v2386_v31  ;;  %v5647_v8 = vcombine.low (%p1419_p0), %v2479_v59, %v2483_v60  ;;  %v2494_v23 = vld [vmem:[%s8383_s4 + $0x100] sm:$0xff] (%p1419_p0)  ;;  %v5655_v28 = vcombine.low (%p1419_p0), %v2487_v9, %v2491_v10 }
 0x2d5   : > { %6204 = vpow2.f32 %v5606_v19  ;;  %v5656_v19 = vcombine.high (%p1419_p0), %v2487_v9, %v2491_v10  ;;  %v5662_v29 = vcombine.high (%p1419_p0), %v2494_v23, %v2498_v24  ;;  %v2502_v22 = vld [vmem:[%s8383_s4 + $0x140] sm:$0xff] (%p1419_p0) }
 0x2d6   : > { %6206 = vpow2.f32 %v5607_v26  ;;  %v2499_v26 = vld [vmem:[%s8383_s4 + $0x128] sm:$0xff] (%p1419_p0)  ;;  %3470 = vmatpush1.bf16.msra.mxu1 (%p1419_p0), %v5647_v8  ;;  %v2534_v59 = vld [vmem:[%s8383_s4 + $0x240] sm:$0xff] (%p1419_p0) }
 0x2d7   : > { %6208 = vpow2.f32 %v5608_v18  ;;  %3471 = vmatprep.subr.bf16.mxu1 (%p1419_p0), %v5656_v19  ;;  %v2506_v18 = vld [vmem:[%s8383_s4 + $0x160] sm:$0xff] (%p1419_p0)  ;;  %v2547_v8 = vld [vmem:[%s8383_s4 + $0x2a8] sm:$0xff] (%p1419_p0) }
 0x2d8   : > { %6210 = vtanh.f32 %v2387_v20  ;;  %v2503_v20 = vld [vmem:[%s8383_s4 + $0x148] sm:$0xff] (%p1419_p0)  ;;  %v2538_v60 = vld [vmem:[%s8383_s4 + $0x260] sm:$0xff] (%p1419_p0) }
 0x2d9   :  { %v5702_v6 = vcombine.high (%p1419_p0), %v2534_v59, %v2538_v60  ;;  %v2542_v9 = vld [vmem:[%s8383_s4 + $0x280] sm:$0xff] (%p1419_p0) }
 0x2da   :  { %3472 = vmatpush1.bf16.msra.mxu1 (%p1419_p0), %v5655_v28  ;;  %v2546_v10 = vld [vmem:[%s8383_s4 + $0x2a0] sm:$0xff] (%p1419_p0)  ;;  %v2555_v28 = vld [vmem:[%s8383_s4 + $0x2e8] sm:$0xff] (%p1419_p0) }
 0x2df   : > { %v6205_v33 = vpop.eup %6204 }
 0x2e0   : > { %v6207_v40 = vpop.eup %6206  ;;  %v2415_v14 = vadd.f32 1.0, %v6205_v33  ;;  %v2507_v33 = vld [vmem:[%s8383_s4 + $0x168] sm:$0xff] (%p1419_p0) }
 0x2e1   : > { %v2416_v34 = vadd.f32 1.0, %v6207_v40  ;;  %v6209_v35 = vpop.eup %6208  ;;  %v5661_v40 = vcombine.low (%p1419_p0), %v2494_v23, %v2498_v24  ;;  %v5710_v23 = vcombine.high (%p1419_p0), %v2542_v9, %v2546_v10 }
 0x2e2   : > { %6212 = vrcp.f32 %v2415_v14  ;;  %v6211_v36 = vpop.eup %6210  ;;  %v2417_v38 = vadd.f32 1.0, %v6209_v35  ;;  %v5663_v14 = vcombine.low (%p1419_p0), %v2495_v25, %v2499_v26  ;;  %v5672_v35 = vcombine.high (%p1419_p0), %v2503_v20, %v2507_v33 }
 0x2e3   : > { %6214 = vrcp.f32 %v2416_v34  ;;  %v5670_v34 = vcombine.high (%p1419_p0), %v2502_v22, %v2506_v18 }
 0x2e4   : > { %6216 = vrcp.f32 %v2417_v38  ;;  %v2511_v38 = vld [vmem:[%s8383_s4 + $0x188] sm:$0xff] (%p1419_p0) }
 0x2ec   : > { %v6213_v37 = vpop.eup %6212 }
 0x2ed   : > { %v6215_v39 = vpop.eup %6214  ;;  %v2430_v41 = vmul.f32 %v6213_v37, %v6211_v36  ;;  %v2510_v36 = vld [vmem:[%s8383_s4 + $0x180] sm:$0xff] (%p1419_p0) }
 0x2ee   : > { %v2428_v42 = vmul.f32 %v6318_v30, %v6215_v39  ;;  %v6217_v43 = vpop.eup %6216  ;;  %v2514_v37 = vld [vmem:[%s8383_s4 + $0x1a0] sm:$0xff] (%p1419_p0)  ;;  %v2515_v39 = vld [vmem:[%s8383_s4 + $0x1a8] sm:$0xff] (%p1419_p0) }
 0x2ef   :  { %v5677_v32 = vcombine.low (%p1419_p0), %v2510_v36, %v2514_v37  ;;  %v5679_v49 = vcombine.low (%p1419_p0), %v2511_v38, %v2515_v39 }
 0x2f0   : > { %v2431_v30 = vadd.f32 %v2430_v41, %v2428_v42   ;;  %v5669_v41 = vcombine.low (%p1419_p0), %v2502_v22, %v2506_v18  ;;  %v5671_v42 = vcombine.low (%p1419_p0), %v2503_v20, %v2507_v33  ;;  %v2558_v20 = vld [vmem:[%s8383_s4 + $0x300] sm:$0xff] (%p1419_p0) }
 0x2f1   :  { %v2562_v33 = vld [vmem:[%s8383_s4 + $0x320] sm:$0xff] (%p1419_p0) }
 0x2f2   : > { %6218 = vtanh.f32 %v2431_v30  ;;  %v2470_v30 = vld [vmem:[%s8383_s4 + $0x40] sm:$0xff] (%p1419_p0) }
 0x2f3   :  { %v5638_v52 = vcombine.high (%p1419_p0), %v2470_v30, %v2474_v21  ;;  %v5637_v61 = vcombine.low (%p1419_p0), %v2470_v30, %v2474_v21  ;;  %v5688_v21 = vcombine.high (%p1419_p0), %v2519_v47, %v2523_v48  ;;  %v2574_v47 = vld [vmem:[%s8383_s4 + $0x380] sm:$0xff] (%p1419_p0) }
 0x2f4   :  { %v2578_v48 = vld [vmem:[%s8383_s4 + $0x3a0] sm:$0xff] (%p1419_p0) }
 0x2f5   :  { %3354 = vmatprep.subr.bf16.mxu0 (%p1419_p0), %v5638_v52  ;;  %v2527_v52 = vld [vmem:[%s8383_s4 + $0x208] sm:$0xff] (%p1419_p0) }
 0x2f6   :  { %3355 = vmatpush1.bf16.msra.mxu0 (%p1419_p0), %v5637_v61  ;;  %v5696_v58 = vcombine.high (%p1419_p0), %v2527_v52, %v2531_v53  ;;  %v2535_v61 = vld [vmem:[%s8383_s4 + $0x248] sm:$0xff] (%p1419_p0)  ;;  %v5695_v4 = vcombine.low (%p1419_p0), %v2527_v52, %v2531_v53  ;;  %v2582_v52 = vld [vmem:[%s8383_s4 + $0x3c0] sm:$0xff] (%p1419_p0) }
 0x2f7   :  { %3356 = vmatprep.subr.bf16.mxu0 (%p1419_p0), %v5646_v2  ;;  %v5693_v2 = vcombine.low (%p1419_p0), %v2526_v50, %v2530_v51  ;;  %v5704_v7 = vcombine.high (%p1419_p0), %v2535_v61, %v2539_v0  ;;  %v5703_v19 = vcombine.low (%p1419_p0), %v2535_v61, %v2539_v0  ;;  %v5742_v50 = vcombine.high (%p1419_p0), %v2574_v47, %v2578_v48  ;;  %v2586_v53 = vld [vmem:[%s8383_s4 + $0x3e0] sm:$0xff] (%p1419_p0)  ;;  %v2464_v61 = vld [vmem:[%s8383_s4 + $0x10] sm:$0xff] (%p1419_p0) }
 0x2f8   :  { %v2468_v0 = vld [vmem:[%s8383_s4 + $0x30] sm:$0xff] (%p1419_p0) }
 0x2fa   :  { %3357 = vmatpush1.bf16.msra.mxu0 (%p1419_p0), %v5645_v11  ;;  %v2543_v11 = vld [vmem:[%s8383_s4 + $0x288] sm:$0xff] (%p1419_p0) }
 0x2fb   :  { %1421 = sbr.rel (!%p1419_p0) target bundleno = 377 (0x179), region = 70  ;;  %3358 = vmatprep.subr.bf16.mxu0 (%p1419_p0), %v5654_v3  ;;  %v5701_v3 = vcombine.low (%p1419_p0), %v2534_v59, %v2538_v60  ;;  %v5712_v24 = vcombine.high (%p1419_p0), %v2543_v11, %v2547_v8  ;;  %v5750_v59 = vcombine.high (%p1419_p0), %v2582_v52, %v2586_v53 }
 0x2fc   : > { %v6219_v1 = vpop.eup %6218 }
 0x2fd   : > { %v2435_v31 = vmul.f32 %v6219_v1, %v6217_v43   ;;  %v5678_v43 = vcombine.high (%p1419_p0), %v2510_v36, %v2514_v37  ;;  %v5680_v1 = vcombine.high (%p1419_p0), %v2511_v38, %v2515_v39  ;;  %v5726_v36 = vcombine.high (%p1419_p0), %v2558_v20, %v2562_v33  ;;  %v2566_v38 = vld [vmem:[%s8383_s4 + $0x340] sm:$0xff] (%p1419_p0) }
 0x2fe   :  { %3359 = vmatpush1.bf16.msra.mxu0 (%p1419_p0), %v5653_v27  ;;  %v2551_v27 = vld [vmem:[%s8383_s4 + $0x2c8] sm:$0xff] (%p1419_p0)  ;;  %v2570_v39 = vld [vmem:[%s8383_s4 + $0x360] sm:$0xff] (%p1419_p0) }
 0x2ff   : > { %v2441_v44 = vpack.c.bf16 %v2435_v31, %v2435_v31  ;;  %v5664_v31 = vcombine.high (%p1419_p0), %v2495_v25, %v2499_v26  ;;  %3360 = vmatprep.subr.bf16.mxu0 (%p1419_p0), %v5662_v29  ;;  %v2550_v25 = vld [vmem:[%s8383_s4 + $0x2c0] sm:$0xff] (%p1419_p0)  ;;  %v5709_v29 = vcombine.low (%p1419_p0), %v2542_v9, %v2546_v10  ;;  %v5720_v18 = vcombine.high (%p1419_p0), %v2551_v27, %v2555_v28 }
 0x300   :  { %v2554_v26 = vld [vmem:[%s8383_s4 + $0x2e0] sm:$0xff] (%p1419_p0)  ;;  %v5634_v9 = vcombine.high (%p1419_p0), %v2464_v61, %v2468_v0 }
 0x301   : > { %2445 = vst [vmem:[%s2444_s21 + $0x4] sm:$0xf] %v2441_v44  ;;  %3473 = vmatprep.subr.bf16.mxu1 (%p1419_p0), %v5664_v31  ;;  %v2518_v44 = vld [vmem:[%s8383_s4 + $0x1c0] sm:$0xff] (%p1419_p0)  ;;  %v5711_v31 = vcombine.low (%p1419_p0), %v2543_v11, %v2547_v8  ;;  %v5718_v22 = vcombine.high (%p1419_p0), %v2550_v25, %v2554_v26  ;;  %v2472_v11 = vld [vmem:[%s8383_s4 + $0x50] sm:$0xff] (%p1419_p0) }
 0x302   :  { %3361 = vmatpush1.bf16.msra.mxu0 %v5661_v40  ;;  %3474 = vmatpush1.bf16.msra.mxu1 %v5663_v14  ;;  %v5686_v30 = vcombine.high %v2518_v44, %v2522_v45  ;;  %v5685_v54 = vcombine.low %v2518_v44, %v2522_v45  ;;  %v2559_v40 = vld [vmem:[%s8383_s4 + $0x308] sm:$0xff]  ;;  %v5734_v44 = vcombine.high %v2566_v38, %v2570_v39  ;;  %v2476_v8 = vld [vmem:[%s8383_s4 + $0x70] sm:$0xff] }
 0x303   :  { %3362 = vmatprep.subr.bf16.mxu0 %v5670_v34  ;;  %3475 = vmatprep.subr.bf16.mxu1 %v5672_v35  ;;  %v2563_v14 = vld [vmem:[%s8383_s4 + $0x328] sm:$0xff]  ;;  %v5717_v34 = vcombine.low %v2550_v25, %v2554_v26  ;;  %v5719_v35 = vcombine.low %v2551_v27, %v2555_v28  ;;  %v5642_v26 = vcombine.high %v2472_v11, %v2476_v8 }
 0x304   :  { %v5728_v37 = vcombine.high %v2559_v40, %v2563_v14 }
 0x306   :  { %3363 = vmatpush1.bf16.msra.mxu0 %v5669_v41  ;;  %3476 = vmatpush1.bf16.msra.mxu1 %v5671_v42  ;;  %v2567_v41 = vld [vmem:[%s8383_s4 + $0x348] sm:$0xff] }
 0x307   :  { %3364 = vmatprep.subr.bf16.mxu0 %v5678_v43  ;;  %3477 = vmatprep.subr.bf16.mxu1 %v5680_v1  ;;  %v2571_v42 = vld [vmem:[%s8383_s4 + $0x368] sm:$0xff]  ;;  %v5725_v43 = vcombine.low %v2558_v20, %v2562_v33  ;;  %v5727_v1 = vcombine.low %v2559_v40, %v2563_v14  ;;  %v5641_v20 = vcombine.low %v2472_v11, %v2476_v8  ;;  %v2520_v11 = vld [vmem:[%s8383_s4 + $0x1d0] sm:$0xff] }
 0x308   :  { %v7377_v46 = vld [vmem:[#allocation3 + $0x4] ss:$8 sps:$4 sm:$0xff]   ;;  %v5736_v45 = vcombine.high %v2567_v41, %v2571_v42  ;;  %v7509_v28 = vld [vmem:[#allocation3 + $0x14] ss:$8 sps:$4 sm:$0xff]  }
 0x309   :  { %3384 = vmatprep.mubr.bf16.mxu0 %v7377_v46  ;;  %3497 = vmatprep.mubr.bf16.mxu1 %v7377_v46  ;;  %v2524_v8 = vld [vmem:[%s8383_s4 + $0x1f0] sm:$0xff] }
 0x30a   :  { %3365 = vmatpush1.bf16.msra.mxu0 %v5677_v32  ;;  %3478 = vmatpush1.bf16.msra.mxu1 %v5679_v49  ;;  %v2575_v32 = vld [vmem:[%s8383_s4 + $0x388] sm:$0xff] }
 0x30b   :  { %3366 = vmatprep.subr.bf16.mxu0 %v5686_v30  ;;  %3479 = vmatprep.subr.bf16.mxu1 %v5688_v21  ;;  %v2579_v49 = vld [vmem:[%s8383_s4 + $0x3a8] sm:$0xff]  ;;  %v5733_v30 = vcombine.low %v2566_v38, %v2570_v39  ;;  %v5735_v21 = vcombine.low %v2567_v41, %v2571_v42  ;;  %v2493_v38 = vld [vmem:[%s8383_s4 + $0xf8] sm:$0xff] }
 0x30c   :  { %v5744_v51 = vcombine.high %v2575_v32, %v2579_v49 }
 0x30e   :  { %3367 = vmatpush1.bf16.msra.mxu0 %v5685_v54  ;;  %3480 = vmatpush1.bf16.msra.mxu1 %v5687_v55  ;;  %v2583_v54 = vld [vmem:[%s8383_s4 + $0x3c8] sm:$0xff] }
 0x30f   :  { %3368 = vmatprep.subr.bf16.mxu0 %v5694_v56  ;;  %3481 = vmatprep.subr.bf16.mxu1 %v5696_v58  ;;  %v2587_v55 = vld [vmem:[%s8383_s4 + $0x3e8] sm:$0xff]  ;;  %v5741_v56 = vcombine.low %v2574_v47, %v2578_v48  ;;  %v5743_v58 = vcombine.low %v2575_v32, %v2579_v49  ;;  %v2497_v47 = vld [vmem:[%s8383_s4 + $0x118] sm:$0xff] }
 0x310   :  { %v5752_v60 = vcombine.high %v2583_v54, %v2587_v55  ;;  %v2501_v48 = vld [vmem:[%s8383_s4 + $0x138] sm:$0xff] }
 0x312   :  { %3369 = vmatpush1.bf16.msra.mxu0 %v5693_v2  ;;  %3482 = vmatpush1.bf16.msra.mxu1 %v5695_v4  ;;  %v2465_v2 = vld [vmem:[%s8383_s4 + $0x18] sm:$0xff] }
 0x313   :  { %3370 = vmatprep.subr.bf16.mxu0 %v5702_v6  ;;  %3483 = vmatprep.subr.bf16.mxu1 %v5704_v7  ;;  %v2469_v4 = vld [vmem:[%s8383_s4 + $0x38] sm:$0xff]  ;;  %v5749_v6 = vcombine.low %v2582_v52, %v2586_v53  ;;  %v5751_v7 = vcombine.low %v2583_v54, %v2587_v55  ;;  %v7565_v52 = vld [vmem:[#allocation3 + $0x20] ss:$8 sps:$4 sm:$0xff]  }
 0x314   :  { %v5636_v10 = vcombine.high %v2465_v2, %v2469_v4  ;;  %v5635_v25 = vcombine.low %v2465_v2, %v2469_v4  ;;  %v2505_v53 = vld [vmem:[%s8383_s4 + $0x158] sm:$0xff] }
 0x315   :  { %v2509_v54 = vld [vmem:[%s8383_s4 + $0x178] sm:$0xff] }
 0x316   :  { %3371 = vmatpush1.bf16.msra.mxu0 %v5701_v3  ;;  %3484 = vmatpush1.bf16.msra.mxu1 %v5703_v19  ;;  %v7501_v3 = vld [vmem:[#allocation3] ss:$8 sps:$4 sm:$0xff]   ;;  %v2473_v19 = vld [vmem:[%s8383_s4 + $0x58] sm:$0xff] }
 0x317   :  { %3372 = vmatprep.subr.bf16.mxu0 %v5710_v23  ;;  %3485 = vmatprep.subr.bf16.mxu1 %v5712_v24  ;;  %v2477_v23 = vld [vmem:[%s8383_s4 + $0x78] sm:$0xff]  ;;  %v5633_v24 = vcombine.low %v2464_v61, %v2468_v0  ;;  %v2512_v61 = vld [vmem:[%s8383_s4 + $0x190] sm:$0xff] }
 0x318   :  { %v5644_v27 = vcombine.high %v2473_v19, %v2477_v23  ;;  %v5643_v33 = vcombine.low %v2473_v19, %v2477_v23  ;;  %v2516_v0 = vld [vmem:[%s8383_s4 + $0x1b0] sm:$0xff]  ;;  %v2513_v2 = vld [vmem:[%s8383_s4 + $0x198] sm:$0xff] }
 0x319   :  { %v2517_v4 = vld [vmem:[%s8383_s4 + $0x1b8] sm:$0xff] }
 0x31a   :  { %3373 = vmatpush1.bf16.msra.mxu0 %v5709_v29  ;;  %3486 = vmatpush1.bf16.msra.mxu1 %v5711_v31  ;;  %v2480_v29 = vld [vmem:[%s8383_s4 + $0x90] sm:$0xff]  ;;  %v2521_v23 = vld [vmem:[%s8383_s4 + $0x1d8] sm:$0xff] }
 0x31b   :  { %3374 = vmatprep.subr.bf16.mxu0 %v5718_v22  ;;  %3487 = vmatprep.subr.bf16.mxu1 %v5720_v18  ;;  %v2484_v31 = vld [vmem:[%s8383_s4 + $0xb0] sm:$0xff]  ;;  %v2481_v22 = vld [vmem:[%s8383_s4 + $0x98] sm:$0xff] }
 0x31c   :  { %v2485_v18 = vld [vmem:[%s8383_s4 + $0xb8] sm:$0xff]  ;;  %v5650_v40 = vcombine.high %v2480_v29, %v2484_v31  ;;  %v5649_v39 = vcombine.low %v2480_v29, %v2484_v31  ;;  %v7605_v31 = vld [vmem:[#allocation3 + $0x44] ss:$8 sps:$4 sm:$0xff]  }
 0x31d   :  { %v5652_v14 = vcombine.high %v2481_v22, %v2485_v18  ;;  %v5651_v41 = vcombine.low %v2481_v22, %v2485_v18  ;;  %v7597_v19 = vld [vmem:[#allocation3 + $0x30] ss:$8 sps:$4 sm:$0xff]  }
 0x31e   :  { %3375 = vmatpush1.bf16.msra.mxu0 %v5717_v34  ;;  %3488 = vmatpush1.bf16.msra.mxu1 %v5719_v35  ;;  %v2488_v34 = vld [vmem:[%s8383_s4 + $0xd0] sm:$0xff] }
 0x31f   :  { %3376 = vmatprep.subr.bf16.mxu0 %v5726_v36  ;;  %3489 = vmatprep.subr.bf16.mxu1 %v5728_v37  ;;  %v2492_v35 = vld [vmem:[%s8383_s4 + $0xf0] sm:$0xff]  ;;  %v2489_v37 = vld [vmem:[%s8383_s4 + $0xd8] sm:$0xff] }
 0x320   :  { %v7533_v36 = vld [vmem:[#allocation3 + $0x10] ss:$8 sps:$4 sm:$0xff]   ;;  %v5658_v42 = vcombine.high %v2488_v34, %v2492_v35  ;;  %v5657_v32 = vcombine.low %v2488_v34, %v2492_v35  ;;  %v5659_v49 = vcombine.low %v2489_v37, %v2493_v38 }
 0x321   :  { %v2528_v22 = vld [vmem:[%s8383_s4 + $0x210] sm:$0xff] }
 0x322   :  { %3377 = vmatpush1.bf16.msra.mxu0 %v5725_v43  ;;  %3490 = vmatpush1.bf16.msra.mxu1 %v5727_v1  ;;  %v5660_v43 = vcombine.high %v2489_v37, %v2493_v38  ;;  %v7541_v1 = vld [vmem:[#allocation3 + $0x24] ss:$8 sps:$4 sm:$0xff]   ;;  %v2532_v18 = vld [vmem:[%s8383_s4 + $0x230] sm:$0xff] }
 0x323   :  { %3378 = vmatprep.subr.bf16.mxu0 %v5734_v44  ;;  %3491 = vmatprep.subr.bf16.mxu1 %v5736_v45  ;;  %v2496_v44 = vld [vmem:[%s8383_s4 + $0x110] sm:$0xff]  ;;  %v5698_v34 = vcombine.high %v2528_v22, %v2532_v18 }
 0x324   :  { %v2500_v45 = vld [vmem:[%s8383_s4 + $0x130] sm:$0xff] }
 0x325   :  { %v5665_v55 = vcombine.low %v2496_v44, %v2500_v45  ;;  %v2536_v37 = vld [vmem:[%s8383_s4 + $0x250] sm:$0xff] }
 0x326   :  { %3379 = vmatpush1.bf16.msra.mxu0 %v5733_v30  ;;  %3492 = vmatpush1.bf16.msra.mxu1 %v5735_v21  ;;  %v5666_v30 = vcombine.high %v2496_v44, %v2500_v45  ;;  %v5668_v21 = vcombine.high %v2497_v47, %v2501_v48  ;;  %v2540_v38 = vld [vmem:[%s8383_s4 + $0x270] sm:$0xff] }
 0x327   :  { %3380 = vmatprep.subr.bf16.mxu0 %v5742_v50  ;;  %3493 = vmatprep.subr.bf16.mxu1 %v5744_v51  ;;  %v2504_v50 = vld [vmem:[%s8383_s4 + $0x150] sm:$0xff]  ;;  %v5706_v45 = vcombine.high %v2536_v37, %v2540_v38 }
 0x328   :  { %v2508_v51 = vld [vmem:[%s8383_s4 + $0x170] sm:$0xff] }
 0x32a   :  { %3381 = vmatpush1.bf16.msra.mxu0 %v5741_v56  ;;  %3494 = vmatpush1.bf16.msra.mxu1 %v5743_v58  ;;  %v5667_v56 = vcombine.low %v2497_v47, %v2501_v48  ;;  %v5674_v58 = vcombine.high %v2504_v50, %v2508_v51  ;;  %v7637_v48 = vld [vmem:[#allocation3 + $0x54] ss:$8 sps:$4 sm:$0xff]  }
 0x32b   :  { %3382 = vmatprep.subr.bf16.mxu0 %v5750_v59  ;;  %3495 = vmatprep.subr.bf16.mxu1 %v5752_v60  ;;  %v5676_v59 = vcombine.high %v2505_v53, %v2509_v54  ;;  %v7573_v60 = vld [vmem:[#allocation3 + $0x34] ss:$8 sps:$4 sm:$0xff]  }
 0x32e   :  { %3383 = vmatpush1.bf16.msra.mxu0 %v5749_v6  ;;  %3496 = vmatpush1.bf16.msra.mxu1 %v5751_v7  ;;  %v5673_v6 = vcombine.low %v2504_v50, %v2508_v51  ;;  %v5675_v7 = vcombine.low %v2505_v53, %v2509_v54  ;;  %v5705_v50 = vcombine.low %v2536_v37, %v2540_v38  ;;  %v2576_v37 = vld [vmem:[%s8383_s4 + $0x390] sm:$0xff] }
 0x32f   :  { %3578 = vmatprep.subr.bf16.mxu0 %v5634_v9  ;;  %3691 = vmatprep.subr.bf16.mxu1 %v5636_v10  ;;  %v5682_v9 = vcombine.high %v2512_v61, %v2516_v0  ;;  %v5684_v10 = vcombine.high %v2513_v2, %v2517_v4  ;;  %v2580_v38 = vld [vmem:[%s8383_s4 + $0x3b0] sm:$0xff] }
 0x331   :  { %3385 = vmatmul.mubr.bf16.vlgmr.msra.gmra.mrb[0].mxu0 %v7501_v3  ;;  %3498 = vmatmul.mubr.bf16.vlgmr.msra.gmra.mrb[0].mxu1 %v7501_v3 }
 0x332   :  { %3579 = vmatpush1.bf16.msra.mxu0 %v5633_v24  ;;  %3692 = vmatpush1.bf16.msra.mxu1 %v5635_v25  ;;  %v2525_v24 = vld [vmem:[%s8383_s4 + $0x1f8] sm:$0xff]  ;;  %v5681_v25 = vcombine.low %v2512_v61, %v2516_v0 }
 0x333   :  { %3580 = vmatprep.subr.bf16.mxu0 %v5642_v26  ;;  %3693 = vmatprep.subr.bf16.mxu1 %v5644_v27  ;;  %v5683_v26 = vcombine.low %v2513_v2, %v2517_v4  ;;  %v5690_v27 = vcombine.high %v2520_v11, %v2524_v8  ;;  %v5692_v29 = vcombine.high %v2521_v23, %v2525_v24  ;;  %v2557_v61 = vld [vmem:[%s8383_s4 + $0x2f8] sm:$0xff] }
 0x334   :  { %3394 = vmatprep.mubr.bf16.mxu0 %v7509_v28  ;;  %3507 = vmatprep.mubr.bf16.mxu1 %v7509_v28 }
 0x336   :  { %3581 = vmatpush1.bf16.msra.mxu0 %v5641_v20  ;;  %3694 = vmatpush1.bf16.msra.mxu1 %v5643_v33  ;;  %v2529_v20 = vld [vmem:[%s8383_s4 + $0x218] sm:$0xff] }
 0x337   :  { %3582 = vmatprep.subr.bf16.mxu0 %v5650_v40  ;;  %3695 = vmatprep.subr.bf16.mxu1 %v5652_v14  ;;  %v2533_v33 = vld [vmem:[%s8383_s4 + $0x238] sm:$0xff]  ;;  %v5689_v40 = vcombine.low %v2520_v11, %v2524_v8  ;;  %v5691_v14 = vcombine.low %v2521_v23, %v2525_v24 }
 0x338   :  { %v5700_v35 = vcombine.high %v2529_v20, %v2533_v33  ;;  %v5699_v44 = vcombine.low %v2529_v20, %v2533_v33  ;;  %v2561_v11 = vld [vmem:[%s8383_s4 + $0x318] sm:$0xff] }
 0x339   :  { %3395 = vmatmul.mubr.bf16.gmra.mrb[4].mxu0 %v7533_v36  ;;  %3508 = vmatmul.mubr.bf16.gmra.mrb[4].mxu1 %v7533_v36  ;;  %v2565_v8 = vld [vmem:[%s8383_s4 + $0x338] sm:$0xff] }
 0x33a   :  { %3583 = vmatpush1.bf16.msra.mxu0 %v5649_v39  ;;  %3696 = vmatpush1.bf16.msra.mxu1 %v5651_v41  ;;  %v7629_v39 = vld [vmem:[#allocation3 + $0x40] ss:$8 sps:$4 sm:$0xff]   ;;  %v2537_v41 = vld [vmem:[%s8383_s4 + $0x258] sm:$0xff] }
 0x33b   :  { %3584 = vmatprep.subr.bf16.mxu0 %v5658_v42  ;;  %3697 = vmatprep.subr.bf16.mxu1 %v5660_v43  ;;  %v2541_v42 = vld [vmem:[%s8383_s4 + $0x278] sm:$0xff]  ;;  %v5697_v43 = vcombine.low %v2528_v22, %v2532_v18  ;;  %v7693_v22 = vld [vmem:[#allocation3 + $0x60] ss:$8 sps:$4 sm:$0xff]  }
 0x33c   :  { %3404 = vmatprep.mubr.bf16.mxu0 %v7541_v1  ;;  %3517 = vmatprep.mubr.bf16.mxu1 %v7541_v1  ;;  %v5708_v47 = vcombine.high %v2537_v41, %v2541_v42  ;;  %v5707_v51 = vcombine.low %v2537_v41, %v2541_v42  ;;  %v2569_v18 = vld [vmem:[%s8383_s4 + $0x358] sm:$0xff] }
 0x33d   :  { %v2573_v20 = vld [vmem:[%s8383_s4 + $0x378] sm:$0xff] }
 0x33e   :  { %3585 = vmatpush1.bf16.msra.mxu0 %v5657_v32  ;;  %3698 = vmatpush1.bf16.msra.mxu1 %v5659_v49  ;;  %v2544_v32 = vld [vmem:[%s8383_s4 + $0x290] sm:$0xff]  ;;  %v2577_v41 = vld [vmem:[%s8383_s4 + $0x398] sm:$0xff] }
 0x33f   :  { %3586 = vmatprep.subr.bf16.mxu0 %v5666_v30  ;;  %3699 = vmatprep.subr.bf16.mxu1 %v5668_v21  ;;  %v2548_v49 = vld [vmem:[%s8383_s4 + $0x2b0] sm:$0xff]  ;;  %v2545_v30 = vld [vmem:[%s8383_s4 + $0x298] sm:$0xff] }
 0x340   :  { %v2549_v21 = vld [vmem:[%s8383_s4 + $0x2b8] sm:$0xff]  ;;  %v5714_v53 = vcombine.high %v2544_v32, %v2548_v49  ;;  %v5713_v0 = vcombine.low %v2544_v32, %v2548_v49  ;;  %v2584_v32 = vld [vmem:[%s8383_s4 + $0x3d0] sm:$0xff] }
 0x341   :  { %3405 = vmatmul.mubr.bf16.gmra.mrb[8].mxu0 %v7565_v52  ;;  %3518 = vmatmul.mubr.bf16.gmra.mrb[8].mxu1 %v7565_v52  ;;  %v5716_v54 = vcombine.high %v2545_v30, %v2549_v21  ;;  %v5715_v2 = vcombine.low %v2545_v30, %v2549_v21  ;;  %v2581_v42 = vld [vmem:[%s8383_s4 + $0x3b8] sm:$0xff]  ;;  %v2588_v49 = vld [vmem:[%s8383_s4 + $0x3f0] sm:$0xff] }
 0x342   :  { %3587 = vmatpush1.bf16.msra.mxu0 %v5665_v55  ;;  %3700 = vmatpush1.bf16.msra.mxu1 %v5667_v56  ;;  %v2552_v55 = vld [vmem:[%s8383_s4 + $0x2d0] sm:$0xff]  ;;  %v2585_v21 = vld [vmem:[%s8383_s4 + $0x3d8] sm:$0xff] }
 0x343   :  { %3588 = vmatprep.subr.bf16.mxu0 %v5674_v58  ;;  %3701 = vmatprep.subr.bf16.mxu1 %v5676_v59  ;;  %v2556_v56 = vld [vmem:[%s8383_s4 + $0x2f0] sm:$0xff]  ;;  %v2553_v59 = vld [vmem:[%s8383_s4 + $0x2d8] sm:$0xff] }
 0x344   :  { %3414 = vmatprep.mubr.bf16.mxu0 %v7573_v60  ;;  %3527 = vmatprep.mubr.bf16.mxu1 %v7573_v60  ;;  %v7661_v58 = vld [vmem:[#allocation3 + $0x50] ss:$8 sps:$4 sm:$0xff]   ;;  %v5722_v4 = vcombine.high %v2552_v55, %v2556_v56  ;;  %v5721_v23 = vcombine.low %v2552_v55, %v2556_v56  ;;  %v5723_v24 = vcombine.low %v2553_v59, %v2557_v61 }
 0x345   :  { %v6243_v30 = vld [vmem:[#allocation3 + $0x70] ss:$8 sps:$4 sm:$0xff]   ;;  %v5753_v56 = vcombine.low %v2584_v32, %v2588_v49 }
 0x346   :  { %3589 = vmatpush1.bf16.msra.mxu0 %v5673_v6  ;;  %3702 = vmatpush1.bf16.msra.mxu1 %v5675_v7  ;;  %v5724_v6 = vcombine.high %v2553_v59, %v2557_v61  ;;  %v7669_v7 = vld [vmem:[#allocation3 + $0x64] ss:$8 sps:$4 sm:$0xff]  }
 0x347   :  { %3590 = vmatprep.subr.bf16.mxu0 %v5682_v9  ;;  %3703 = vmatprep.subr.bf16.mxu1 %v5684_v10  ;;  %v2560_v9 = vld [vmem:[%s8383_s4 + $0x310] sm:$0xff] }
 0x348   :  { %v2564_v10 = vld [vmem:[%s8383_s4 + $0x330] sm:$0xff] }
 0x349   :  { %3415 = vmatmul.mubr.bf16.gmra.mrb[12].mxu0 %v7597_v19  ;;  %3528 = vmatmul.mubr.bf16.gmra.mrb[12].mxu1 %v7597_v19  ;;  %v5729_v33 = vcombine.low %v2560_v9, %v2564_v10 }
 0x34a   :  { %3591 = vmatpush1.bf16.msra.mxu0 %v5681_v25  ;;  %3704 = vmatpush1.bf16.msra.mxu1 %v5683_v26  ;;  %v5730_v25 = vcombine.high %v2560_v9, %v2564_v10  ;;  %v5732_v26 = vcombine.high %v2561_v11, %v2565_v8 }
 0x34b   :  { %3592 = vmatprep.subr.bf16.mxu0 %v5690_v27  ;;  %3705 = vmatprep.subr.bf16.mxu1 %v5692_v29  ;;  %v2568_v27 = vld [vmem:[%s8383_s4 + $0x350] sm:$0xff] }
 0x34c   :  { %3424 = vmatprep.mubr.bf16.mxu0 %v7605_v31  ;;  %3537 = vmatprep.mubr.bf16.mxu1 %v7605_v31  ;;  %v2572_v29 = vld [vmem:[%s8383_s4 + $0x370] sm:$0xff] }
 0x34e   :  { %3593 = vmatpush1.bf16.msra.mxu0 %v5689_v40  ;;  %3706 = vmatpush1.bf16.msra.mxu1 %v5691_v14  ;;  %v5731_v40 = vcombine.low %v2561_v11, %v2565_v8  ;;  %v5738_v14 = vcombine.high %v2568_v27, %v2572_v29 }
 0x34f   :  { %3594 = vmatprep.subr.bf16.mxu0 %v5698_v34  ;;  %3707 = vmatprep.subr.bf16.mxu1 %v5700_v35  ;;  %v5740_v34 = vcombine.high %v2569_v18, %v2573_v20  ;;  %v7701_v35 = vld [vmem:[#allocation3 + $0x74] ss:$8 sps:$4 sm:$0xff]  }
 0x351   :  { %3425 = vmatmul.mubr.bf16.gmra.mrb[16].mxu0 %v7629_v39  ;;  %3538 = vmatmul.mubr.bf16.gmra.mrb[16].mxu1 %v7629_v39 }
 0x352   :  { %3595 = vmatpush1.bf16.msra.mxu0 %v5697_v43  ;;  %3708 = vmatpush1.bf16.msra.mxu1 %v5699_v44  ;;  %v5737_v43 = vcombine.low %v2568_v27, %v2572_v29  ;;  %v5739_v44 = vcombine.low %v2569_v18, %v2573_v20 }
 0x353   :  { %3596 = vmatprep.subr.bf16.mxu0 %v5706_v45  ;;  %3709 = vmatprep.subr.bf16.mxu1 %v5708_v47  ;;  %v5746_v45 = vcombine.high %v2576_v37, %v2580_v38  ;;  %v5748_v47 = vcombine.high %v2577_v41, %v2581_v42 }
 0x354   :  { %3434 = vmatprep.mubr.bf16.mxu0 %v7637_v48  ;;  %3547 = vmatprep.mubr.bf16.mxu1 %v7637_v48 }
 0x356   :  { %3597 = vmatpush1.bf16.msra.mxu0 %v5705_v50  ;;  %3710 = vmatpush1.bf16.msra.mxu1 %v5707_v51  ;;  %v2589_v50 = vld [vmem:[%s8383_s4 + $0x3f8] sm:$0xff]  ;;  %v5745_v51 = vcombine.low %v2576_v37, %v2580_v38 }
 0x357   :  { %3598 = vmatprep.subr.bf16.mxu0 %v5714_v53  ;;  %3711 = vmatprep.subr.bf16.mxu1 %v5716_v54  ;;  %v5747_v53 = vcombine.low %v2577_v41, %v2581_v42  ;;  %v5754_v54 = vcombine.high %v2584_v32, %v2588_v49  ;;  %v5756_v55 = vcombine.high %v2585_v21, %v2589_v50 }
 0x358   :  { %v5755_v59 = vcombine.low %v2585_v21, %v2589_v50 }
 0x359   :  { %3435 = vmatmul.mubr.bf16.gmra.mrb[20].mxu0 %v7661_v58  ;;  %3548 = vmatmul.mubr.bf16.gmra.mrb[20].mxu1 %v7661_v58 }
 0x35a   :  { %3599 = vmatpush1.bf16.msra.mxu0 %v5713_v0  ;;  %3712 = vmatpush1.bf16.msra.mxu1 %v5715_v2 }
 0x35b   :  { %3600 = vmatprep.subr.bf16.mxu0 %v5722_v4  ;;  %3713 = vmatprep.subr.bf16.mxu1 %v5724_v6 }
 0x35c   :  { %3444 = vmatprep.mubr.bf16.mxu0 %v7669_v7  ;;  %3557 = vmatprep.mubr.bf16.mxu1 %v7669_v7 }
 0x35e   :  { %3601 = vmatpush1.bf16.msra.mxu0 %v5721_v23  ;;  %3714 = vmatpush1.bf16.msra.mxu1 %v5723_v24 }
 0x35f   :  { %3602 = vmatprep.subr.bf16.mxu0 %v5730_v25  ;;  %3715 = vmatprep.subr.bf16.mxu1 %v5732_v26 }
 0x361   :  { %3445 = vmatmul.mubr.bf16.gmra.mrb[24].mxu0 %v7693_v22  ;;  %3558 = vmatmul.mubr.bf16.gmra.mrb[24].mxu1 %v7693_v22 }
 0x362   :  { %3603 = vmatpush1.bf16.msra.mxu0 %v5729_v33  ;;  %3716 = vmatpush1.bf16.msra.mxu1 %v5731_v40 }
 0x363   :  { %3604 = vmatprep.subr.bf16.mxu0 %v5738_v14  ;;  %3717 = vmatprep.subr.bf16.mxu1 %v5740_v34 }
 0x364   :  { %3454 = vmatprep.mubr.bf16.mxu0 %v7701_v35  ;;  %3567 = vmatprep.mubr.bf16.mxu1 %v7701_v35 }
 0x366   :  { %3605 = vmatpush1.bf16.msra.mxu0 %v5737_v43  ;;  %3718 = vmatpush1.bf16.msra.mxu1 %v5739_v44 }
 0x367   :  { %3606 = vmatprep.subr.bf16.mxu0 %v5746_v45  ;;  %3719 = vmatprep.subr.bf16.mxu1 %v5748_v47 }
 0x369   :  { %3455 = vmatmul.mubr.bf16.gmra.mrb[28].mxu0 %v6243_v30  ;;  %3568 = vmatmul.mubr.bf16.gmra.mrb[28].mxu1 %v6243_v30 }
 0x36a   :  { %3607 = vmatpush1.bf16.msra.mxu0 %v5745_v51  ;;  %3720 = vmatpush1.bf16.msra.mxu1 %v5747_v53 }
 0x36b   :  { %3608 = vmatprep.subr.bf16.mxu0 %v5754_v54  ;;  %3721 = vmatprep.subr.bf16.mxu1 %v5756_v55 }
 0x36c   :  { %3610 = vmatprep.mubr.bf16.mxu0 %v7377_v46  ;;  %3723 = vmatprep.mubr.bf16.mxu1 %v7377_v46  ;;  %v7764_v46 = vld [vmem:[%s8385_s6] sm:$0xff]  ;;  %s7942_s6 = smov 0  }
 0x36e   :  { %3609 = vmatpush1.bf16.msra.mxu0 %v5753_v56  ;;  %3722 = vmatpush1.bf16.msra.mxu1 %v5755_v59 }
 0x371   :  { %3611 = vmatmul.mubr.bf16.vlgmr.msra.gmra.mrb[32].mxu0 %v7501_v3  ;;  %3724 = vmatmul.mubr.bf16.vlgmr.msra.gmra.mrb[32].mxu1 %v7501_v3  ;;  %v7769_v3 = vrot.slane %v7764_v46, %v111_v13 }
 0x372   :  { %3620 = vmatprep.mubr.bf16.mxu0 %v7509_v28  ;;  %3733 = vmatprep.mubr.bf16.mxu1 %v7509_v28  ;;  %v7774_v28 = vrot.slane %v7764_v46, %v119_v15 }
 0x379   :  { %3621 = vmatmul.mubr.bf16.gmra.mrb[36].mxu0 %v7533_v36  ;;  %3734 = vmatmul.mubr.bf16.gmra.mrb[36].mxu1 %v7533_v36  ;;  %v7779_v36 = vrot.slane %v7764_v46, %v115_v16 }
 0x37a   :  { %3630 = vmatprep.mubr.bf16.mxu0 %v7541_v1  ;;  %3743 = vmatprep.mubr.bf16.mxu1 %v7541_v1  ;;  %v7784_v1 = vrot.slane %v7764_v46, %v123_v17 }
 0x381   :  { %3631 = vmatmul.mubr.bf16.gmra.mrb[40].mxu0 %v7565_v52  ;;  %3744 = vmatmul.mubr.bf16.gmra.mrb[40].mxu1 %v7565_v52 }
 0x382   :  { %3640 = vmatprep.mubr.bf16.mxu0 %v7573_v60  ;;  %3753 = vmatprep.mubr.bf16.mxu1 %v7573_v60 }
 0x389   :  { %3641 = vmatmul.mubr.bf16.gmra.mrb[44].mxu0 %v7597_v19  ;;  %3754 = vmatmul.mubr.bf16.gmra.mrb[44].mxu1 %v7597_v19 }
 0x38a   :  { %3650 = vmatprep.mubr.bf16.mxu0 %v7605_v31  ;;  %3763 = vmatprep.mubr.bf16.mxu1 %v7605_v31 }
 0x391   :  { %3651 = vmatmul.mubr.bf16.gmra.mrb[48].mxu0 %v7629_v39  ;;  %3764 = vmatmul.mubr.bf16.gmra.mrb[48].mxu1 %v7629_v39 }
 0x392   :  { %3660 = vmatprep.mubr.bf16.mxu0 %v7637_v48  ;;  %3773 = vmatprep.mubr.bf16.mxu1 %v7637_v48 }
 0x399   :  { %3661 = vmatmul.mubr.bf16.gmra.mrb[52].mxu0 %v7661_v58  ;;  %3774 = vmatmul.mubr.bf16.gmra.mrb[52].mxu1 %v7661_v58 }
 0x39a   :  { %3670 = vmatprep.mubr.bf16.mxu0 %v7669_v7  ;;  %3783 = vmatprep.mubr.bf16.mxu1 %v7669_v7 }
 0x3a1   :  { %3671 = vmatmul.mubr.bf16.gmra.mrb[56].mxu0 %v7693_v22  ;;  %3784 = vmatmul.mubr.bf16.gmra.mrb[56].mxu1 %v7693_v22 }
 0x3a2   :  { %3680 = vmatprep.mubr.bf16.mxu0 %v7701_v35  ;;  %3793 = vmatprep.mubr.bf16.mxu1 %v7701_v35 }
 0x3a9   :  { %3681 = vmatmul.mubr.bf16.gmra.mrb[60].mxu0 %v6243_v30  ;;  %3794 = vmatmul.mubr.bf16.gmra.mrb[60].mxu1 %v6243_v30 }
 0x404   :  { %v3386_v52 = vpop.f32.mrb[0].mxu0  ;;  %v3499_v13 = vpop.f32.mrb[0].mxu1 }
 0x405   :  { %v3387_v60 = vadd.f32 %v3386_v52, %v7769_v3  ;;  %v3388_v19 = vpop.f32.mrb[1].mxu0  ;;  %v3500_v31 = vadd.f32 %v3499_v13, %v7774_v28  ;;  %v3501_v39 = vpop.f32.mrb[1].mxu1 }
 0x406   :  { %v3389_v15 = vadd.f32 %v3388_v19, %v7779_v36  ;;  %v3390_v48 = vpop.f32.mrb[2].mxu0  ;;  %v3502_v58 = vadd.f32 %v3501_v39, %v7784_v1  ;;  %v3503_v61 = vpop.f32.mrb[2].mxu1 }
 0x407   :  { %v3391_v16 = vadd.f32 %v3390_v48, %v7769_v3  ;;  %v3392_v0 = vpop.f32.mrb[3].mxu0  ;;  %v3504_v17 = vadd.f32 %v3503_v61, %v7774_v28  ;;  %v3505_v6 = vpop.f32.mrb[3].mxu1 }
 0x408   :  { %v6031_v2 = vpack.c.bf16 %v3389_v15, %v3387_v60  ;;  %v3393_v4 = vadd.f32 %v3392_v0, %v7779_v36  ;;  %v6032_v7 = vpack.c.bf16 %v3502_v58, %v3500_v31  ;;  %v3506_v9 = vadd.f32 %v3505_v6, %v7784_v1 }
 0x40a   :  { %4188 = vst [vmem:[#allocation2] sm:$0xff] %v6031_v2  ;;  %v6035_v10 = vpack.c.bf16 %v3393_v4, %v3391_v16  ;;  %4189 = vst [vmem:[#allocation2 + $0x8] sm:$0xff] %v6032_v7  ;;  %v6036_v11 = vpack.c.bf16 %v3506_v9, %v3504_v17 }
 0x40c   :  { %4192 = vst [vmem:[#allocation2 + $0x20] sm:$0xff] %v6035_v10  ;;  %v3396_v8 = vpop.f32.mrb[4].mxu0  ;;  %4193 = vst [vmem:[#allocation2 + $0x28] sm:$0xff] %v6036_v11  ;;  %v3509_v24 = vpop.f32.mrb[4].mxu1 }
 0x40d   :  { %v3397_v23 = vadd.f32 %v3396_v8, %v7769_v3  ;;  %v3398_v25 = vpop.f32.mrb[5].mxu0  ;;  %v3510_v26 = vadd.f32 %v3509_v24, %v7774_v28  ;;  %v3511_v29 = vpop.f32.mrb[5].mxu1 }
 0x40e   :  { %v3399_v27 = vadd.f32 %v3398_v25, %v7779_v36  ;;  %v3400_v22 = vpop.f32.mrb[6].mxu0  ;;  %v3512_v18 = vadd.f32 %v3511_v29, %v7784_v1  ;;  %v3513_v33 = vpop.f32.mrb[6].mxu1 }
 0x40f   :  { %v3401_v20 = vadd.f32 %v3400_v22, %v7769_v3  ;;  %v3402_v40 = vpop.f32.mrb[7].mxu0  ;;  %v3514_v34 = vadd.f32 %v3513_v33, %v7774_v28  ;;  %v3515_v37 = vpop.f32.mrb[7].mxu1 }
 0x410   :  { %v6039_v14 = vpack.c.bf16 %v3399_v27, %v3397_v23  ;;  %v3403_v35 = vadd.f32 %v3402_v40, %v7779_v36  ;;  %v6040_v38 = vpack.c.bf16 %v3512_v18, %v3510_v26  ;;  %v3516_v41 = vadd.f32 %v3515_v37, %v7784_v1 }
 0x412   :  { %4196 = vst [vmem:[#allocation2 + $0x40] sm:$0xff] %v6039_v14  ;;  %v6043_v42 = vpack.c.bf16 %v3403_v35, %v3401_v20  ;;  %4197 = vst [vmem:[#allocation2 + $0x48] sm:$0xff] %v6040_v38  ;;  %v6044_v43 = vpack.c.bf16 %v3516_v41, %v3514_v34 }
 0x414   :  { %4200 = vst [vmem:[#allocation2 + $0x60] sm:$0xff] %v6043_v42  ;;  %v3406_v44 = vpop.f32.mrb[8].mxu0  ;;  %4201 = vst [vmem:[#allocation2 + $0x68] sm:$0xff] %v6044_v43  ;;  %v3519_v47 = vpop.f32.mrb[8].mxu1 }
 0x415   :  { %v3407_v45 = vadd.f32 %v3406_v44, %v7769_v3  ;;  %v3408_v32 = vpop.f32.mrb[9].mxu0  ;;  %v3520_v49 = vadd.f32 %v3519_v47, %v7774_v28  ;;  %v3521_v21 = vpop.f32.mrb[9].mxu1 }
 0x416   :  { %v3409_v30 = vadd.f32 %v3408_v32, %v7779_v36  ;;  %v3410_v50 = vpop.f32.mrb[10].mxu0  ;;  %v3522_v51 = vadd.f32 %v3521_v21, %v7784_v1  ;;  %v3523_v54 = vpop.f32.mrb[10].mxu1 }
 0x417   :  { %v3411_v53 = vadd.f32 %v3410_v50, %v7769_v3  ;;  %v3412_v55 = vpop.f32.mrb[11].mxu0  ;;  %v3524_v59 = vadd.f32 %v3523_v54, %v7774_v28  ;;  %v3525_v60 = vpop.f32.mrb[11].mxu1 }
 0x418   :  { %v6047_v56 = vpack.c.bf16 %v3409_v30, %v3407_v45  ;;  %v3413_v52 = vadd.f32 %v3412_v55, %v7779_v36  ;;  %v6048_v13 = vpack.c.bf16 %v3522_v51, %v3520_v49  ;;  %v3526_v19 = vadd.f32 %v3525_v60, %v7784_v1 }
 0x41a   :  { %4204 = vst [vmem:[#allocation2 + $0x80] sm:$0xff] %v6047_v56  ;;  %v6051_v31 = vpack.c.bf16 %v3413_v52, %v3411_v53  ;;  %4205 = vst [vmem:[#allocation2 + $0x88] sm:$0xff] %v6048_v13  ;;  %v6052_v15 = vpack.c.bf16 %v3526_v19, %v3524_v59 }
 0x41c   :  { %4208 = vst [vmem:[#allocation2 + $0xa0] sm:$0xff] %v6051_v31  ;;  %v3416_v39 = vpop.f32.mrb[12].mxu0  ;;  %4209 = vst [vmem:[#allocation2 + $0xa8] sm:$0xff] %v6052_v15  ;;  %v3529_v58 = vpop.f32.mrb[12].mxu1 }
 0x41d   :  { %v3417_v48 = vadd.f32 %v3416_v39, %v7769_v3  ;;  %v3418_v16 = vpop.f32.mrb[13].mxu0  ;;  %v3530_v61 = vadd.f32 %v3529_v58, %v7774_v28  ;;  %v3531_v2 = vpop.f32.mrb[13].mxu1 }
 0x41e   :  { %v3419_v0 = vadd.f32 %v3418_v16, %v7779_v36  ;;  %v3420_v17 = vpop.f32.mrb[14].mxu0  ;;  %v3532_v4 = vadd.f32 %v3531_v2, %v7784_v1  ;;  %v3533_v7 = vpop.f32.mrb[14].mxu1 }
 0x41f   :  { %v3421_v6 = vadd.f32 %v3420_v17, %v7769_v3  ;;  %v3422_v9 = vpop.f32.mrb[15].mxu0  ;;  %v3534_v11 = vadd.f32 %v3533_v7, %v7774_v28  ;;  %v3535_v23 = vpop.f32.mrb[15].mxu1 }
 0x420   :  { %v6055_v10 = vpack.c.bf16 %v3419_v0, %v3417_v48  ;;  %v3423_v8 = vadd.f32 %v3422_v9, %v7779_v36  ;;  %v6056_v24 = vpack.c.bf16 %v3532_v4, %v3530_v61  ;;  %v3536_v25 = vadd.f32 %v3535_v23, %v7784_v1 }
 0x422   :  { %4212 = vst [vmem:[#allocation2 + $0xc0] sm:$0xff] %v6055_v10  ;;  %v6059_v26 = vpack.c.bf16 %v3423_v8, %v3421_v6  ;;  %4213 = vst [vmem:[#allocation2 + $0xc8] sm:$0xff] %v6056_v24  ;;  %v6060_v27 = vpack.c.bf16 %v3536_v25, %v3534_v11 }
 0x424   :  { %4216 = vst [vmem:[#allocation2 + $0xe0] sm:$0xff] %v6059_v26  ;;  %v3426_v29 = vpop.f32.mrb[16].mxu0  ;;  %4217 = vst [vmem:[#allocation2 + $0xe8] sm:$0xff] %v6060_v27  ;;  %v3539_v18 = vpop.f32.mrb[16].mxu1 }
 0x425   :  { %v3427_v22 = vadd.f32 %v3426_v29, %v7769_v3  ;;  %v3428_v20 = vpop.f32.mrb[17].mxu0  ;;  %v3540_v33 = vadd.f32 %v3539_v18, %v7774_v28  ;;  %v3541_v14 = vpop.f32.mrb[17].mxu1 }
 0x426   :  { %v3429_v40 = vadd.f32 %v3428_v20, %v7779_v36  ;;  %v3430_v34 = vpop.f32.mrb[18].mxu0  ;;  %v3542_v35 = vadd.f32 %v3541_v14, %v7784_v1  ;;  %v3543_v38 = vpop.f32.mrb[18].mxu1 }
 0x427   :  { %v3431_v37 = vadd.f32 %v3430_v34, %v7769_v3  ;;  %v3432_v41 = vpop.f32.mrb[19].mxu0  ;;  %v3544_v43 = vadd.f32 %v3543_v38, %v7774_v28  ;;  %v3545_v45 = vpop.f32.mrb[19].mxu1 }
 0x428   :  { %v6063_v42 = vpack.c.bf16 %v3429_v40, %v3427_v22  ;;  %v3433_v44 = vadd.f32 %v3432_v41, %v7779_v36  ;;  %v6064_v47 = vpack.c.bf16 %v3542_v35, %v3540_v33  ;;  %v3546_v32 = vadd.f32 %v3545_v45, %v7784_v1 }
 0x42a   :  { %4220 = vst [vmem:[#allocation2 + $0x100] sm:$0xff] %v6063_v42  ;;  %v6067_v49 = vpack.c.bf16 %v3433_v44, %v3431_v37  ;;  %4221 = vst [vmem:[#allocation2 + $0x108] sm:$0xff] %v6064_v47  ;;  %v6068_v30 = vpack.c.bf16 %v3546_v32, %v3544_v43 }
 0x42c   :  { %4224 = vst [vmem:[#allocation2 + $0x120] sm:$0xff] %v6067_v49  ;;  %v3436_v21 = vpop.f32.mrb[20].mxu0  ;;  %4225 = vst [vmem:[#allocation2 + $0x128] sm:$0xff] %v6068_v30  ;;  %v3549_v51 = vpop.f32.mrb[20].mxu1 }
 0x42d   :  { %v3437_v50 = vadd.f32 %v3436_v21, %v7769_v3  ;;  %v3438_v53 = vpop.f32.mrb[21].mxu0  ;;  %v3550_v54 = vadd.f32 %v3549_v51, %v7774_v28  ;;  %v3551_v56 = vpop.f32.mrb[21].mxu1 }
 0x42e   :  { %v3439_v55 = vadd.f32 %v3438_v53, %v7779_v36  ;;  %v3440_v59 = vpop.f32.mrb[22].mxu0  ;;  %v3552_v52 = vadd.f32 %v3551_v56, %v7784_v1  ;;  %v3553_v13 = vpop.f32.mrb[22].mxu1 }
 0x42f   :  { %v3441_v60 = vadd.f32 %v3440_v59, %v7769_v3  ;;  %v3442_v19 = vpop.f32.mrb[23].mxu0  ;;  %v3554_v15 = vadd.f32 %v3553_v13, %v7774_v28  ;;  %v3555_v48 = vpop.f32.mrb[23].mxu1 }
 0x430   :  { %v6071_v31 = vpack.c.bf16 %v3439_v55, %v3437_v50  ;;  %v3443_v39 = vadd.f32 %v3442_v19, %v7779_v36  ;;  %v6072_v58 = vpack.c.bf16 %v3552_v52, %v3550_v54  ;;  %v3556_v16 = vadd.f32 %v3555_v48, %v7784_v1 }
 0x431   :  { %v7853_v54 = vrot.slane %v7764_v46, %v127_v57 }
 0x432   :  { %4228 = vst [vmem:[#allocation2 + $0x140] sm:$0xff] %v6071_v31  ;;  %v6075_v61 = vpack.c.bf16 %v3443_v39, %v3441_v60  ;;  %4229 = vst [vmem:[#allocation2 + $0x148] sm:$0xff] %v6072_v58  ;;  %v6076_v0 = vpack.c.bf16 %v3556_v16, %v3554_v15 }
 0x434   :  { %4232 = vst [vmem:[#allocation2 + $0x160] sm:$0xff] %v6075_v61  ;;  %v3446_v2 = vpop.f32.mrb[24].mxu0  ;;  %4233 = vst [vmem:[#allocation2 + $0x168] sm:$0xff] %v6076_v0  ;;  %v3559_v4 = vpop.f32.mrb[24].mxu1 }
 0x435   :  { %v3447_v17 = vadd.f32 %v3446_v2, %v7769_v3  ;;  %v3448_v6 = vpop.f32.mrb[25].mxu0  ;;  %v3560_v7 = vadd.f32 %v3559_v4, %v7774_v28  ;;  %v3561_v10 = vpop.f32.mrb[25].mxu1 }
 0x436   :  { %v3449_v9 = vadd.f32 %v3448_v6, %v7779_v36  ;;  %v3450_v11 = vpop.f32.mrb[26].mxu0  ;;  %v3562_v8 = vadd.f32 %v3561_v10, %v7784_v1  ;;  %v3563_v24 = vpop.f32.mrb[26].mxu1 }
 0x437   :  { %v3451_v23 = vadd.f32 %v3450_v11, %v7769_v3  ;;  %v3452_v25 = vpop.f32.mrb[27].mxu0  ;;  %v3564_v27 = vadd.f32 %v3563_v24, %v7774_v28  ;;  %v3565_v22 = vpop.f32.mrb[27].mxu1 }
 0x438   :  { %v6079_v26 = vpack.c.bf16 %v3449_v9, %v3447_v17  ;;  %v3453_v29 = vadd.f32 %v3452_v25, %v7779_v36  ;;  %v6080_v18 = vpack.c.bf16 %v3562_v8, %v3560_v7  ;;  %v3566_v20 = vadd.f32 %v3565_v22, %v7784_v1 }
 0x43a   :  { %4236 = vst [vmem:[#allocation2 + $0x180] sm:$0xff] %v6079_v26  ;;  %v6083_v33 = vpack.c.bf16 %v3453_v29, %v3451_v23  ;;  %4237 = vst [vmem:[#allocation2 + $0x188] sm:$0xff] %v6080_v18  ;;  %v6084_v40 = vpack.c.bf16 %v3566_v20, %v3564_v27 }
 0x43c   :  { %4240 = vst [vmem:[#allocation2 + $0x1a0] sm:$0xff] %v6083_v33  ;;  %v3456_v14 = vpop.f32.mrb[28].mxu0  ;;  %4241 = vst [vmem:[#allocation2 + $0x1a8] sm:$0xff] %v6084_v40  ;;  %v3569_v35 = vpop.f32.mrb[28].mxu1 }
 0x43d   :  { %v3457_v34 = vadd.f32 %v3456_v14, %v7769_v3  ;;  %v3458_v37 = vpop.f32.mrb[29].mxu0  ;;  %v3570_v38 = vadd.f32 %v3569_v35, %v7774_v28  ;;  %v3571_v42 = vpop.f32.mrb[29].mxu1 }
 0x43e   :  { %v3459_v41 = vadd.f32 %v3458_v37, %v7779_v36  ;;  %v3460_v43 = vpop.f32.mrb[30].mxu0  ;;  %v3572_v44 = vadd.f32 %v3571_v42, %v7784_v1  ;;  %v3573_v47 = vpop.f32.mrb[30].mxu1 }
 0x43f   :  { %v3461_v45 = vadd.f32 %v3460_v43, %v7769_v3  ;;  %v3462_v32 = vpop.f32.mrb[31].mxu0  ;;  %v3574_v30 = vadd.f32 %v3573_v47, %v7774_v28  ;;  %v3575_v50 = vpop.f32.mrb[31].mxu1  ;;  %v7858_v3 = vrot.slane %v7764_v46, %v135_v62  ;;  %v7863_v28 = vrot.slane %v7764_v46, %v131_v63 }
 0x440   :  { %v6087_v49 = vpack.c.bf16 %v3459_v41, %v3457_v34  ;;  %v3463_v21 = vadd.f32 %v3462_v32, %v7779_v36  ;;  %v6088_v51 = vpack.c.bf16 %v3572_v44, %v3570_v38  ;;  %v3576_v53 = vadd.f32 %v3575_v50, %v7784_v1 }
 0x441   :  { %v7868_v1 = vrot.slane %v7764_v46, %v139_v5 }
 0x442   :  { %4244 = vst [vmem:[#allocation2 + $0x1c0] sm:$0xff] %v6087_v49  ;;  %v6091_v55 = vpack.c.bf16 %v3463_v21, %v3461_v45  ;;  %4245 = vst [vmem:[#allocation2 + $0x1c8] sm:$0xff] %v6088_v51  ;;  %v6092_v36 = vpack.c.bf16 %v3576_v53, %v3574_v30 }
 0x444   :  { %4248 = vst [vmem:[#allocation2 + $0x1e0] sm:$0xff] %v6091_v55  ;;  %v3612_v57 = vpop.f32.mrb[32].mxu0  ;;  %4249 = vst [vmem:[#allocation2 + $0x1e8] sm:$0xff] %v6092_v36  ;;  %v3725_v59 = vpop.f32.mrb[32].mxu1 }
 0x445   :  { %v3613_v56 = vadd.f32 %v3612_v57, %v7853_v54  ;;  %v3614_v62 = vpop.f32.mrb[33].mxu0  ;;  %v3726_v52 = vadd.f32 %v3725_v59, %v7858_v3  ;;  %v3727_v63 = vpop.f32.mrb[33].mxu1 }
 0x446   :  { %v3615_v60 = vadd.f32 %v3614_v62, %v7863_v28  ;;  %v3616_v13 = vpop.f32.mrb[34].mxu0  ;;  %v3728_v19 = vadd.f32 %v3727_v63, %v7868_v1  ;;  %v3729_v31 = vpop.f32.mrb[34].mxu1 }
 0x447   :  { %v3617_v12 = vadd.f32 %v3616_v13, %v7853_v54  ;;  %v3618_v5 = vpop.f32.mrb[35].mxu0  ;;  %v3730_v15 = vadd.f32 %v3729_v31, %v7858_v3  ;;  %v3731_v48 = vpop.f32.mrb[35].mxu1 }
 0x448   :  { %v6033_v46 = vpack.c.bf16 %v3615_v60, %v3613_v56  ;;  %v3619_v39 = vadd.f32 %v3618_v5, %v7863_v28  ;;  %v6034_v58 = vpack.c.bf16 %v3728_v19, %v3726_v52  ;;  %v3732_v16 = vadd.f32 %v3731_v48, %v7868_v1 }
 0x44a   :  { %4190 = vst [vmem:[#allocation2 + $0x10] sm:$0xff] %v6033_v46  ;;  %v6037_v61 = vpack.c.bf16 %v3619_v39, %v3617_v12  ;;  %4191 = vst [vmem:[#allocation2 + $0x18] sm:$0xff] %v6034_v58  ;;  %v6038_v0 = vpack.c.bf16 %v3732_v16, %v3730_v15 }
 0x44c   :  { %4194 = vst [vmem:[#allocation2 + $0x30] sm:$0xff] %v6037_v61  ;;  %v3622_v2 = vpop.f32.mrb[36].mxu0  ;;  %4195 = vst [vmem:[#allocation2 + $0x38] sm:$0xff] %v6038_v0  ;;  %v3735_v4 = vpop.f32.mrb[36].mxu1 }
 0x44d   :  { %v3623_v17 = vadd.f32 %v3622_v2, %v7853_v54  ;;  %v3624_v6 = vpop.f32.mrb[37].mxu0  ;;  %v3736_v7 = vadd.f32 %v3735_v4, %v7858_v3  ;;  %v3737_v10 = vpop.f32.mrb[37].mxu1 }
 0x44e   :  { %v3625_v9 = vadd.f32 %v3624_v6, %v7863_v28  ;;  %v3626_v11 = vpop.f32.mrb[38].mxu0  ;;  %v3738_v8 = vadd.f32 %v3737_v10, %v7868_v1  ;;  %v3739_v24 = vpop.f32.mrb[38].mxu1 }
 0x44f   :  { %v3627_v23 = vadd.f32 %v3626_v11, %v7853_v54  ;;  %v3628_v25 = vpop.f32.mrb[39].mxu0  ;;  %v3740_v27 = vadd.f32 %v3739_v24, %v7858_v3  ;;  %v3741_v22 = vpop.f32.mrb[39].mxu1 }
 0x450   :  { %v6041_v26 = vpack.c.bf16 %v3625_v9, %v3623_v17  ;;  %v3629_v29 = vadd.f32 %v3628_v25, %v7863_v28  ;;  %v6042_v18 = vpack.c.bf16 %v3738_v8, %v3736_v7  ;;  %v3742_v20 = vadd.f32 %v3741_v22, %v7868_v1 }
 0x452   :  { %4198 = vst [vmem:[#allocation2 + $0x50] sm:$0xff] %v6041_v26  ;;  %v6045_v33 = vpack.c.bf16 %v3629_v29, %v3627_v23  ;;  %4199 = vst [vmem:[#allocation2 + $0x58] sm:$0xff] %v6042_v18  ;;  %v6046_v40 = vpack.c.bf16 %v3742_v20, %v3740_v27 }
 0x454   :  { %4202 = vst [vmem:[#allocation2 + $0x70] sm:$0xff] %v6045_v33  ;;  %v3632_v14 = vpop.f32.mrb[40].mxu0  ;;  %4203 = vst [vmem:[#allocation2 + $0x78] sm:$0xff] %v6046_v40  ;;  %v3745_v35 = vpop.f32.mrb[40].mxu1 }
 0x455   :  { %v3633_v34 = vadd.f32 %v3632_v14, %v7853_v54  ;;  %v3634_v37 = vpop.f32.mrb[41].mxu0  ;;  %v3746_v38 = vadd.f32 %v3745_v35, %v7858_v3  ;;  %v3747_v42 = vpop.f32.mrb[41].mxu1 }
 0x456   :  { %v3635_v41 = vadd.f32 %v3634_v37, %v7863_v28  ;;  %v3636_v43 = vpop.f32.mrb[42].mxu0  ;;  %v3748_v44 = vadd.f32 %v3747_v42, %v7868_v1  ;;  %v3749_v47 = vpop.f32.mrb[42].mxu1 }
 0x457   :  { %v3637_v45 = vadd.f32 %v3636_v43, %v7853_v54  ;;  %v3638_v32 = vpop.f32.mrb[43].mxu0  ;;  %v3750_v30 = vadd.f32 %v3749_v47, %v7858_v3  ;;  %v3751_v50 = vpop.f32.mrb[43].mxu1 }
 0x458   :  { %v6049_v49 = vpack.c.bf16 %v3635_v41, %v3633_v34  ;;  %v3639_v21 = vadd.f32 %v3638_v32, %v7863_v28  ;;  %v6050_v51 = vpack.c.bf16 %v3748_v44, %v3746_v38  ;;  %v3752_v53 = vadd.f32 %v3751_v50, %v7868_v1 }
 0x45a   :  { %4206 = vst [vmem:[#allocation2 + $0x90] sm:$0xff] %v6049_v49  ;;  %v6053_v55 = vpack.c.bf16 %v3639_v21, %v3637_v45  ;;  %4207 = vst [vmem:[#allocation2 + $0x98] sm:$0xff] %v6050_v51  ;;  %v6054_v36 = vpack.c.bf16 %v3752_v53, %v3750_v30 }
 0x45c   :  { %4210 = vst [vmem:[#allocation2 + $0xb0] sm:$0xff] %v6053_v55  ;;  %v3642_v57 = vpop.f32.mrb[44].mxu0  ;;  %4211 = vst [vmem:[#allocation2 + $0xb8] sm:$0xff] %v6054_v36  ;;  %v3755_v59 = vpop.f32.mrb[44].mxu1 }
 0x45d   :  { %v3643_v56 = vadd.f32 %v3642_v57, %v7853_v54  ;;  %v3644_v62 = vpop.f32.mrb[45].mxu0  ;;  %v3756_v52 = vadd.f32 %v3755_v59, %v7858_v3  ;;  %v3757_v63 = vpop.f32.mrb[45].mxu1 }
 0x45e   :  { %v3645_v60 = vadd.f32 %v3644_v62, %v7863_v28  ;;  %v3646_v13 = vpop.f32.mrb[46].mxu0  ;;  %v3758_v19 = vadd.f32 %v3757_v63, %v7868_v1  ;;  %v3759_v31 = vpop.f32.mrb[46].mxu1 }
 0x45f   :  { %v3647_v12 = vadd.f32 %v3646_v13, %v7853_v54  ;;  %v3648_v5 = vpop.f32.mrb[47].mxu0  ;;  %v3760_v15 = vadd.f32 %v3759_v31, %v7858_v3  ;;  %v3761_v48 = vpop.f32.mrb[47].mxu1 }
 0x460   :  { %v6057_v46 = vpack.c.bf16 %v3645_v60, %v3643_v56  ;;  %v3649_v39 = vadd.f32 %v3648_v5, %v7863_v28  ;;  %v6058_v58 = vpack.c.bf16 %v3758_v19, %v3756_v52  ;;  %v3762_v16 = vadd.f32 %v3761_v48, %v7868_v1 }
 0x462   :  { %4214 = vst [vmem:[#allocation2 + $0xd0] sm:$0xff] %v6057_v46  ;;  %v6061_v61 = vpack.c.bf16 %v3649_v39, %v3647_v12  ;;  %4215 = vst [vmem:[#allocation2 + $0xd8] sm:$0xff] %v6058_v58  ;;  %v6062_v0 = vpack.c.bf16 %v3762_v16, %v3760_v15 }
 0x464   :  { %4218 = vst [vmem:[#allocation2 + $0xf0] sm:$0xff] %v6061_v61  ;;  %v3652_v2 = vpop.f32.mrb[48].mxu0  ;;  %4219 = vst [vmem:[#allocation2 + $0xf8] sm:$0xff] %v6062_v0  ;;  %v3765_v4 = vpop.f32.mrb[48].mxu1 }
 0x465   :  { %v3653_v17 = vadd.f32 %v3652_v2, %v7853_v54  ;;  %v3654_v6 = vpop.f32.mrb[49].mxu0  ;;  %v3766_v7 = vadd.f32 %v3765_v4, %v7858_v3  ;;  %v3767_v10 = vpop.f32.mrb[49].mxu1 }
 0x466   :  { %v3655_v9 = vadd.f32 %v3654_v6, %v7863_v28  ;;  %v3656_v11 = vpop.f32.mrb[50].mxu0  ;;  %v3768_v8 = vadd.f32 %v3767_v10, %v7868_v1  ;;  %v3769_v24 = vpop.f32.mrb[50].mxu1 }
 0x467   :  { %v3657_v23 = vadd.f32 %v3656_v11, %v7853_v54  ;;  %v3658_v25 = vpop.f32.mrb[51].mxu0  ;;  %v3770_v27 = vadd.f32 %v3769_v24, %v7858_v3  ;;  %v3771_v22 = vpop.f32.mrb[51].mxu1 }
 0x468   :  { %v6065_v26 = vpack.c.bf16 %v3655_v9, %v3653_v17  ;;  %v3659_v29 = vadd.f32 %v3658_v25, %v7863_v28  ;;  %v6066_v18 = vpack.c.bf16 %v3768_v8, %v3766_v7  ;;  %v3772_v20 = vadd.f32 %v3771_v22, %v7868_v1 }
 0x46a   :  { %4222 = vst [vmem:[#allocation2 + $0x110] sm:$0xff] %v6065_v26  ;;  %v6069_v33 = vpack.c.bf16 %v3659_v29, %v3657_v23  ;;  %4223 = vst [vmem:[#allocation2 + $0x118] sm:$0xff] %v6066_v18  ;;  %v6070_v40 = vpack.c.bf16 %v3772_v20, %v3770_v27 }
 0x46c   :  { %4226 = vst [vmem:[#allocation2 + $0x130] sm:$0xff] %v6069_v33  ;;  %v3662_v14 = vpop.f32.mrb[52].mxu0  ;;  %4227 = vst [vmem:[#allocation2 + $0x138] sm:$0xff] %v6070_v40  ;;  %v3775_v35 = vpop.f32.mrb[52].mxu1 }
 0x46d   :  { %v3663_v34 = vadd.f32 %v3662_v14, %v7853_v54  ;;  %v3664_v37 = vpop.f32.mrb[53].mxu0  ;;  %v3776_v38 = vadd.f32 %v3775_v35, %v7858_v3  ;;  %v3777_v42 = vpop.f32.mrb[53].mxu1  ;;  %v7934_v14 = vmov 0.0   ;;  %v7940_v35 = vmov 0.0  }
 0x46e   :  { %v3665_v41 = vadd.f32 %v3664_v37, %v7863_v28  ;;  %v3666_v43 = vpop.f32.mrb[54].mxu0  ;;  %v3778_v44 = vadd.f32 %v3777_v42, %v7868_v1  ;;  %v3779_v47 = vpop.f32.mrb[54].mxu1 }
 0x46f   :  { %v3667_v45 = vadd.f32 %v3666_v43, %v7853_v54  ;;  %v3668_v32 = vpop.f32.mrb[55].mxu0  ;;  %v3780_v30 = vadd.f32 %v3779_v47, %v7858_v3  ;;  %v3781_v50 = vpop.f32.mrb[55].mxu1 }
 0x470   :  { %v6073_v49 = vpack.c.bf16 %v3665_v41, %v3663_v34  ;;  %v3669_v21 = vadd.f32 %v3668_v32, %v7863_v28  ;;  %v6074_v51 = vpack.c.bf16 %v3778_v44, %v3776_v38  ;;  %v3782_v53 = vadd.f32 %v3781_v50, %v7868_v1 }
 0x471   :  { %v7938_v34 = vmov 0.0  }
 0x472   :  { %4230 = vst [vmem:[#allocation2 + $0x150] sm:$0xff] %v6073_v49  ;;  %v6077_v55 = vpack.c.bf16 %v3669_v21, %v3667_v45  ;;  %4231 = vst [vmem:[#allocation2 + $0x158] sm:$0xff] %v6074_v51  ;;  %v6078_v36 = vpack.c.bf16 %v3782_v53, %v3780_v30 }
 0x474   :  { %4234 = vst [vmem:[#allocation2 + $0x170] sm:$0xff] %v6077_v55  ;;  %v3672_v57 = vpop.f32.mrb[56].mxu0  ;;  %4235 = vst [vmem:[#allocation2 + $0x178] sm:$0xff] %v6078_v36  ;;  %v3785_v59 = vpop.f32.mrb[56].mxu1 }
 0x475   :  { %v3673_v56 = vadd.f32 %v3672_v57, %v7853_v54  ;;  %v3674_v62 = vpop.f32.mrb[57].mxu0  ;;  %v3786_v52 = vadd.f32 %v3785_v59, %v7858_v3  ;;  %v3787_v63 = vpop.f32.mrb[57].mxu1 }
 0x476   :  { %v3675_v60 = vadd.f32 %v3674_v62, %v7863_v28  ;;  %v3676_v13 = vpop.f32.mrb[58].mxu0  ;;  %v3788_v19 = vadd.f32 %v3787_v63, %v7868_v1  ;;  %v3789_v31 = vpop.f32.mrb[58].mxu1 }
 0x477   :  { %v3677_v12 = vadd.f32 %v3676_v13, %v7853_v54  ;;  %v3678_v5 = vpop.f32.mrb[59].mxu0  ;;  %v3790_v15 = vadd.f32 %v3789_v31, %v7858_v3  ;;  %v3791_v48 = vpop.f32.mrb[59].mxu1 }
 0x478   :  { %v6081_v46 = vpack.c.bf16 %v3675_v60, %v3673_v56  ;;  %v3679_v39 = vadd.f32 %v3678_v5, %v7863_v28  ;;  %v6082_v58 = vpack.c.bf16 %v3788_v19, %v3786_v52  ;;  %v3792_v16 = vadd.f32 %v3791_v48, %v7868_v1 }
 0x47a   :  { %4238 = vst [vmem:[#allocation2 + $0x190] sm:$0xff] %v6081_v46  ;;  %v6085_v61 = vpack.c.bf16 %v3679_v39, %v3677_v12  ;;  %4239 = vst [vmem:[#allocation2 + $0x198] sm:$0xff] %v6082_v58  ;;  %v6086_v0 = vpack.c.bf16 %v3792_v16, %v3790_v15 }
 0x47c   :  { %4242 = vst [vmem:[#allocation2 + $0x1b0] sm:$0xff] %v6085_v61  ;;  %v3682_v2 = vpop.f32.mrb[60].mxu0  ;;  %4243 = vst [vmem:[#allocation2 + $0x1b8] sm:$0xff] %v6086_v0  ;;  %v3795_v4 = vpop.f32.mrb[60].mxu1 }
 0x47d   :  { %v3683_v17 = vadd.f32 %v3682_v2, %v7853_v54  ;;  %v3684_v6 = vpop.f32.mrb[61].mxu0  ;;  %v3796_v7 = vadd.f32 %v3795_v4, %v7858_v3  ;;  %v3797_v10 = vpop.f32.mrb[61].mxu1 }
 0x47e   :  { %v3685_v9 = vadd.f32 %v3684_v6, %v7863_v28  ;;  %v3686_v11 = vpop.f32.mrb[62].mxu0  ;;  %v3798_v8 = vadd.f32 %v3797_v10, %v7868_v1  ;;  %v3799_v24 = vpop.f32.mrb[62].mxu1 }
 0x47f   :  { %v3687_v23 = vadd.f32 %v3686_v11, %v7853_v54  ;;  %v3688_v25 = vpop.f32.mrb[63].mxu0  ;;  %v3800_v27 = vadd.f32 %v3799_v24, %v7858_v3  ;;  %v3801_v22 = vpop.f32.mrb[63].mxu1  ;;  %v7936_v54 = vmov 0.0  }
 0x480   :  { %v6089_v26 = vpack.c.bf16 %v3685_v9, %v3683_v17  ;;  %v3689_v29 = vadd.f32 %v3688_v25, %v7863_v28  ;;  %v6090_v18 = vpack.c.bf16 %v3798_v8, %v3796_v7  ;;  %v3802_v20 = vadd.f32 %v3801_v22, %v7868_v1 }
 0x482   :  { %4246 = vst [vmem:[#allocation2 + $0x1d0] sm:$0xff] %v6089_v26  ;;  %v6093_v33 = vpack.c.bf16 %v3689_v29, %v3687_v23  ;;  %4247 = vst [vmem:[#allocation2 + $0x1d8] sm:$0xff] %v6090_v18  ;;  %v6094_v40 = vpack.c.bf16 %v3802_v20, %v3800_v27 }
 0x484   :  { %4250 = vst [vmem:[#allocation2 + $0x1f0] sm:$0xff] %v6093_v33  ;;  %4251 = vst [vmem:[#allocation2 + $0x1f8] sm:$0xff] %v6094_v40 }
 0x485 LB: > { %v4264_v3 = vld [vmem:[%s8384_s5] sm:$0xff]  ;;  %v4265_v45 = vld [vmem:[%s8384_s5 + $0x8] sm:$0xff]  ;;  %v7981_v32 = vpack.c.bf16 %v6346_v34, %v6346_v34  ;;  %s6095_s13 = sshll.u32 %s6354_s6, 5  ;;  %s6097_s15 = sshll.u32 %s6354_s6, 3  ;;  %s6354_s6 = sphi %s7942_s6, %s4257_s6   ;;  %v6350_v35 = vphi %v7940_v35, %v5268_v35   ;;  %v6346_v34 = vphi %v7938_v34, %v5270_v34   ;;  %v6342_v54 = vphi %v7936_v54, %v5262_v54   ;;  %v6338_v14 = vphi %v7934_v14, %v5266_v14  }
 0x486   : > { %v4268_v28 = vld [vmem:[%s8384_s5 + $0x20] sm:$0xff]  ;;  %v4269_v47 = vld [vmem:[%s8384_s5 + $0x28] sm:$0xff]  ;;  %s5199_s14 = scalar_lea.vmem [#allocation2], %s6095_s13  ;;  %s5274_s18 = scalar_lea.vmem %s8386_s7, %s6097_s15 }
 0x487   : > { %v4272_v1 = vld [vmem:[%s8384_s5 + $0x40] sm:$0xff]  ;;  %v5822_v37 = vcombine.high %v4264_v3, %v4268_v28  ;;  %v5821_v38 = vcombine.low %v4264_v3, %v4268_v28  ;;  %v5824_v30 = vcombine.high %v4265_v45, %v4269_v47  ;;  %v5823_v21 = vcombine.low %v4265_v45, %v4269_v47  ;;  %v4273_v50 = vld [vmem:[%s8384_s5 + $0x48] sm:$0xff]  ;;  %5064 = vmatprep.mubr.bf16.mxu0 %v7981_v32  ;;  %s5196_s19 = ssub.s32 15, %s6354_s6  ;;  %s4257_s6 = sadd.s32 1, %s6354_s6  }
 0x488   : > { %v4276_v41 = vld [vmem:[%s8384_s5 + $0x60] sm:$0xff]  ;;  %v4277_v51 = vld [vmem:[%s8384_s5 + $0x68] sm:$0xff]  ;;  %5105 = vmatprep.mubr.bf16.mxu1 %v7981_v32  ;;  %s6096_s20 = sshll.u32 %s5196_s19, 5  ;;  %s6098_s1 = sshll.u32 %s5196_s19, 3 }
 0x489   : > { %v5830_v42 = vcombine.high %v4272_v1, %v4276_v41  ;;  %v4280_v43 = vld [vmem:[%s8384_s5 + $0x80] sm:$0xff]  ;;  %5032 = vmatprep.subr.bf16.mxu0 %v5822_v37  ;;  %v5829_v49 = vcombine.low %v4272_v1, %v4276_v41  ;;  %v5832_v55 = vcombine.high %v4273_v50, %v4277_v51  ;;  %v4281_v36 = vld [vmem:[%s8384_s5 + $0x88] sm:$0xff]  ;;  %5073 = vmatprep.subr.bf16.mxu1 %v5824_v30  ;;  %s5212_s21 = scalar_lea.vmem [#allocation2], %s6096_s20  ;;  %s5279_s24 = scalar_lea.vmem %s8386_s7, %s6098_s1 }
 0x48a   : > { %v4284_v44 = vld [vmem:[%s8384_s5 + $0xa0] sm:$0xff]  ;;  %5033 = vmatpush1.bf16.msra.mxu0 %v5821_v38  ;;  %v4285_v57 = vld [vmem:[%s8384_s5 + $0xa8] sm:$0xff]  ;;  %5074 = vmatpush1.bf16.msra.mxu1 %v5823_v21  ;;  %v5831_v62 = vcombine.low %v4273_v50, %v4277_v51  ;;  %p4254_p1 = scmp.ge.s32.totalorder %s4257_s6, 16  }
 0x48b   : > { %5034 = vmatprep.subr.bf16.mxu0 %v5830_v42  ;;  %v5838_v53 = vcombine.high %v4280_v43, %v4284_v44  ;;  %v4288_v56 = vld [vmem:[%s8384_s5 + $0xc0] sm:$0xff]  ;;  %v5837_v52 = vcombine.low %v4280_v43, %v4284_v44  ;;  %5075 = vmatprep.subr.bf16.mxu1 %v5832_v55  ;;  %v5840_v60 = vcombine.high %v4281_v36, %v4285_v57  ;;  %v4289_v13 = vld [vmem:[%s8384_s5 + $0xc8] sm:$0xff] }
 0x48c   : > { %v4292_v59 = vld [vmem:[%s8384_s5 + $0xe0] sm:$0xff]  ;;  %v4293_v19 = vld [vmem:[%s8384_s5 + $0xe8] sm:$0xff]  ;;  %v5839_v5 = vcombine.low %v4281_v36, %v4285_v57 }
 0x48d   : > { %v5846_v63 = vcombine.high %v4288_v56, %v4292_v59  ;;  %v4296_v12 = vld [vmem:[%s8384_s5 + $0x100] sm:$0xff]  ;;  %v5845_v46 = vcombine.low %v4288_v56, %v4292_v59  ;;  %v5848_v15 = vcombine.high %v4289_v13, %v4293_v19  ;;  %v4297_v48 = vld [vmem:[%s8384_s5 + $0x108] sm:$0xff]  ;;  %v5847_v0 = vcombine.low %v4289_v13, %v4293_v19 }
 0x48e   : > { %5035 = vmatpush1.bf16.msra.mxu0 %v5829_v49  ;;  %v4300_v31 = vld [vmem:[%s8384_s5 + $0x120] sm:$0xff]  ;;  %5076 = vmatpush1.bf16.msra.mxu1 %v5831_v62  ;;  %v4301_v58 = vld [vmem:[%s8384_s5 + $0x128] sm:$0xff] }
 0x48f   : > { %5036 = vmatprep.subr.bf16.mxu0 %v5838_v53  ;;  %5077 = vmatprep.subr.bf16.mxu1 %v5840_v60  ;;  %v5854_v39 = vcombine.high %v4296_v12, %v4300_v31  ;;  %v4304_v16 = vld [vmem:[%s8384_s5 + $0x140] sm:$0xff]  ;;  %v5853_v2 = vcombine.low %v4296_v12, %v4300_v31  ;;  %v5856_v17 = vcombine.high %v4297_v48, %v4301_v58  ;;  %v4305_v6 = vld [vmem:[%s8384_s5 + $0x148] sm:$0xff] }
 0x490   : > { %v4308_v61 = vld [vmem:[%s8384_s5 + $0x160] sm:$0xff]  ;;  %v4309_v7 = vld [vmem:[%s8384_s5 + $0x168] sm:$0xff]  ;;  %v5855_v11 = vcombine.low %v4297_v48, %v4301_v58 }
 0x491   : > { %v5862_v4 = vcombine.high %v4304_v16, %v4308_v61  ;;  %v4312_v9 = vld [vmem:[%s8384_s5 + $0x180] sm:$0xff]  ;;  %v5861_v8 = vcombine.low %v4304_v16, %v4308_v61  ;;  %v5864_v23 = vcombine.high %v4305_v6, %v4309_v7  ;;  %v4313_v25 = vld [vmem:[%s8384_s5 + $0x188] sm:$0xff]  ;;  %v5863_v22 = vcombine.low %v4305_v6, %v4309_v7 }
 0x492   : > { %5037 = vmatpush1.bf16.msra.mxu0 %v5837_v52  ;;  %5078 = vmatpush1.bf16.msra.mxu1 %v5839_v5  ;;  %v4316_v10 = vld [vmem:[%s8384_s5 + $0x1a0] sm:$0xff]  ;;  %v4317_v26 = vld [vmem:[%s8384_s5 + $0x1a8] sm:$0xff] }
 0x493   : > { %5038 = vmatprep.subr.bf16.mxu0 %v5846_v63  ;;  %5079 = vmatprep.subr.bf16.mxu1 %v5848_v15  ;;  %v5870_v24 = vcombine.high %v4312_v9, %v4316_v10  ;;  %v4320_v27 = vld [vmem:[%s8384_s5 + $0x1c0] sm:$0xff]  ;;  %v5869_v18 = vcombine.low %v4312_v9, %v4316_v10  ;;  %v5872_v20 = vcombine.high %v4313_v25, %v4317_v26  ;;  %v4321_v40 = vld [vmem:[%s8384_s5 + $0x1c8] sm:$0xff] }
 0x494   : > { %v4324_v29 = vld [vmem:[%s8384_s5 + $0x1e0] sm:$0xff]  ;;  %v4325_v34 = vld [vmem:[%s8384_s5 + $0x1e8] sm:$0xff]  ;;  %v5871_v1 = vcombine.low %v4313_v25, %v4317_v26 }
 0x495   : > { %v5878_v33 = vcombine.high %v4320_v27, %v4324_v29  ;;  %v4328_v3 = vld [vmem:[%s8384_s5 + $0x200] sm:$0xff]  ;;  %v5877_v37 = vcombine.low %v4320_v27, %v4324_v29  ;;  %v5880_v38 = vcombine.high %v4321_v40, %v4325_v34  ;;  %v4329_v42 = vld [vmem:[%s8384_s5 + $0x208] sm:$0xff]  ;;  %v5879_v47 = vcombine.low %v4321_v40, %v4325_v34 }
 0x496   : > { %5039 = vmatpush1.bf16.msra.mxu0 %v5845_v46  ;;  %5080 = vmatpush1.bf16.msra.mxu1 %v5847_v0  ;;  %v4332_v28 = vld [vmem:[%s8384_s5 + $0x220] sm:$0xff]  ;;  %v4333_v43 = vld [vmem:[%s8384_s5 + $0x228] sm:$0xff] }
 0x497   : > { %5040 = vmatprep.subr.bf16.mxu0 %v5854_v39  ;;  %5081 = vmatprep.subr.bf16.mxu1 %v5856_v17  ;;  %v5886_v41 = vcombine.high %v4328_v3, %v4332_v28  ;;  %v4336_v44 = vld [vmem:[%s8384_s5 + $0x240] sm:$0xff]  ;;  %v5885_v49 = vcombine.low %v4328_v3, %v4332_v28  ;;  %v5888_v30 = vcombine.high %v4329_v42, %v4333_v43  ;;  %v4337_v50 = vld [vmem:[%s8384_s5 + $0x248] sm:$0xff] }
 0x498   : > { %v4340_v45 = vld [vmem:[%s8384_s5 + $0x260] sm:$0xff]  ;;  %v4341_v51 = vld [vmem:[%s8384_s5 + $0x268] sm:$0xff]  ;;  %v5887_v36 = vcombine.low %v4329_v42, %v4333_v43 }
 0x499   : > { %v5894_v21 = vcombine.high %v4336_v44, %v4340_v45  ;;  %v4344_v53 = vld [vmem:[%s8384_s5 + $0x280] sm:$0xff]  ;;  %v5893_v57 = vcombine.low %v4336_v44, %v4340_v45  ;;  %v5896_v56 = vcombine.high %v4337_v50, %v4341_v51  ;;  %v4345_v62 = vld [vmem:[%s8384_s5 + $0x288] sm:$0xff]  ;;  %v5895_v13 = vcombine.low %v4337_v50, %v4341_v51 }
 0x49a   : > { %5041 = vmatpush1.bf16.msra.mxu0 %v5853_v2  ;;  %5082 = vmatpush1.bf16.msra.mxu1 %v5855_v11  ;;  %v4348_v55 = vld [vmem:[%s8384_s5 + $0x2a0] sm:$0xff]  ;;  %v4349_v52 = vld [vmem:[%s8384_s5 + $0x2a8] sm:$0xff]  ;;  %v8173_v50 = vpack.c.bf16 %v6350_v35, %v6350_v35  ;;  %v4282_v35 = vld [vmem:[%s8384_s5 + $0x90] sm:$0xff] }
 0x49b   : > { %5042 = vmatprep.subr.bf16.mxu0 %v5862_v4  ;;  %5083 = vmatprep.subr.bf16.mxu1 %v5864_v23  ;;  %v5902_v59 = vcombine.high %v4344_v53, %v4348_v55  ;;  %v4352_v60 = vld [vmem:[%s8384_s5 + $0x2c0] sm:$0xff]  ;;  %v5901_v19 = vcombine.low %v4344_v53, %v4348_v55  ;;  %v5904_v12 = vcombine.high %v4345_v62, %v4349_v52  ;;  %v4353_v5 = vld [vmem:[%s8384_s5 + $0x2c8] sm:$0xff] }
 0x49c   : > { %v4356_v63 = vld [vmem:[%s8384_s5 + $0x2e0] sm:$0xff]  ;;  %v4357_v46 = vld [vmem:[%s8384_s5 + $0x2e8] sm:$0xff]  ;;  %v5903_v48 = vcombine.low %v4345_v62, %v4349_v52 }
 0x49d   : > { %v5910_v31 = vcombine.high %v4352_v60, %v4356_v63  ;;  %v4360_v15 = vld [vmem:[%s8384_s5 + $0x300] sm:$0xff]  ;;  %v5909_v58 = vcombine.low %v4352_v60, %v4356_v63  ;;  %v5912_v16 = vcombine.high %v4353_v5, %v4357_v46  ;;  %v4361_v0 = vld [vmem:[%s8384_s5 + $0x308] sm:$0xff]  ;;  %v5911_v6 = vcombine.low %v4353_v5, %v4357_v46 }
 0x49e   : > { %5043 = vmatpush1.bf16.msra.mxu0 %v5861_v8  ;;  %5084 = vmatpush1.bf16.msra.mxu1 %v5863_v22  ;;  %v4364_v39 = vld [vmem:[%s8384_s5 + $0x320] sm:$0xff]  ;;  %v4365_v2 = vld [vmem:[%s8384_s5 + $0x328] sm:$0xff] }
 0x49f   : > { %5044 = vmatprep.subr.bf16.mxu0 %v5870_v24  ;;  %5085 = vmatprep.subr.bf16.mxu1 %v5872_v20  ;;  %v5918_v61 = vcombine.high %v4360_v15, %v4364_v39  ;;  %v4368_v17 = vld [vmem:[%s8384_s5 + $0x340] sm:$0xff]  ;;  %v5917_v7 = vcombine.low %v4360_v15, %v4364_v39  ;;  %v5920_v9 = vcombine.high %v4361_v0, %v4365_v2  ;;  %v4369_v11 = vld [vmem:[%s8384_s5 + $0x348] sm:$0xff] }
 0x4a0   : > { %v4372_v4 = vld [vmem:[%s8384_s5 + $0x360] sm:$0xff]  ;;  %v4373_v8 = vld [vmem:[%s8384_s5 + $0x368] sm:$0xff]  ;;  %v5919_v25 = vcombine.low %v4361_v0, %v4365_v2 }
 0x4a1   : > { %v5926_v10 = vcombine.high %v4368_v17, %v4372_v4  ;;  %v4376_v23 = vld [vmem:[%s8384_s5 + $0x380] sm:$0xff]  ;;  %v5925_v26 = vcombine.low %v4368_v17, %v4372_v4  ;;  %v5928_v27 = vcombine.high %v4369_v11, %v4373_v8  ;;  %v4377_v22 = vld [vmem:[%s8384_s5 + $0x388] sm:$0xff]  ;;  %v5927_v40 = vcombine.low %v4369_v11, %v4373_v8  ;;  %v4299_v4 = vld [vmem:[%s8384_s5 + $0x118] sm:$0xff] }
 0x4a2   : > { %5045 = vmatpush1.bf16.msra.mxu0 %v5869_v18  ;;  %5086 = vmatpush1.bf16.msra.mxu1 %v5871_v1  ;;  %v4380_v24 = vld [vmem:[%s8384_s5 + $0x3a0] sm:$0xff]  ;;  %v4381_v18 = vld [vmem:[%s8384_s5 + $0x3a8] sm:$0xff] }
 0x4a3   : > { %5046 = vmatprep.subr.bf16.mxu0 %v5878_v33  ;;  %5087 = vmatprep.subr.bf16.mxu1 %v5880_v38  ;;  %v5934_v29 = vcombine.high %v4376_v23, %v4380_v24  ;;  %v4384_v20 = vld [vmem:[%s8384_s5 + $0x3c0] sm:$0xff]  ;;  %v5933_v34 = vcombine.low %v4376_v23, %v4380_v24  ;;  %v5936_v3 = vcombine.high %v4377_v22, %v4381_v18  ;;  %v4385_v1 = vld [vmem:[%s8384_s5 + $0x3c8] sm:$0xff]  ;;  %v4266_v38 = vld [vmem:[%s8384_s5 + $0x10] sm:$0xff] }
 0x4a4   : > { %v4388_v33 = vld [vmem:[%s8384_s5 + $0x3e0] sm:$0xff]  ;;  %v5935_v42 = vcombine.low %v4377_v22, %v4381_v18  ;;  %v4307_v24 = vld [vmem:[%s8384_s5 + $0x158] sm:$0xff] }
 0x4a5   : > { %v5942_v28 = vcombine.high %v4384_v20, %v4388_v33  ;;  %v5941_v43 = vcombine.low %v4384_v20, %v4388_v33  ;;  %v4315_v33 = vld [vmem:[%s8384_s5 + $0x198] sm:$0xff] }
 0x4a6   : > { %5047 = vmatpush1.bf16.msra.mxu0 %v5877_v37  ;;  %5088 = vmatpush1.bf16.msra.mxu1 %v5879_v47  ;;  %v4389_v37 = vld [vmem:[%s8384_s5 + $0x3e8] sm:$0xff]  ;;  %v4267_v47 = vld [vmem:[%s8384_s5 + $0x18] sm:$0xff] }
 0x4a7   : > { %5048 = vmatprep.subr.bf16.mxu0 %v5886_v41  ;;  %5089 = vmatprep.subr.bf16.mxu1 %v5888_v30  ;;  %v4270_v41 = vld [vmem:[%s8384_s5 + $0x30] sm:$0xff]  ;;  %v5944_v44 = vcombine.high %v4385_v1, %v4389_v37  ;;  %v5943_v51 = vcombine.low %v4385_v1, %v4389_v37 }
 0x4a8   : > { %v5826_v45 = vcombine.high %v4266_v38, %v4270_v41  ;;  %v4274_v30 = vld [vmem:[%s8384_s5 + $0x50] sm:$0xff]  ;;  %v5825_v53 = vcombine.low %v4266_v38, %v4270_v41  ;;  %v4323_v41 = vld [vmem:[%s8384_s5 + $0x1d8] sm:$0xff] }
 0x4aa   : > { %5049 = vmatpush1.bf16.msra.mxu0 %v5885_v49  ;;  %5090 = vmatpush1.bf16.msra.mxu1 %v5887_v36  ;;  %v4271_v49 = vld [vmem:[%s8384_s5 + $0x38] sm:$0xff] }
 0x4ab   : > { %5050 = vmatprep.subr.bf16.mxu0 %v5894_v21  ;;  %5091 = vmatprep.subr.bf16.mxu1 %v5896_v56  ;;  %v4278_v21 = vld [vmem:[%s8384_s5 + $0x70] sm:$0xff]  ;;  %v5828_v55 = vcombine.high %v4267_v47, %v4271_v49  ;;  %v4279_v56 = vld [vmem:[%s8384_s5 + $0x78] sm:$0xff]  ;;  %v5827_v62 = vcombine.low %v4267_v47, %v4271_v49 }
 0x4ac   : > { %v5834_v36 = vcombine.high %v4274_v30, %v4278_v21  ;;  %v5833_v52 = vcombine.low %v4274_v30, %v4278_v21  ;;  %v4331_v21 = vld [vmem:[%s8384_s5 + $0x218] sm:$0xff] }
 0x4ae   : > { %5051 = vmatpush1.bf16.msra.mxu0 %v5893_v57  ;;  %5092 = vmatpush1.bf16.msra.mxu1 %v5895_v13  ;;  %v4275_v57 = vld [vmem:[%s8384_s5 + $0x58] sm:$0xff] }
 0x4af   : > { %5052 = vmatprep.subr.bf16.mxu0 %v5902_v59  ;;  %5093 = vmatprep.subr.bf16.mxu1 %v5904_v12  ;;  %v4286_v59 = vld [vmem:[%s8384_s5 + $0xb0] sm:$0xff]  ;;  %v5836_v60 = vcombine.high %v4275_v57, %v4279_v56  ;;  %v4283_v13 = vld [vmem:[%s8384_s5 + $0x98] sm:$0xff]  ;;  %v5835_v5 = vcombine.low %v4275_v57, %v4279_v56 }
 0x4b0   : > { %v5842_v63 = vcombine.high %v4282_v35, %v4286_v59  ;;  %v4290_v12 = vld [vmem:[%s8384_s5 + $0xd0] sm:$0xff]  ;;  %v5841_v46 = vcombine.low %v4282_v35, %v4286_v59  ;;  %v4339_v59 = vld [vmem:[%s8384_s5 + $0x258] sm:$0xff] }
 0x4b2   : > { %5053 = vmatpush1.bf16.msra.mxu0 %v5901_v19  ;;  %5094 = vmatpush1.bf16.msra.mxu1 %v5903_v48  ;;  %v4287_v19 = vld [vmem:[%s8384_s5 + $0xb8] sm:$0xff] }
 0x4b3   : > { %5054 = vmatprep.subr.bf16.mxu0 %v5910_v31  ;;  %5095 = vmatprep.subr.bf16.mxu1 %v5912_v16  ;;  %v4294_v31 = vld [vmem:[%s8384_s5 + $0xf0] sm:$0xff]  ;;  %v5844_v15 = vcombine.high %v4283_v13, %v4287_v19  ;;  %v4291_v48 = vld [vmem:[%s8384_s5 + $0xd8] sm:$0xff] }
 0x4b4   : > { %v5850_v39 = vcombine.high %v4290_v12, %v4294_v31  ;;  %v4298_v16 = vld [vmem:[%s8384_s5 + $0x110] sm:$0xff]  ;;  %v5849_v0 = vcombine.low %v4290_v12, %v4294_v31  ;;  %v4347_v31 = vld [vmem:[%s8384_s5 + $0x298] sm:$0xff] }
 0x4b6   : > { %5055 = vmatpush1.bf16.msra.mxu0 %v5909_v58  ;;  %5096 = vmatpush1.bf16.msra.mxu1 %v5911_v6  ;;  %v4295_v58 = vld [vmem:[%s8384_s5 + $0xf8] sm:$0xff] }
 0x4b7   : > { %5056 = vmatprep.subr.bf16.mxu0 %v5918_v61  ;;  %5097 = vmatprep.subr.bf16.mxu1 %v5920_v9  ;;  %v5843_v61 = vcombine.low %v4283_v13, %v4287_v19  ;;  %v5852_v2 = vcombine.high %v4291_v48, %v4295_v58  ;;  %v4303_v6 = vld [vmem:[%s8384_s5 + $0x138] sm:$0xff]  ;;  %v4310_v9 = vld [vmem:[%s8384_s5 + $0x170] sm:$0xff] }
 0x4b8   : > { %v5860_v8 = vcombine.high %v4299_v4, %v4303_v6 }
 0x4ba   : > { %5057 = vmatpush1.bf16.msra.mxu0 %v5917_v7  ;;  %5098 = vmatpush1.bf16.msra.mxu1 %v5919_v25  ;;  %v4306_v7 = vld [vmem:[%s8384_s5 + $0x150] sm:$0xff]  ;;  %v4311_v25 = vld [vmem:[%s8384_s5 + $0x178] sm:$0xff] }
 0x4bb   : > { %5058 = vmatprep.subr.bf16.mxu0 %v5926_v10  ;;  %5099 = vmatprep.subr.bf16.mxu1 %v5928_v27  ;;  %v5851_v10 = vcombine.low %v4291_v48, %v4295_v58  ;;  %v5866_v23 = vcombine.high %v4306_v7, %v4310_v9  ;;  %v4318_v27 = vld [vmem:[%s8384_s5 + $0x1b0] sm:$0xff]  ;;  %v5865_v22 = vcombine.low %v4306_v7, %v4310_v9  ;;  %v4363_v9 = vld [vmem:[%s8384_s5 + $0x318] sm:$0xff] }
 0x4bc   : > { %v5868_v18 = vcombine.high %v4307_v24, %v4311_v25 }
 0x4be   : > { %5059 = vmatpush1.bf16.msra.mxu0 %v5925_v26  ;;  %5100 = vmatpush1.bf16.msra.mxu1 %v5927_v40  ;;  %v4314_v26 = vld [vmem:[%s8384_s5 + $0x190] sm:$0xff]  ;;  %v4319_v40 = vld [vmem:[%s8384_s5 + $0x1b8] sm:$0xff] }
 0x4bf   : > { %5060 = vmatprep.subr.bf16.mxu0 %v5934_v29  ;;  %5101 = vmatprep.subr.bf16.mxu1 %v5936_v3  ;;  %v5859_v29 = vcombine.low %v4299_v4, %v4303_v6  ;;  %v5874_v20 = vcombine.high %v4314_v26, %v4318_v27  ;;  %v4326_v3 = vld [vmem:[%s8384_s5 + $0x1f0] sm:$0xff]  ;;  %v5873_v1 = vcombine.low %v4314_v26, %v4318_v27  ;;  %v4371_v27 = vld [vmem:[%s8384_s5 + $0x358] sm:$0xff] }
 0x4c0   : > { %v5876_v37 = vcombine.high %v4315_v33, %v4319_v40 }
 0x4c2   : > { %5061 = vmatpush1.bf16.msra.mxu0 %v5933_v34  ;;  %5102 = vmatpush1.bf16.msra.mxu1 %v5935_v42  ;;  %v4322_v34 = vld [vmem:[%s8384_s5 + $0x1d0] sm:$0xff]  ;;  %v4327_v42 = vld [vmem:[%s8384_s5 + $0x1f8] sm:$0xff] }
 0x4c3   : > { %5062 = vmatprep.subr.bf16.mxu0 %v5942_v28  ;;  %5103 = vmatprep.subr.bf16.mxu1 %v5944_v44  ;;  %v5867_v28 = vcombine.low %v4307_v24, %v4311_v25  ;;  %v5882_v38 = vcombine.high %v4322_v34, %v4326_v3  ;;  %v4334_v44 = vld [vmem:[%s8384_s5 + $0x230] sm:$0xff]  ;;  %v5881_v47 = vcombine.low %v4322_v34, %v4326_v3  ;;  %v4379_v3 = vld [vmem:[%s8384_s5 + $0x398] sm:$0xff] }
 0x4c4   : > { %v5884_v49 = vcombine.high %v4323_v41, %v4327_v42 }
 0x4c6   : > { %5063 = vmatpush1.bf16.msra.mxu0 %v5941_v43  ;;  %5104 = vmatpush1.bf16.msra.mxu1 %v5943_v51  ;;  %v4330_v43 = vld [vmem:[%s8384_s5 + $0x210] sm:$0xff]  ;;  %v4335_v51 = vld [vmem:[%s8384_s5 + $0x238] sm:$0xff] }
 0x4c7   : > { %5114 = vmatprep.subr.bf16.mxu0 %v5826_v45  ;;  %5155 = vmatprep.subr.bf16.mxu1 %v5828_v55  ;;  %v5875_v45 = vcombine.low %v4315_v33, %v4319_v40  ;;  %v5890_v30 = vcombine.high %v4330_v43, %v4334_v44  ;;  %v4342_v55 = vld [vmem:[%s8384_s5 + $0x270] sm:$0xff]  ;;  %v5889_v57 = vcombine.low %v4330_v43, %v4334_v44  ;;  %v4387_v44 = vld [vmem:[%s8384_s5 + $0x3d8] sm:$0xff] }
 0x4c8   : > { %v5892_v56 = vcombine.high %v4331_v21, %v4335_v51 }
 0x4c9   : > { %5065 = vmatmul.mubr.bf16.vlgmr.msra.gmra.mrb[0].mxu0 %v8173_v50  ;;  %5106 = vmatmul.mubr.bf16.vlgmr.msra.gmra.mrb[0].mxu1 %v8173_v50 }
 0x4ca   : > { %5115 = vmatpush1.bf16.msra.mxu0 %v5825_v53  ;;  %5146 = vmatprep.mubr.bf16.mxu0 %v7981_v32  ;;  %v4338_v53 = vld [vmem:[%s8384_s5 + $0x250] sm:$0xff] }
 0x4cb   : > { %5116 = vmatprep.subr.bf16.mxu0 %v5834_v36  ;;  %5156 = vmatpush1.bf16.msra.mxu1 %v5827_v62  ;;  %v5883_v36 = vcombine.low %v4323_v41, %v4327_v42  ;;  %v5898_v35 = vcombine.high %v4338_v53, %v4342_v55  ;;  %v4343_v62 = vld [vmem:[%s8384_s5 + $0x278] sm:$0xff]  ;;  %v5897_v13 = vcombine.low %v4338_v53, %v4342_v55 }
 0x4cc   : > { %5187 = vmatprep.mubr.bf16.mxu1 %v7981_v32  ;;  %5157 = vmatprep.subr.bf16.mxu1 %v5836_v60  ;;  %v4302_v32 = vld [vmem:[%s8384_s5 + $0x130] sm:$0xff]  ;;  %v5900_v19 = vcombine.high %v4339_v59, %v4343_v62 }
 0x4cd   : > { %v5858_v17 = vcombine.high %v4298_v16, %v4302_v32  ;;  %v5857_v11 = vcombine.low %v4298_v16, %v4302_v32  ;;  %v4350_v60 = vld [vmem:[%s8384_s5 + $0x2b0] sm:$0xff]  ;;  %v4355_v32 = vld [vmem:[%s8384_s5 + $0x2d8] sm:$0xff] }
 0x4ce   : > { %5117 = vmatpush1.bf16.msra.mxu0 %v5833_v52  ;;  %v4346_v52 = vld [vmem:[%s8384_s5 + $0x290] sm:$0xff] }
 0x4cf   : > { %5118 = vmatprep.subr.bf16.mxu0 %v5842_v63  ;;  %5158 = vmatpush1.bf16.msra.mxu1 %v5835_v5  ;;  %v5891_v63 = vcombine.low %v4331_v21, %v4335_v51  ;;  %v5906_v12 = vcombine.high %v4346_v52, %v4350_v60  ;;  %v4351_v5 = vld [vmem:[%s8384_s5 + $0x2b8] sm:$0xff]  ;;  %v5905_v48 = vcombine.low %v4346_v52, %v4350_v60  ;;  %v5200_v51 = vld [vmem:[%s5199_s14] sm:$0xff] }
 0x4d0   : > { %5159 = vmatprep.subr.bf16.mxu1 %v5844_v15  ;;  %v4358_v15 = vld [vmem:[%s8384_s5 + $0x2f0] sm:$0xff]  ;;  %v5908_v58 = vcombine.high %v4347_v31, %v4351_v5  ;;  %v5202_v53 = vunpack.c.l.bf16 %v5200_v51  ;;  %v5203_v55 = vunpack.c.h.bf16 %v5200_v51 }
 0x4d2   : > { %5119 = vmatpush1.bf16.msra.mxu0 %v5841_v46  ;;  %v4354_v46 = vld [vmem:[%s8384_s5 + $0x2d0] sm:$0xff] }
 0x4d3   : > { %5120 = vmatprep.subr.bf16.mxu0 %v5850_v39  ;;  %5160 = vmatpush1.bf16.msra.mxu1 %v5843_v61  ;;  %v5899_v39 = vcombine.low %v4339_v59, %v4343_v62  ;;  %v5914_v16 = vcombine.high %v4354_v46, %v4358_v15  ;;  %v4359_v61 = vld [vmem:[%s8384_s5 + $0x2f8] sm:$0xff]  ;;  %v5913_v4 = vcombine.low %v4354_v46, %v4358_v15 }
 0x4d4   : > { %5161 = vmatprep.subr.bf16.mxu1 %v5852_v2  ;;  %v4366_v2 = vld [vmem:[%s8384_s5 + $0x330] sm:$0xff]  ;;  %v5916_v6 = vcombine.high %v4355_v32, %v4359_v61 }
 0x4d6   : > { %5121 = vmatpush1.bf16.msra.mxu0 %v5849_v0  ;;  %v4362_v0 = vld [vmem:[%s8384_s5 + $0x310] sm:$0xff] }
 0x4d7   : > { %5122 = vmatprep.subr.bf16.mxu0 %v5858_v17  ;;  %5162 = vmatpush1.bf16.msra.mxu1 %v5851_v10  ;;  %v5907_v17 = vcombine.low %v4347_v31, %v4351_v5  ;;  %v5922_v7 = vcombine.high %v4362_v0, %v4366_v2  ;;  %v4367_v10 = vld [vmem:[%s8384_s5 + $0x338] sm:$0xff]  ;;  %v5921_v24 = vcombine.low %v4362_v0, %v4366_v2 }
 0x4d8   : > { %5163 = vmatprep.subr.bf16.mxu1 %v5860_v8  ;;  %v4374_v8 = vld [vmem:[%s8384_s5 + $0x370] sm:$0xff]  ;;  %v5924_v25 = vcombine.high %v4363_v9, %v4367_v10 }
 0x4da   : > { %5123 = vmatpush1.bf16.msra.mxu0 %v5857_v11  ;;  %v4370_v11 = vld [vmem:[%s8384_s5 + $0x350] sm:$0xff] }
 0x4db   : > { %5124 = vmatprep.subr.bf16.mxu0 %v5866_v23  ;;  %5164 = vmatpush1.bf16.msra.mxu1 %v5859_v29  ;;  %v5915_v23 = vcombine.low %v4355_v32, %v4359_v61  ;;  %v5930_v26 = vcombine.high %v4370_v11, %v4374_v8  ;;  %v4375_v29 = vld [vmem:[%s8384_s5 + $0x378] sm:$0xff]  ;;  %v5929_v33 = vcombine.low %v4370_v11, %v4374_v8  ;;  %v5213_v8 = vld [vmem:[%s5212_s21 + $0x10] sm:$0xff] }
 0x4dc   : > { %5165 = vmatprep.subr.bf16.mxu1 %v5868_v18  ;;  %v4382_v18 = vld [vmem:[%s8384_s5 + $0x3b0] sm:$0xff]  ;;  %v5932_v40 = vcombine.high %v4371_v27, %v4375_v29 }
 0x4de   : > { %5125 = vmatpush1.bf16.msra.mxu0 %v5865_v22  ;;  %v4378_v22 = vld [vmem:[%s8384_s5 + $0x390] sm:$0xff] }
 0x4df   : > { %5126 = vmatprep.subr.bf16.mxu0 %v5874_v20  ;;  %5166 = vmatpush1.bf16.msra.mxu1 %v5867_v28  ;;  %v5923_v20 = vcombine.low %v4363_v9, %v4367_v10  ;;  %v5938_v34 = vcombine.high %v4378_v22, %v4382_v18  ;;  %v4383_v28 = vld [vmem:[%s8384_s5 + $0x3b8] sm:$0xff]  ;;  %v5937_v41 = vcombine.low %v4378_v22, %v4382_v18 }
 0x4e0   : > { %5167 = vmatprep.subr.bf16.mxu1 %v5876_v37  ;;  %v4390_v37 = vld [vmem:[%s8384_s5 + $0x3f0] sm:$0xff]  ;;  %v5940_v42 = vcombine.high %v4379_v3, %v4383_v28 }
 0x4e2   : > { %5127 = vmatpush1.bf16.msra.mxu0 %v5873_v1  ;;  %v4386_v1 = vld [vmem:[%s8384_s5 + $0x3d0] sm:$0xff] }
 0x4e3   : > { %5128 = vmatprep.subr.bf16.mxu0 %v5882_v38  ;;  %5168 = vmatpush1.bf16.msra.mxu1 %v5875_v45  ;;  %v5931_v38 = vcombine.low %v4371_v27, %v4375_v29  ;;  %v5946_v43 = vcombine.high %v4386_v1, %v4390_v37  ;;  %v4391_v45 = vld [vmem:[%s8384_s5 + $0x3f8] sm:$0xff] }
 0x4e4   : > { %5169 = vmatprep.subr.bf16.mxu1 %v5884_v49  ;;  %v5945_v49 = vcombine.low %v4386_v1, %v4390_v37  ;;  %v5947_v21 = vcombine.low %v4387_v44, %v4391_v45 }
 0x4e6   : > { %5129 = vmatpush1.bf16.msra.mxu0 %v5881_v47  ;;  %v5939_v47 = vcombine.low %v4379_v3, %v4383_v28 }
 0x4e7   : > { %5130 = vmatprep.subr.bf16.mxu0 %v5890_v30  ;;  %5170 = vmatpush1.bf16.msra.mxu1 %v5883_v36  ;;  %v5948_v30 = vcombine.high %v4387_v44, %v4391_v45 }
 0x4e8   : > { %5171 = vmatprep.subr.bf16.mxu1 %v5892_v56 }
 0x4ea   : > { %5131 = vmatpush1.bf16.msra.mxu0 %v5889_v57  ;;  %v5201_v57 = vld [vmem:[%s5199_s14 + $0x8] sm:$0xff] }
 0x4eb   : > { %5132 = vmatprep.subr.bf16.mxu0 %v5898_v35  ;;  %5172 = vmatpush1.bf16.msra.mxu1 %v5891_v63  ;;  %v5205_v46 = vunpack.c.h.bf16 %v5201_v57 }
 0x4ec   : > { %5173 = vmatprep.subr.bf16.mxu1 %v5900_v19 }
 0x4ee   : > { %5133 = vmatpush1.bf16.msra.mxu0 %v5897_v13  ;;  %v5204_v13 = vunpack.c.l.bf16 %v5201_v57 }
 0x4ef   : > { %5134 = vmatprep.subr.bf16.mxu0 %v5906_v12  ;;  %5174 = vmatpush1.bf16.msra.mxu1 %v5899_v39 }
 0x4f0   : > { %5175 = vmatprep.subr.bf16.mxu1 %v5908_v58 }
 0x4f2   : > { %5135 = vmatpush1.bf16.msra.mxu0 %v5905_v48 }
 0x4f3   : > { %5136 = vmatprep.subr.bf16.mxu0 %v5914_v16  ;;  %5176 = vmatpush1.bf16.msra.mxu1 %v5907_v17 }
 0x4f4   : > { %5177 = vmatprep.subr.bf16.mxu1 %v5916_v6 }
 0x4f6   : > { %5137 = vmatpush1.bf16.msra.mxu0 %v5913_v4 }
 0x4f7   : > { %5138 = vmatprep.subr.bf16.mxu0 %v5922_v7  ;;  %5178 = vmatpush1.bf16.msra.mxu1 %v5915_v23  ;;  %v5215_v23 = vunpack.c.l.bf16 %v5213_v8 }
 0x4f8   : > { %5179 = vmatprep.subr.bf16.mxu1 %v5924_v25 }
 0x4fa   : > { %5139 = vmatpush1.bf16.msra.mxu0 %v5921_v24  ;;  %v5216_v24 = vunpack.c.h.bf16 %v5213_v8 }
 0x4fb   : > { %5140 = vmatprep.subr.bf16.mxu0 %v5930_v26  ;;  %5180 = vmatpush1.bf16.msra.mxu1 %v5923_v20  ;;  %v5214_v26 = vld [vmem:[%s5212_s21 + $0x18] sm:$0xff] }
 0x4fc   : > { %5181 = vmatprep.subr.bf16.mxu1 %v5932_v40 }
 0x4fe   : > { %5141 = vmatpush1.bf16.msra.mxu0 %v5929_v33 }
 0x4ff   : > { %5142 = vmatprep.subr.bf16.mxu0 %v5938_v34  ;;  %5182 = vmatpush1.bf16.msra.mxu1 %v5931_v38  ;;  %v5217_v34 = vunpack.c.l.bf16 %v5214_v26 }
 0x500   : > { %5183 = vmatprep.subr.bf16.mxu1 %v5940_v42 }
 0x502   : > { %5143 = vmatpush1.bf16.msra.mxu0 %v5937_v41  ;;  %v5218_v41 = vunpack.c.h.bf16 %v5214_v26 }
 0x503   : > { %5144 = vmatprep.subr.bf16.mxu0 %v5946_v43  ;;  %5184 = vmatpush1.bf16.msra.mxu1 %v5939_v47 }
 0x504   : > { %5185 = vmatprep.subr.bf16.mxu1 %v5948_v30 }
 0x506   : > { %5145 = vmatpush1.bf16.msra.mxu0 %v5945_v49 }
 0x507   : > { %5186 = vmatpush1.bf16.msra.mxu1 %v5947_v21 }
 0x509   : > { %5147 = vmatmul.mubr.bf16.vlgmr.msra.gmra.mrb[4].mxu0 %v8173_v50 }
 0x50a   : > { %5188 = vmatmul.mubr.bf16.vlgmr.msra.gmra.mrb[4].mxu1 %v8173_v50 }
 0x59c   : > { %v5066_v36 = vpop.f32.mrb[0].mxu0  ;;  %v5107_v63 = vpop.f32.mrb[0].mxu1 }
 0x59d   : > { %v5206_v56 = vadd.f32 %v5202_v53, %v5066_v36  ;;  %v5068_v35 = vpop.f32.mrb[1].mxu0  ;;  %v5109_v12 = vpop.f32.mrb[1].mxu1  ;;  %v5208_v5 = vadd.f32 %v5204_v13, %v5107_v63 }
 0x59e   : > { %v5207_v59 = vadd.f32 %v5203_v55, %v5068_v35  ;;  %v5070_v62 = vpop.f32.mrb[2].mxu0  ;;  %v5111_v31 = vpop.f32.mrb[2].mxu1  ;;  %v5209_v39 = vadd.f32 %v5205_v46, %v5109_v12 }
 0x59f   : > { %v5953_v52 = vmul.f32 -1.442695, %v5206_v56  ;;  %v5071_v60 = vpop.f32.mrb[3].mxu0  ;;  %v5112_v50 = vpop.f32.mrb[3].mxu1  ;;  %v5955_v15 = vmul.f32 -1.442695, %v5208_v5 }
 0x5a0   : > { %v5954_v19 = vmul.f32 -1.442695, %v5207_v59 }
 0x5a1   : > { %6244 = vpow2.f32 %v5953_v52 }
 0x5a2   : > { %6246 = vpow2.f32 %v5954_v19 }
 0x5a3   : > { %6248 = vpow2.f32 %v5955_v15 }
 0x5a4   : > { %6250 = vtanh.f32 %v5209_v39 }
 0x5ab   : > { %v6245_v48 = vpop.eup %6244 }
 0x5ac   : > { %v6247_v58 = vpop.eup %6246  ;;  %v5232_v16 = vadd.f32 1.0, %v6245_v48 }
 0x5ad   : > { %v5233_v32 = vadd.f32 1.0, %v6247_v58  ;;  %v6249_v61 = vpop.eup %6248 }
 0x5ae   : > { %6252 = vrcp.f32 %v5232_v16  ;;  %v6251_v0 = vpop.eup %6250  ;;  %v5234_v17 = vadd.f32 1.0, %v6249_v61 }
 0x5af   : > { %6254 = vrcp.f32 %v5233_v32 }
 0x5b0   : > { %6256 = vrcp.f32 %v5234_v17 }
 0x5b8   : > { %v6253_v2 = vpop.eup %6252 }
 0x5b9   : > { %v6255_v4 = vpop.eup %6254  ;;  %v5261_v6 = vmul.f32 %v6253_v2, %v6251_v0 }
 0x5ba   : > { %v5259_v7 = vmul.f32 %v6342_v54, %v6255_v4  ;;  %v6257_v9 = vpop.eup %6256 }
 0x5bc   : > { %v5262_v54 = vadd.f32 %v5261_v6, %v5259_v7  }
 0x5be   : > { %6258 = vtanh.f32 %v5262_v54 }
 0x5c8   : > { %v6259_v10 = vpop.eup %6258 }
 0x5c9   : > { %v5268_v35 = vmul.f32 %v6259_v10, %v6257_v9  }
 0x5cb   : > { %v5271_v11 = vpack.c.bf16 %v5268_v35, %v5268_v35 }
 0x5cd   : > { %5275 = vst [vmem:[%s5274_s18] sm:$0xf] %v5271_v11 }
 0x5dc   : > { %v5148_v25 = vpop.f32.mrb[4].mxu0 }
 0x5dd   : > { %v5219_v27 = vadd.f32 %v5215_v23, %v5148_v25  ;;  %v5150_v29 = vpop.f32.mrb[5].mxu0  ;;  %v5189_v40 = vpop.f32.mrb[4].mxu1 }
 0x5de   : > { %v5220_v22 = vadd.f32 %v5216_v24, %v5150_v29  ;;  %v5152_v18 = vpop.f32.mrb[6].mxu0  ;;  %v5191_v28 = vpop.f32.mrb[5].mxu1  ;;  %v5221_v38 = vadd.f32 %v5217_v34, %v5189_v40 }
 0x5df   : > { %v5956_v20 = vmul.f32 -1.442695, %v5219_v27  ;;  %v5153_v33 = vpop.f32.mrb[7].mxu0  ;;  %v5193_v1 = vpop.f32.mrb[6].mxu1  ;;  %v5222_v43 = vadd.f32 %v5218_v41, %v5191_v28 }
 0x5e0   : > { %v5957_v3 = vmul.f32 -1.442695, %v5220_v22  ;;  %v5194_v37 = vpop.f32.mrb[7].mxu1  ;;  %v5958_v42 = vmul.f32 -1.442695, %v5221_v38 }
 0x5e1   : > { %6260 = vpow2.f32 %v5956_v20 }
 0x5e2   : > { %6262 = vpow2.f32 %v5957_v3 }
 0x5e3   : > { %6264 = vpow2.f32 %v5958_v42 }
 0x5e4   : > { %6266 = vtanh.f32 %v5222_v43 }
 0x5eb   : > { %v6261_v44 = vpop.eup %6260 }
 0x5ec   : > { %v6263_v45 = vpop.eup %6262  ;;  %v5250_v47 = vadd.f32 1.0, %v6261_v44 }
 0x5ed   : > { %v5251_v49 = vadd.f32 1.0, %v6263_v45  ;;  %v6265_v30 = vpop.eup %6264 }
 0x5ee   : > { %6268 = vrcp.f32 %v5250_v47  ;;  %v6267_v21 = vpop.eup %6266  ;;  %v5252_v53 = vadd.f32 1.0, %v6265_v30 }
 0x5ef   : > { %6270 = vrcp.f32 %v5251_v49 }
 0x5f0   : > { %6272 = vrcp.f32 %v5252_v53 }
 0x5f8   : > { %v6269_v51 = vpop.eup %6268 }
 0x5f9   : > { %v6271_v55 = vpop.eup %6270  ;;  %v5265_v36 = vmul.f32 %v6269_v51, %v6267_v21 }
 0x5fa   : > { %v5263_v57 = vmul.f32 %v6338_v14, %v6271_v55  ;;  %v6273_v56 = vpop.eup %6272 }
 0x5fc   : > { %v5266_v14 = vadd.f32 %v5265_v36, %v5263_v57  }
 0x5fe   : > { %6274 = vtanh.f32 %v5266_v14 }
 0x607   :  { %4256 = sbr.rel (!%p4254_p1) target bundleno = 1157 (0x485), region = 81 }
 0x608   : > { %v6275_v59 = vpop.eup %6274 }
 0x609   : > { %v5270_v34 = vmul.f32 %v6275_v59, %v6273_v56  }
 0x60b   : > { %v5276_v62 = vpack.c.bf16 %v5270_v34, %v5270_v34 }
 0x60d   : > { %5280 = vst [vmem:[%s5279_s24 + $0x4] sm:$0xf] %v5276_v62 }

</bundles_post_ra>
